<compile_context>
chip_gen: v7x
topology: tpu7x:2x2x1
jax: 0.10.0
libtpu: 0.0.40
codegen_flags: <defaults>
</compile_context>

<pallas_src>
import math
from functools import partial

import jax
import jax.numpy as jnp
from jax.experimental import pallas as pl
from jax.experimental.pallas import tpu as pltpu

_BN_EPS = 1e-5


# -----------------------------------------------------------------------------
# small helpers
# -----------------------------------------------------------------------------
def _round_up(x, m):
    return ((x + m - 1) // m) * m


def bn_eval(x):
    # torch.nn.BatchNorm1d at init in eval(): running_mean=0, running_var=1,
    # weight=1, bias=0  ->  y = x / sqrt(1 + eps)
    return x * (1.0 / math.sqrt(1.0 + _BN_EPS))


def prelu(x, a=0.25):
    # nn.PReLU() default init 0.25
    return jnp.where(x >= 0, x, a * x)


def make_act(name):
    if name == "sigmoid":
        return jax.nn.sigmoid
    if name == "relu":
        return lambda x: jnp.maximum(x, 0.0)
    if name == "leaky_relu":
        return lambda x: jnp.where(x >= 0, x, 0.2 * x)
    raise ValueError(name)


# -----------------------------------------------------------------------------
# Pallas kernel 1: tiled linear  out = x @ w + b
# -----------------------------------------------------------------------------
def _linear_kernel(x_ref, w_ref, b_ref, o_ref):
    acc = jnp.dot(x_ref[...], w_ref[...], preferred_element_type=jnp.float32)
    o_ref[...] = (acc + b_ref[...].astype(jnp.float32)).astype(o_ref.dtype)


def linear_pallas(x, w, b=None, *, tile_m=256):
    """x: (M, K), w: (K, N), b: (N,) or None -> (M, N)."""
    m, k = x.shape
    k2, n = w.shape
    assert k == k2
    dt = x.dtype
    if b is None:
        b = jnp.zeros((n,), dtype=dt)

    # Lane-dense output: pad out_features to a multiple of 128 -> unmasked vst.
    n_pad = _round_up(n, 128)
    if n_pad != n:
        w = jnp.pad(w, ((0, 0), (0, n_pad - n)))
        b = jnp.pad(b, ((0, n_pad - n),))
    b2 = b.reshape(1, n_pad).astype(dt)

    # Tile / pad the batch (rows) dimension.
    tm = min(tile_m, _round_up(m, 8))
    m_pad = _round_up(m, tm)
    if m_pad != m:
        x = jnp.pad(x, ((0, m_pad - m), (0, 0)))
    tn = n_pad if n_pad <= 512 else 128  # n_pad is a multiple of 128

    # TODO(synk): K is kept whole per block (fine for GAMLP-sized layers); very
    # large in_features would want a third "arbitrary" grid axis + f32 scratch.
    cost = pl.CostEstimate(
        flops=2 * m_pad * k * n_pad,
        transcendentals=0,
        bytes_accessed=(m_pad * k + k * n_pad + n_pad + m_pad * n_pad) * dt.itemsize,
    )

    out = pl.pallas_call(
        _linear_kernel,
        out_shape=jax.ShapeDtypeStruct((m_pad, n_pad), dt),
        grid_spec=pltpu.PrefetchScalarGridSpec(
            num_scalar_prefetch=0,
            grid=(m_pad // tm, n_pad // tn),
            in_specs=[
                pl.BlockSpec((tm, k), lambda i, j: (i, 0)),
                pl.BlockSpec((k, tn), lambda i, j: (0, j)),
                pl.BlockSpec((1, tn), lambda i, j: (0, j)),
            ],
            out_specs=pl.BlockSpec((tm, tn), lambda i, j: (i, j)),
        ),
        compiler_params=pltpu.CompilerParams(
            dimension_semantics=("parallel", "parallel"),
            vmem_limit_bytes=32 * 1024 * 1024,
        ),
        cost_estimate=cost,
    )(x, w, b2)
    return out[:m, :n]


# -----------------------------------------------------------------------------
# Pallas kernel 2: fused GAMLP hop attention + softmax + weighted aggregation
# -----------------------------------------------------------------------------
def _make_att_agg_kernel(act_fn):
    def kernel(feats_ref, jk_ref, w_x_ref, w_jk_ref, b_ref, out_ref):
        f32 = jnp.float32
        # For bf16 inputs one would keep feats in bf16 on the VPU and only
        # accumulate in f32; inputs here are f32 so these casts are no-ops.
        feats = feats_ref[...].astype(f32)      # (H, TB, D)  hop axis leading
        jk = jk_ref[...].astype(f32)            # (TB, DR)
        w_x = w_x_ref[...].astype(f32)          # (1, D)
        w_jk = w_jk_ref[...].astype(f32)        # (1, DR)
        b = b_ref[...].astype(f32)              # (1, 1)

        # per-node attention logit for each hop: (H, TB, 1)
        jk_score = jnp.sum(jk * w_jk, axis=-1, keepdims=True)                 # (TB, 1)
        hop_score = jnp.sum(feats * w_x[None, :, :], axis=-1, keepdims=True)  # (H, TB, 1)
        logits = act_fn(hop_score + jk_score[None, :, :] + b[None, :, :])

        # softmax over the leading hop axis -> pure VPU (no cross-sublane XLU)
        m = jnp.max(logits, axis=0, keepdims=True)
        e = jnp.exp(logits - m)
        w = e / jnp.sum(e, axis=0, keepdims=True)                             # (H, TB, 1)

        # attention-weighted hop sum; reduction over leading axis = VPU adds
        out_ref[...] = jnp.sum(feats * w, axis=0).astype(out_ref.dtype)       # (TB, D)

    return kernel


def gamlp_attention_aggregate(feats_stacked, jk_ref, att_w, att_b, *, act_fn,
                              target_tile_bytes=2 * 1024 * 1024):
    """feats_stacked: (H, N, D), jk_ref: (N, DR), att_w: (DR + D,), att_b: scalar."""
    h, n, d = feats_stacked.shape
    n2, dr = jk_ref.shape
    assert n == n2 and att_w.shape == (dr + d,)
    dt = feats_stacked.dtype

    w_jk = att_w[:dr].reshape(1, dr).astype(dt)
    w_x = att_w[dr:].reshape(1, d).astype(dt)
    b = jnp.asarray(att_b, dtype=dt).reshape(1, 1)

    # Lane-dense feature dims (multiple of 128) -> unmasked full-lane stores.
    d_pad = _round_up(d, 128)
    dr_pad = _round_up(dr, 128)
    if d_pad != d:
        feats_stacked = jnp.pad(feats_stacked, ((0, 0), (0, 0), (0, d_pad - d)))
        w_x = jnp.pad(w_x, ((0, 0), (0, d_pad - d)))
    if dr_pad != dr:
        jk_ref = jnp.pad(jk_ref, ((0, 0), (0, dr_pad - dr)))
        w_jk = jnp.pad(w_jk, ((0, 0), (0, dr_pad - dr)))

    # Batch tile sized for ~2 MiB of hop features per grid step: roofline-sized
    # and comfortably inside default scoped VMEM (double-buffered) on
    # v5e / v6e / v7x.  Remainder handled by zero-padding + slicing back.
    itemsize = dt.itemsize
    tb = (target_tile_bytes // max(1, h * d_pad * itemsize)) // 8 * 8
    tb = max(8, min(2048, tb))
    tb = min(tb, _round_up(n, 8))
    n_pad = _round_up(n, tb)
    if n_pad != n:
        feats_stacked = jnp.pad(feats_stacked, ((0, 0), (0, n_pad - n), (0, 0)))
        jk_ref = jnp.pad(jk_ref, ((0, n_pad - n), (0, 0)))

    cost = pl.CostEstimate(
        flops=4 * h * n_pad * d_pad + 2 * n_pad * dr_pad + 6 * h * n_pad,
        transcendentals=h * n_pad,
        bytes_accessed=(h * n_pad * d_pad + n_pad * dr_pad + d_pad + dr_pad + 1
                        + n_pad * d_pad) * itemsize,
    )

    out = pl.pallas_call(
        _make_att_agg_kernel(act_fn),
        out_shape=jax.ShapeDtypeStruct((n_pad, d_pad), dt),
        grid_spec=pltpu.PrefetchScalarGridSpec(
            num_scalar_prefetch=0,
            grid=(n_pad // tb,),
            in_specs=[
                # all hops for the current batch tile; last two dims (TB, D)
                pl.BlockSpec((h, tb, d_pad), lambda i: (0, i, 0)),
                pl.BlockSpec((tb, dr_pad), lambda i: (i, 0)),
                # attention parameters stay resident across batch tiles
                pl.BlockSpec((1, d_pad), lambda i: (0, 0)),
                pl.BlockSpec((1, dr_pad), lambda i: (0, 0)),
                pl.BlockSpec((1, 1), lambda i: (0, 0)),
            ],
            out_specs=pl.BlockSpec((tb, d_pad), lambda i: (i, 0)),
        ),
        compiler_params=pltpu.CompilerParams(
            # fine-grained batch-tile axis -> near-perfect 2-TC balance on v7x
            dimension_semantics=("parallel",),
            vmem_limit_bytes=32 * 1024 * 1024,
        ),
        cost_estimate=cost,
    )(feats_stacked, jk_ref, w_x, w_jk, b)
    return out[:n, :d]


# -----------------------------------------------------------------------------
# parameter construction (deterministic, mirroring the PyTorch init schemes)
# -----------------------------------------------------------------------------
def _uniform(key, shape, bound):
    return jax.random.uniform(key, shape, jnp.float32, -bound, bound)


def _xavier(key, shape, gain=1.0):
    fan_in, fan_out = shape
    bound = gain * math.sqrt(6.0 / (fan_in + fan_out))
    return _uniform(key, shape, bound)


def ffn_dims(in_dim, hidden, out_dim, n_layers):
    if n_layers == 1:
        return [in_dim, out_dim]
    return [in_dim] + [hidden] * (n_layers - 1) + [out_dim]


def init_ffn(key, dims, bns):
    gain = math.sqrt(2.0)  # calculate_gain('relu')
    keys = jax.random.split(key, len(dims) - 1)
    layers = []
    for i in range(len(dims) - 1):
        w = _xavier(keys[i], (dims[i], dims[i + 1]), gain)
        bb = jnp.zeros((dims[i + 1],), jnp.float32)
        layers.append((w, bb))
    return {"layers": layers, "bns": bns}


def init_ffnii(key, feat_dim, hidden, out_feats, n_layers, bns):
    keys = jax.random.split(key, n_layers)
    layers = []
    if n_layers == 1:
        layers.append(_uniform(keys[0], (feat_dim, out_feats), 1.0 / math.sqrt(out_feats)))
    else:
        layers.append(_uniform(keys[0], (feat_dim, hidden), 1.0 / math.sqrt(hidden)))
        for i in range(n_layers - 2):
            layers.append(_uniform(keys[i + 1], (hidden, hidden), 1.0 / math.sqrt(hidden)))
        layers.append(_uniform(keys[n_layers - 1], (hidden, out_feats),
                               1.0 / math.sqrt(out_feats)))
    return {"layers": layers, "bns": bns}


def init_params(key, feat_dim, hidden, nclass, num_hops,
                n_layers_1, n_layers_2, n_layers_3, bns=False):
    ks = jax.random.split(key, num_hops + 5)
    gain = math.sqrt(2.0)
    process = [init_ffn(ks[i], ffn_dims(feat_dim, hidden, hidden, 2), bns)
               for i in range(num_hops)]
    lr_jk_ref = init_ffnii(ks[num_hops], num_hops * hidden, hidden, hidden, n_layers_1, bns)
    att_in = hidden + hidden
    lr_att = {
        "w": _uniform(ks[num_hops + 1], (att_in,), gain * math.sqrt(6.0 / (att_in + 1))),
        "b": jnp.zeros((), jnp.float32),
    }
    lr_output = init_ffnii(ks[num_hops + 2], hidden, hidden, nclass, n_layers_2, bns)
    label_fc = init_ffn(ks[num_hops + 3], ffn_dims(nclass, hidden, nclass, n_layers_3), True)
    res_fc = _xavier(ks[num_hops + 4], (feat_dim, hidden), gain)
    return dict(process=process, lr_jk_ref=lr_jk_ref, lr_att=lr_att,
                lr_output=lr_output, label_fc=label_fc, res_fc=res_fc)


# -----------------------------------------------------------------------------
# module forward (eval mode).  use_pallas=True -> Pallas kernels; False -> ref.
# -----------------------------------------------------------------------------
def ffn_forward(p, x, *, use_pallas, precision=None):
    if use_pallas:
        lin = lambda a, w, bb: linear_pallas(a, w, bb)
    else:
        lin = lambda a, w, bb: jnp.dot(a, w, precision=precision) + bb
    n_layers = len(p["layers"])
    for i, (w, bb) in enumerate(p["layers"]):
        x = lin(x, w, bb)
        if i < n_layers - 1:
            if p["bns"]:
                x = bn_eval(x)
            x = prelu(x)  # Dropout: eval mode -> identity
    return x


def ffnii_forward(p, x, alpha, *, use_pallas, precision=None):
    if use_pallas:
        mm = lambda a, w: linear_pallas(a, w, None)
    else:
        mm = lambda a, w: jnp.dot(a, w, precision=precision)
    layers = p["layers"]
    n_layers = len(layers)

    def dense(a, w):                      # Dense: mm -> BN ('bn' bias) -> residual if square
        out = bn_eval(mm(a, w))
        if w.shape[0] == w.shape[1]:
            out = out + a
        return out

    def graphconv(a, h0, w):              # GraphConvolution
        support = (1.0 - alpha) * a + alpha * h0
        out = mm(support, w)
        if p["bns"]:
            out = bn_eval(out)
        if w.shape[0] == w.shape[1]:
            out = out + a
        return out

    x = dense(x, layers[0])
    h0 = x
    for i in range(1, n_layers):
        x = prelu(x)                      # Dropout: eval mode -> identity
        if i == n_layers - 1:
            x = dense(x, layers[i])
        else:
            x = graphconv(x, h0, layers[i])
    return x


def jk_gamlp_rlu_forward(params, feature_list, label_emb, *, num_hops, alpha, act_fn,
                         residual=False, pre_dropout=False,
                         use_pallas=True, precision=None):
    # input_drop: eval mode -> identity.  pre_process=True path.
    input_list = [ffn_forward(params["process"][i], feature_list[i],
                              use_pallas=use_pallas, precision=precision)
                  for i in range(num_hops)]
    concat_features = jnp.concatenate(input_list, axis=1)
    jk_ref = prelu(ffnii_forward(params["lr_jk_ref"], concat_features, alpha,
                                 use_pallas=use_pallas, precision=precision))

    if use_pallas:
        feats_stacked = jnp.stack(input_list, axis=0)        # (H, N, hidden)
        final_feat = gamlp_attention_aggregate(
            feats_stacked, jk_ref, params["lr_att"]["w"], params["lr_att"]["b"],
            act_fn=act_fn)
    else:
        dr = jk_ref.shape[1]
        w_jk = params["lr_att"]["w"][:dr]
        w_x = params["lr_att"]["w"][dr:]
        bb = params["lr_att"]["b"]
        scores = jnp.stack(
            [act_fn(jnp.dot(jk_ref, w_jk, precision=precision)
                    + jnp.dot(x, w_x, precision=precision) + bb)
             for x in input_list], axis=1)                   # (N, H)
        wsm = jax.nn.softmax(scores, axis=1)                 # att_drop: identity
        final_feat = sum(input_list[i] * wsm[:, i:i + 1] for i in range(num_hops))

    if residual:
        final_feat = final_feat + jnp.dot(feature_list[0], params["res_fc"],
                                          precision=precision)
        final_feat = prelu(final_feat)
    if pre_dropout:
        pass  # Dropout: eval mode -> identity

    yhat = ffnii_forward(params["lr_output"], final_feat, alpha,
                         use_pallas=use_pallas, precision=precision)
    yhat = yhat + ffn_forward(params["label_fc"], label_emb,
                              use_pallas=use_pallas, precision=precision)
    return yhat


# -----------------------------------------------------------------------------
# demo / correctness checks
# -----------------------------------------------------------------------------
if __name__ == "__main__":
    feat_dim, hidden, nclass = 128, 128, 32
    num_hops, n_nodes = 3, 256
    n_layers_1 = n_layers_2 = n_layers_3 = 2
    alpha = 0.5
    act_fn = make_act("leaky_relu")
    hp = jax.lax.Precision.HIGHEST

    key = jax.random.PRNGKey(0)
    kp, kf, kl, kt = jax.random.split(key, 4)
    params = init_params(kp, feat_dim, hidden, nclass, num_hops,
                         n_layers_1, n_layers_2, n_layers_3, bns=False)
    fkeys = jax.random.split(kf, num_hops)
    feature_list = [jax.random.normal(fkeys[i], (n_nodes, feat_dim), jnp.float32)
                    for i in range(num_hops)]
    label_emb = jax.random.normal(kl, (n_nodes, nclass), jnp.float32)

    # --- tight standalone check: fused hop-attention kernel (pure VPU math) ---
    tkeys = jax.random.split(kt, 4)
    feats_t = jax.random.normal(tkeys[0], (num_hops, n_nodes, hidden), jnp.float32)
    jk_t = jax.random.normal(tkeys[1], (n_nodes, hidden), jnp.float32)
    att_w_t = 0.1 * jax.random.normal(tkeys[2], (2 * hidden,), jnp.float32)
    att_b_t = 0.05
    agg = jax.block_until_ready(
        gamlp_attention_aggregate(feats_t, jk_t, att_w_t, att_b_t, act_fn=act_fn))
    scores_ref = jnp.stack(
        [act_fn(jnp.dot(jk_t, att_w_t[:hidden], precision=hp)
                + jnp.dot(feats_t[i], att_w_t[hidden:], precision=hp) + att_b_t)
         for i in range(num_hops)], axis=1)
    wsm_ref = jax.nn.softmax(scores_ref, axis=1)
    agg_ref = sum(feats_t[i] * wsm_ref[:, i:i + 1] for i in range(num_hops))
    assert jnp.allclose(agg, agg_ref, atol=1e-4, rtol=1e-4), "attention-agg kernel mismatch"

    # --- standalone check: tiled linear kernel ---
    xw = jax.random.normal(tkeys[3], (n_nodes, 3 * hidden), jnp.float32)
    ww = 0.05 * jax.random.normal(tkeys[0], (3 * hidden, hidden), jnp.float32)
    bw = 0.1 * jax.random.normal(tkeys[1], (hidden,), jnp.float32)
    lin = jax.block_until_ready(linear_pallas(xw, ww, bw))
    lin_ref = jnp.dot(xw, ww, precision=hp) + bw
    assert jnp.allclose(lin, lin_ref, atol=1e-2, rtol=1e-2), "linear kernel mismatch"

    # --- full JK_GAMLP_RLU forward: Pallas pipeline vs pure-JAX reference ---
    fwd = partial(jk_gamlp_rlu_forward, num_hops=num_hops, alpha=alpha, act_fn=act_fn,
                  residual=False, pre_dropout=False)
    yhat = jax.block_until_ready(fwd(params, feature_list, label_emb, use_pallas=True))
    yref = fwd(params, feature_list, label_emb, use_pallas=False, precision=hp)
    assert yhat.shape == (n_nodes, nclass)
    assert jnp.allclose(yhat, yref, atol=2e-2, rtol=2e-2), "full forward mismatch"

    print("KERNEL_OK")
</pallas_src>

<mosaic_0001>
module attributes {stable_mosaic.version = 11 : i64} {
  func.func @kernel(%arg0: i32, %arg1: memref<3x256x128xf32, #tpu.memory_space<vmem>>, %arg2: memref<256x128xf32, #tpu.memory_space<vmem>>, %arg3: memref<1x128xf32, #tpu.memory_space<vmem>>, %arg4: memref<1x128xf32, #tpu.memory_space<vmem>>, %arg5: memref<1x1xf32, #tpu.memory_space<vmem>>, %arg6: memref<256x128xf32, #tpu.memory_space<vmem>>) attributes {dimension_semantics = [#tpu.dimension_semantics<parallel>], iteration_bounds = array<i64: 1>, scalar_prefetch = 0 : i64, scratch_operands = 0 : i64, tpu.core_type = #tpu.core_type<tc>, window_params = [{transform_indices = @transform_0, window_bounds = array<i64: 3, 256, 128>}, {transform_indices = @transform_1, window_bounds = array<i64: 256, 128>}, {pipeline_mode = #tpu.pipeline_mode<synchronous>, transform_indices = @transform_2, window_bounds = array<i64: 1, 128>}, {pipeline_mode = #tpu.pipeline_mode<synchronous>, transform_indices = @transform_3, window_bounds = array<i64: 1, 128>}, {pipeline_mode = #tpu.pipeline_mode<synchronous>, transform_indices = @transform_4, window_bounds = array<i64: 1, 1>}, {transform_indices = @transform_5, window_bounds = array<i64: 256, 128>}]} {
    %c0 = arith.constant 0 : index
    %c0_0 = arith.constant 0 : index
    %c0_1 = arith.constant 0 : index
    %0 = vector.load %arg1[%c0, %c0_0, %c0_1] : memref<3x256x128xf32, #tpu.memory_space<vmem>>, vector<3x256x128xf32>
    %c0_2 = arith.constant 0 : index
    %c0_3 = arith.constant 0 : index
    %1 = vector.load %arg2[%c0_2, %c0_3] : memref<256x128xf32, #tpu.memory_space<vmem>>, vector<256x128xf32>
    %c0_4 = arith.constant 0 : index
    %c0_5 = arith.constant 0 : index
    %2 = vector.load %arg3[%c0_4, %c0_5] : memref<1x128xf32, #tpu.memory_space<vmem>>, vector<1x128xf32>
    %c0_6 = arith.constant 0 : index
    %c0_7 = arith.constant 0 : index
    %3 = vector.load %arg4[%c0_6, %c0_7] : memref<1x128xf32, #tpu.memory_space<vmem>>, vector<1x128xf32>
    %c0_8 = arith.constant 0 : index
    %c0_9 = arith.constant 0 : index
    %4 = vector.load %arg5[%c0_8, %c0_9] : memref<1x1xf32, #tpu.memory_space<vmem>>, vector<1x1xf32>
    %5 = vector.broadcast %3 : vector<1x128xf32> to vector<256x128xf32>
    %6 = arith.mulf %1, %5 : vector<256x128xf32>
    %cst = arith.constant dense<0.000000e+00> : vector<256xf32>
    %7 = vector.multi_reduction <add>, %6, %cst [1] : vector<256x128xf32> to vector<256xf32>
    %8 = vector.shape_cast %7 : vector<256xf32> to vector<256x1xf32>
    %9 = vector.shape_cast %2 : vector<1x128xf32> to vector<1x1x128xf32>
    %10 = vector.broadcast %9 : vector<1x1x128xf32> to vector<3x256x128xf32>
    %11 = arith.mulf %0, %10 : vector<3x256x128xf32>
    %cst_10 = arith.constant dense<0.000000e+00> : vector<3x256xf32>
    %12 = vector.multi_reduction <add>, %11, %cst_10 [2] : vector<3x256x128xf32> to vector<3x256xf32>
    %13 = vector.shape_cast %12 : vector<3x256xf32> to vector<3x256x1xf32>
    %14 = vector.shape_cast %8 : vector<256x1xf32> to vector<1x256x1xf32>
    %15 = vector.broadcast %14 : vector<1x256x1xf32> to vector<3x256x1xf32>
    %16 = arith.addf %13, %15 : vector<3x256x1xf32>
    %17 = vector.shape_cast %4 : vector<1x1xf32> to vector<1x1x1xf32>
    %18 = vector.broadcast %17 : vector<1x1x1xf32> to vector<3x256x1xf32>
    %19 = arith.addf %16, %18 : vector<3x256x1xf32>
    %cst_11 = arith.constant 0.000000e+00 : f32
    %20 = vector.broadcast %cst_11 : f32 to vector<3x256x1xf32>
    %21 = arith.cmpf oge, %19, %20 : vector<3x256x1xf32>
    %cst_12 = arith.constant 2.000000e-01 : f32
    %22 = vector.broadcast %cst_12 : f32 to vector<3x256x1xf32>
    %23 = arith.mulf %22, %19 : vector<3x256x1xf32>
    %24 = arith.select %21, %19, %23 : vector<3x256x1xi1>, vector<3x256x1xf32>
    %cst_13 = arith.constant dense<0xFF800000> : vector<256x1xf32>
    %25 = vector.multi_reduction <maximumf>, %24, %cst_13 [0] : vector<3x256x1xf32> to vector<256x1xf32>
    %26 = vector.shape_cast %25 : vector<256x1xf32> to vector<1x256x1xf32>
    %27 = vector.broadcast %26 : vector<1x256x1xf32> to vector<3x256x1xf32>
    %28 = arith.subf %24, %27 : vector<3x256x1xf32>
    %29 = math.exp %28 : vector<3x256x1xf32>
    %cst_14 = arith.constant dense<0.000000e+00> : vector<256x1xf32>
    %30 = vector.multi_reduction <add>, %29, %cst_14 [0] : vector<3x256x1xf32> to vector<256x1xf32>
    %31 = vector.shape_cast %30 : vector<256x1xf32> to vector<1x256x1xf32>
    %32 = vector.broadcast %31 : vector<1x256x1xf32> to vector<3x256x1xf32>
    %33 = arith.divf %29, %32 : vector<3x256x1xf32>
    %34 = vector.broadcast %33 : vector<3x256x1xf32> to vector<3x256x128xf32>
    %35 = arith.mulf %0, %34 : vector<3x256x128xf32>
    %cst_15 = arith.constant dense<0.000000e+00> : vector<256x128xf32>
    %36 = vector.multi_reduction <add>, %35, %cst_15 [0] : vector<3x256x128xf32> to vector<256x128xf32>
    %c0_16 = arith.constant 0 : index
    %c0_17 = arith.constant 0 : index
    %37 = vector.load %arg6[%c0_16, %c0_17] : memref<256x128xf32, #tpu.memory_space<vmem>>, vector<256x128xf32>
    tpu.vector_store %arg6[%c0_16, %c0_17], %36 {strides = array<i32>} : memref<256x128xf32, #tpu.memory_space<vmem>>, vector<256x128xf32>,
    return
  }
  func.func @transform_0(%arg0: i32) -> (i32, i32, i32) {
    %c0_i32 = arith.constant 0 : i32
    %c0_i32_0 = arith.constant 0 : i32
    %c0_i32_1 = arith.constant 0 : i32
    return %c0_i32, %arg0, %c0_i32_0 : i32, i32, i32
  }
  func.func @transform_1(%arg0: i32) -> (i32, i32) {
    %c0_i32 = arith.constant 0 : i32
    %c0_i32_0 = arith.constant 0 : i32
    return %arg0, %c0_i32 : i32, i32
  }
  func.func @transform_2(%arg0: i32) -> (i32, i32) {
    %c0_i32 = arith.constant 0 : i32
    %c0_i32_0 = arith.constant 0 : i32
    %c0_i32_1 = arith.constant 0 : i32
    return %c0_i32, %c0_i32_0 : i32, i32
  }
  func.func @transform_3(%arg0: i32) -> (i32, i32) {
    %c0_i32 = arith.constant 0 : i32
    %c0_i32_0 = arith.constant 0 : i32
    %c0_i32_1 = arith.constant 0 : i32
    return %c0_i32, %c0_i32_0 : i32, i32
  }
  func.func @transform_4(%arg0: i32) -> (i32, i32) {
    %c0_i32 = arith.constant 0 : i32
    %c0_i32_0 = arith.constant 0 : i32
    %c0_i32_1 = arith.constant 0 : i32
    return %c0_i32, %c0_i32_0 : i32, i32
  }
  func.func @transform_5(%arg0: i32) -> (i32, i32) {
    %c0_i32 = arith.constant 0 : i32
    %c0_i32_0 = arith.constant 0 : i32
    return %arg0, %c0_i32 : i32, i32
  }
}

</mosaic_0001>

<bundles_post_ra>
// kernel: tpu_custom_call.1
= control target key start
LH: loop header
LB: loop body
LE: loop exit
PB: predicated region body
PF: predicated region fallthrough
CT: control target
= control target key end

     0   :  { %s5003_s0 = inlined_call_operand.hbm [shape: f32[3,256,128], index: 0, kind: input, shape index: {}]   ;;  %s5004_s1 = inlined_call_operand.hbm [shape: f32[256,128], index: 1, kind: input, shape index: {}]   ;;  %s5005_s2 = inlined_call_operand.vmem [shape: f32[1,128], index: 2, kind: input, shape index: {}]   ;;  %s5006_s3 = inlined_call_operand.vmem [shape: f32[1,128], index: 3, kind: input, shape index: {}]   ;;  %s5007_s4 = inlined_call_operand.<no memory space> [shape: f32[1,1], index: 4, kind: input, shape index: {}]   ;;  %s5008_s5 = inlined_call_operand.hbm [shape: f32[256,128], index: 5, kind: output, shape index: {}]  }
   0x1   :  { %v10_v0 = vstv %s5007_s4 }
   0x2   :  { %11 = vst [vmem:[#allocation2] sm:$0x1] %v10_v0 }
   0x3   :  { %12 = vsyncpa [#allocation4], 0 }
   0x4   :  { %13 = vsyncpa [#allocation7], 0 }
   0x5   :  { %14 = vsyncpa [#allocation5], 0  ;;  %s2928_s20 = smov [#allocation3]   ;;  %s2856_s24 = scalar_lea.hbm %s5003_s0, 12288 }
   0x6   :  { %s20_s21 = sshll.u32 %s2928_s20, 4  ;;  %p2857_p0 = scmp.ne.s32.totalorder %s5003_s0, %s2856_s24  ;;  %s21_s21 = int_to_ptr.vmem [resolvable:$true] %s20_s21 }
   0x7   :  { %p2860_p1 = scmp.lt.u32.totalorder %s2856_s24, %s5003_s0 }
   0x9   :  { %p2862_p2 = pnand %p2860_p1, %p2857_p0 }
   0xb   :  { %2865 = shalt.err (!%p2862_p2)
}
   0xc   :  { %s2866_s4 = scalar_lea.vmem %s21_s21, 12288  ;;  %p2871_p4 = scmp.lt.s32.totalorder %s21_s21, %s21_s21 }
   0xd   :  { %p2867_p3 = scmp.ne.s32.totalorder %s21_s21, %s2866_s4  ;;  %p2872_p5 = scmp.lt.s32.totalorder %s2866_s4, %s2866_s4 }
   0xf   :  { %p2873_p6 = por %p2872_p5, %p2871_p4 }
  0x11   :  { %p2874_p7 = pnand %p2873_p6, %p2867_p3 }
  0x13   :  { %2877 = shalt.err (!%p2874_p7)
}
  0x14   :  { %s2929_s29 = smov 128   ;;  %s2930_s30 = smov 8  }
  0x15   :  { %26 = dma.hbm_to_vmem [thread:$0]  %s5003_s0, 12288, %s21_s21, [#allocation4], %s2929_s29, %s2929_s29, %s2930_s30  }
  0x16   :  { %s2931_s8 = smov [#allocation6]   ;;  %s2878_s12 = scalar_lea.hbm %s5004_s1, 4096 }
  0x17   :  { %s32_s9 = sshll.u32 %s2931_s8, 4  ;;  %p2879_p8 = scmp.ne.s32.totalorder %s5004_s1, %s2878_s12  ;;  %s33_s9 = int_to_ptr.vmem [resolvable:$true] %s32_s9 }
  0x18   :  { %p2882_p9 = scmp.lt.u32.totalorder %s2878_s12, %s5004_s1 }
  0x1a   :  { %p2884_p10 = pnand %p2882_p9, %p2879_p8 }
  0x1c   :  { %2887 = shalt.err (!%p2884_p10)
}
  0x1d   :  { %s2888_s17 = scalar_lea.vmem %s33_s9, 4096  ;;  %p2893_p12 = scmp.lt.s32.totalorder %s33_s9, %s33_s9 }
  0x1e   :  { %p2889_p11 = scmp.ne.s32.totalorder %s33_s9, %s2888_s17  ;;  %p2894_p13 = scmp.lt.s32.totalorder %s2888_s17, %s2888_s17 }
  0x20   :  { %p2895_p0 = por %p2894_p13, %p2893_p12 }
  0x22   :  { %p2896_p1 = pnand %p2895_p0, %p2889_p11 }
  0x24   :  { %2899 = shalt.err (!%p2896_p1)
}
  0x25   :  { %38 = dma.hbm_to_vmem [thread:$0]  %s5004_s1, 4096, %s33_s9, [#allocation7], %s2929_s29, %s2929_s29, %s2930_s30  }
  0x26   :  { %2922 = dma.done.wait [#allocation4], 12288  }
  0x27   :  { %2923 = vsyncadd [#allocation4], 4294955008 }
  0x28   :  { %2924 = dma.done.wait [#allocation7], 4096  }
  0x29   :  { %2925 = vsyncadd [#allocation7], 4294963200  ;;  %v149_v1 = vld [vmem:[#allocation6 + $0x10] sm:$0xff]  ;;  %v3000_v2 = vld [vmem:[%s5006_s3] ss:$0 sm:$0xff]  ;;  %vm1064_vm0 = vcmask 7168  }
  0x2a   :  { %v147_v3 = vld [vmem:[#allocation6] sm:$0xff]  ;;  %v190_v4 = vmul.f32 %v3000_v2, %v149_v1  ;;  %v150_v6 = vld [vmem:[#allocation6 + $0x18] sm:$0xff]  ;;  %v148_v7 = vld [vmem:[#allocation6 + $0x8] sm:$0xff] }
  0x2b   :  { %v188_v5 = vmul.f32 %v3000_v2, %v147_v3  ;;  %v191_v8 = vmul.f32 %v3000_v2, %v150_v6  ;;  %v189_v9 = vmul.f32 %v3000_v2, %v148_v7  ;;  %v152_v10 = vld [vmem:[#allocation6 + $0x28] sm:$0xff]  ;;  %v151_v11 = vld [vmem:[#allocation6 + $0x20] sm:$0xff]  ;;  %v154_v14 = vld [vmem:[#allocation6 + $0x38] sm:$0xff] }
  0x2c   :  { %224 = vadd.xlane.f32.xlu1 %v190_v4  ;;  %v193_v12 = vmul.f32 %v3000_v2, %v152_v10  ;;  %v192_v13 = vmul.f32 %v3000_v2, %v151_v11  ;;  %v153_v15 = vld [vmem:[#allocation6 + $0x30] sm:$0xff]  ;;  %v195_v16 = vmul.f32 %v3000_v2, %v154_v14  ;;  %v156_v18 = vld [vmem:[#allocation6 + $0x48] sm:$0xff]  ;;  %v155_v19 = vld [vmem:[#allocation6 + $0x40] sm:$0xff] }
  0x2d   :  { %220 = vadd.xlane.f32.xlu0 %v188_v5  ;;  %v194_v17 = vmul.f32 %v3000_v2, %v153_v15  ;;  %v197_v20 = vmul.f32 %v3000_v2, %v156_v18  ;;  %v196_v21 = vmul.f32 %v3000_v2, %v155_v19  ;;  %v158_v22 = vld [vmem:[#allocation6 + $0x58] sm:$0xff]  ;;  %v157_v23 = vld [vmem:[#allocation6 + $0x50] sm:$0xff]  ;;  %v160_v26 = vld [vmem:[#allocation6 + $0x68] sm:$0xff] }
  0x2e   :  { %v199_v24 = vmul.f32 %v3000_v2, %v158_v22  ;;  %v198_v25 = vmul.f32 %v3000_v2, %v157_v23  ;;  %v159_v27 = vld [vmem:[#allocation6 + $0x60] sm:$0xff]  ;;  %v201_v28 = vmul.f32 %v3000_v2, %v160_v26  ;;  %v162_v30 = vld [vmem:[#allocation6 + $0x78] sm:$0xff]  ;;  %v161_v31 = vld [vmem:[#allocation6 + $0x70] sm:$0xff] }
  0x2f   :  { %v200_v29 = vmul.f32 %v3000_v2, %v159_v27  ;;  %v203_v32 = vmul.f32 %v3000_v2, %v162_v30  ;;  %v202_v33 = vmul.f32 %v3000_v2, %v161_v31  ;;  %v164_v34 = vld [vmem:[#allocation6 + $0x88] sm:$0xff]  ;;  %v163_v35 = vld [vmem:[#allocation6 + $0x80] sm:$0xff]  ;;  %v166_v38 = vld [vmem:[#allocation6 + $0x98] sm:$0xff] }
  0x30   :  { %226 = vadd.xlane.f32.xlu1 %v191_v8  ;;  %v205_v36 = vmul.f32 %v3000_v2, %v164_v34  ;;  %v204_v37 = vmul.f32 %v3000_v2, %v163_v35  ;;  %v165_v39 = vld [vmem:[#allocation6 + $0x90] sm:$0xff]  ;;  %v207_v40 = vmul.f32 %v3000_v2, %v166_v38  ;;  %v168_v42 = vld [vmem:[#allocation6 + $0xa8] sm:$0xff]  ;;  %v167_v43 = vld [vmem:[#allocation6 + $0xa0] sm:$0xff] }
  0x31   :  { %222 = vadd.xlane.f32.xlu0 %v189_v9  ;;  %v206_v41 = vmul.f32 %v3000_v2, %v165_v39  ;;  %v209_v44 = vmul.f32 %v3000_v2, %v168_v42  ;;  %v208_v45 = vmul.f32 %v3000_v2, %v167_v43  ;;  %v170_v46 = vld [vmem:[#allocation6 + $0xb8] sm:$0xff]  ;;  %v169_v47 = vld [vmem:[#allocation6 + $0xb0] sm:$0xff]  ;;  %v172_v50 = vld [vmem:[#allocation6 + $0xc8] sm:$0xff] }
  0x32   :  { %v211_v48 = vmul.f32 %v3000_v2, %v170_v46  ;;  %v210_v49 = vmul.f32 %v3000_v2, %v169_v47  ;;  %v171_v51 = vld [vmem:[#allocation6 + $0xc0] sm:$0xff]  ;;  %v213_v52 = vmul.f32 %v3000_v2, %v172_v50  ;;  %v174_v54 = vld [vmem:[#allocation6 + $0xd8] sm:$0xff]  ;;  %v173_v55 = vld [vmem:[#allocation6 + $0xd0] sm:$0xff] }
  0x33   :  { %v212_v53 = vmul.f32 %v3000_v2, %v171_v51  ;;  %v215_v56 = vmul.f32 %v3000_v2, %v174_v54  ;;  %v214_v57 = vmul.f32 %v3000_v2, %v173_v55  ;;  %v176_v58 = vld [vmem:[#allocation6 + $0xe8] sm:$0xff]  ;;  %v175_v59 = vld [vmem:[#allocation6 + $0xe0] sm:$0xff]  ;;  %v178_v62 = vld [vmem:[#allocation6 + $0xf8] sm:$0xff] }
  0x34   :  { %230 = vadd.xlane.f32.xlu1 %v193_v12  ;;  %v217_v60 = vmul.f32 %v3000_v2, %v176_v58  ;;  %v216_v61 = vmul.f32 %v3000_v2, %v175_v59  ;;  %v177_v63 = vld [vmem:[#allocation6 + $0xf0] sm:$0xff]  ;;  %v219_v0 = vmul.f32 %v3000_v2, %v178_v62  ;;  %v52_v3 = vld [vmem:[#allocation3 + $0x8] sm:$0xff]  ;;  %v3037_v4 = vld [vmem:[%s5005_s2] ss:$0 sm:$0xff]  ;;  %s2933_s2 = smov [#allocation8]  }
  0x35   :  { %228 = vadd.xlane.f32.xlu0 %v192_v13  ;;  %v218_v1 = vmul.f32 %v3000_v2, %v177_v63  ;;  %v51_v5 = vld [vmem:[#allocation3] sm:$0xff]  ;;  %v291_v6 = vmul.f32 %v3037_v4, %v52_v3  ;;  %v54_v8 = vld [vmem:[#allocation3 + $0x18] sm:$0xff]  ;;  %v53_v9 = vld [vmem:[#allocation3 + $0x10] sm:$0xff]  ;;  %s2478_s21 = sshll.u32 %s2933_s2, 4  ;;  %s2479_s21 = int_to_ptr.vmem [resolvable:$true] %s2478_s21 }
  0x36   :  { %v290_v7 = vmul.f32 %v3037_v4, %v51_v5  ;;  %v293_v10 = vmul.f32 %v3037_v4, %v54_v8  ;;  %v292_v2 = vmul.f32 %v3037_v4, %v53_v9  ;;  %v56_v11 = vld [vmem:[#allocation3 + $0x28] sm:$0xff]  ;;  %v55_v12 = vld [vmem:[#allocation3 + $0x20] sm:$0xff]  ;;  %v58_v15 = vld [vmem:[#allocation3 + $0x38] sm:$0xff]  ;;  %s2900_s22 = scalar_lea.vmem %s2479_s21, 4096  ;;  %p2905_p3 = scmp.lt.s32.totalorder %s2479_s21, %s2479_s21 }
  0x37   :  { %v295_v13 = vmul.f32 %v3037_v4, %v56_v11  ;;  %v294_v14 = vmul.f32 %v3037_v4, %v55_v12  ;;  %v60_v19 = vld [vmem:[#allocation3 + $0x48] sm:$0xff]  ;;  %v62_v23 = vld [vmem:[#allocation3 + $0x58] sm:$0xff]  ;;  %p2901_p2 = scmp.ne.s32.totalorder %s2479_s21, %s2900_s22  ;;  %p2906_p4 = scmp.lt.s32.totalorder %s2900_s22, %s2900_s22 }
  0x38   :  { %234 = vadd.xlane.f32.xlu1 %v195_v16  ;;  %v57_v16 = vld [vmem:[#allocation3 + $0x30] sm:$0xff]  ;;  %v64_v27 = vld [vmem:[#allocation3 + $0x68] sm:$0xff]  ;;  %v66_v31 = vld [vmem:[#allocation3 + $0x78] sm:$0xff] }
  0x39   :  { %232 = vadd.xlane.f32.xlu0 %v194_v17  ;;  %v297_v17 = vmul.f32 %v3037_v4, %v58_v15  ;;  %v296_v18 = vmul.f32 %v3037_v4, %v57_v16  ;;  %v68_v35 = vld [vmem:[#allocation3 + $0x88] sm:$0xff]  ;;  %v70_v39 = vld [vmem:[#allocation3 + $0x98] sm:$0xff]  ;;  %p2907_p5 = por %p2906_p4, %p2905_p3 }
  0x3a   :  { %v72_v43 = vld [vmem:[#allocation3 + $0xa8] sm:$0xff]  ;;  %v74_v47 = vld [vmem:[#allocation3 + $0xb8] sm:$0xff] }
  0x3b   :  { %v76_v51 = vld [vmem:[#allocation3 + $0xc8] sm:$0xff]  ;;  %v78_v55 = vld [vmem:[#allocation3 + $0xd8] sm:$0xff]  ;;  %p2908_p6 = pnand %p2907_p5, %p2901_p2 }
  0x3c   :  { %238 = vadd.xlane.f32.xlu1 %v197_v20  ;;  %v59_v20 = vld [vmem:[#allocation3 + $0x40] sm:$0xff]  ;;  %v80_v59 = vld [vmem:[#allocation3 + $0xe8] sm:$0xff]  ;;  %v82_v63 = vld [vmem:[#allocation3 + $0xf8] sm:$0xff] }
  0x3d   :  { %236 = vadd.xlane.f32.xlu0 %v196_v21  ;;  %v299_v21 = vmul.f32 %v3037_v4, %v60_v19  ;;  %v298_v22 = vmul.f32 %v3037_v4, %v59_v20  ;;  %v84_v5 = vld [vmem:[#allocation3 + $0x108] sm:$0xff]  ;;  %v86_v9 = vld [vmem:[#allocation3 + $0x118] sm:$0xff] }
  0x3e   :  { %v88_v12 = vld [vmem:[#allocation3 + $0x128] sm:$0xff]  ;;  %v90_v16 = vld [vmem:[#allocation3 + $0x138] sm:$0xff] }
  0x3f   :  { %v92_v20 = vld [vmem:[#allocation3 + $0x148] sm:$0xff] }
  0x40   :  { %242 = vadd.xlane.f32.xlu1 %v199_v24  ;;  %v61_v24 = vld [vmem:[#allocation3 + $0x50] sm:$0xff] }
  0x41   :  { %240 = vadd.xlane.f32.xlu0 %v198_v25  ;;  %v301_v25 = vmul.f32 %v3037_v4, %v62_v23  ;;  %v300_v26 = vmul.f32 %v3037_v4, %v61_v24 }
  0x44   :  { %246 = vadd.xlane.f32.xlu1 %v201_v28  ;;  %v63_v28 = vld [vmem:[#allocation3 + $0x60] sm:$0xff] }
  0x45   :  { %244 = vadd.xlane.f32.xlu0 %v200_v29  ;;  %v303_v29 = vmul.f32 %v3037_v4, %v64_v27  ;;  %v302_v30 = vmul.f32 %v3037_v4, %v63_v28  ;;  %v93_v27 = vld [vmem:[#allocation3 + $0x150] sm:$0xff] }
  0x48   :  { %250 = vadd.xlane.f32.xlu1 %v203_v32  ;;  %v65_v32 = vld [vmem:[#allocation3 + $0x70] sm:$0xff] }
  0x49   :  { %248 = vadd.xlane.f32.xlu0 %v202_v33  ;;  %v305_v33 = vmul.f32 %v3037_v4, %v66_v31  ;;  %v304_v34 = vmul.f32 %v3037_v4, %v65_v32  ;;  %v96_v32 = vld [vmem:[#allocation3 + $0x168] sm:$0xff] }
  0x4c   :  { %254 = vadd.xlane.f32.xlu1 %v205_v36  ;;  %v67_v36 = vld [vmem:[#allocation3 + $0x80] sm:$0xff] }
  0x4d   :  { %252 = vadd.xlane.f32.xlu0 %v204_v37  ;;  %v307_v37 = vmul.f32 %v3037_v4, %v68_v35  ;;  %v306_v38 = vmul.f32 %v3037_v4, %v67_v36 }
  0x50   :  { %258 = vadd.xlane.f32.xlu1 %v207_v40  ;;  %v69_v40 = vld [vmem:[#allocation3 + $0x90] sm:$0xff] }
  0x51   :  { %256 = vadd.xlane.f32.xlu0 %v206_v41  ;;  %v309_v41 = vmul.f32 %v3037_v4, %v70_v39  ;;  %v308_v42 = vmul.f32 %v3037_v4, %v69_v40  ;;  %v97_v39 = vld [vmem:[#allocation3 + $0x170] sm:$0xff] }
  0x54   :  { %262 = vadd.xlane.f32.xlu1 %v209_v44  ;;  %v71_v44 = vld [vmem:[#allocation3 + $0xa0] sm:$0xff] }
  0x55   :  { %260 = vadd.xlane.f32.xlu0 %v208_v45  ;;  %v311_v45 = vmul.f32 %v3037_v4, %v72_v43  ;;  %v310_v46 = vmul.f32 %v3037_v4, %v71_v44  ;;  %v100_v44 = vld [vmem:[#allocation3 + $0x188] sm:$0xff] }
  0x58   :  { %266 = vadd.xlane.f32.xlu1 %v211_v48  ;;  %v73_v48 = vld [vmem:[#allocation3 + $0xb0] sm:$0xff] }
  0x59   :  { %264 = vadd.xlane.f32.xlu0 %v210_v49  ;;  %v313_v49 = vmul.f32 %v3037_v4, %v74_v47  ;;  %v312_v50 = vmul.f32 %v3037_v4, %v73_v48 }
  0x5c   :  { %270 = vadd.xlane.f32.xlu1 %v213_v52  ;;  %v75_v52 = vld [vmem:[#allocation3 + $0xc0] sm:$0xff] }
  0x5d   :  { %268 = vadd.xlane.f32.xlu0 %v212_v53  ;;  %v315_v53 = vmul.f32 %v3037_v4, %v76_v51  ;;  %v314_v54 = vmul.f32 %v3037_v4, %v75_v52  ;;  %v101_v51 = vld [vmem:[#allocation3 + $0x190] sm:$0xff] }
  0x60   :  { %274 = vadd.xlane.f32.xlu1 %v215_v56  ;;  %v77_v56 = vld [vmem:[#allocation3 + $0xd0] sm:$0xff] }
  0x61   :  { %272 = vadd.xlane.f32.xlu0 %v214_v57  ;;  %v317_v57 = vmul.f32 %v3037_v4, %v78_v55  ;;  %v316_v58 = vmul.f32 %v3037_v4, %v77_v56  ;;  %v104_v56 = vld [vmem:[#allocation3 + $0x1a8] sm:$0xff] }
  0x64   :  { %278 = vadd.xlane.f32.xlu1 %v217_v60  ;;  %v79_v60 = vld [vmem:[#allocation3 + $0xe0] sm:$0xff] }
  0x65   :  { %276 = vadd.xlane.f32.xlu0 %v216_v61  ;;  %v319_v61 = vmul.f32 %v3037_v4, %v80_v59  ;;  %v318_v62 = vmul.f32 %v3037_v4, %v79_v60 }
  0x68   :  { %282 = vadd.xlane.f32.xlu1 %v219_v0  ;;  %v81_v0 = vld [vmem:[#allocation3 + $0xf0] sm:$0xff] }
  0x69   :  { %280 = vadd.xlane.f32.xlu0 %v218_v1  ;;  %v321_v1 = vmul.f32 %v3037_v4, %v82_v63  ;;  %v320_v3 = vmul.f32 %v3037_v4, %v81_v0  ;;  %v105_v63 = vld [vmem:[#allocation3 + $0x1b0] sm:$0xff] }
  0x6c   :  { %388 = vadd.xlane.f32.xlu1 %v291_v6  ;;  %v83_v6 = vld [vmem:[#allocation3 + $0x100] sm:$0xff] }
  0x6d   :  { %386 = vadd.xlane.f32.xlu0 %v290_v7  ;;  %v323_v7 = vmul.f32 %v3037_v4, %v84_v5  ;;  %v322_v8 = vmul.f32 %v3037_v4, %v83_v6  ;;  %v108_v6 = vld [vmem:[#allocation3 + $0x1c8] sm:$0xff] }
  0x70   :  { %392 = vadd.xlane.f32.xlu1 %v293_v10  ;;  %v85_v10 = vld [vmem:[#allocation3 + $0x110] sm:$0xff] }
  0x71   :  { %390 = vadd.xlane.f32.xlu0 %v292_v2  ;;  %v325_v2 = vmul.f32 %v3037_v4, %v86_v9  ;;  %v324_v11 = vmul.f32 %v3037_v4, %v85_v10 }
  0x74   :  { %396 = vadd.xlane.f32.xlu1 %v295_v13  ;;  %v87_v13 = vld [vmem:[#allocation3 + $0x120] sm:$0xff] }
  0x75   :  { %394 = vadd.xlane.f32.xlu0 %v294_v14  ;;  %v327_v14 = vmul.f32 %v3037_v4, %v88_v12  ;;  %v326_v15 = vmul.f32 %v3037_v4, %v87_v13  ;;  %v109_v12 = vld [vmem:[#allocation3 + $0x1d0] sm:$0xff] }
  0x78   :  { %400 = vadd.xlane.f32.xlu1 %v297_v17  ;;  %v89_v17 = vld [vmem:[#allocation3 + $0x130] sm:$0xff] }
  0x79   :  { %398 = vadd.xlane.f32.xlu0 %v296_v18  ;;  %v329_v18 = vmul.f32 %v3037_v4, %v90_v16  ;;  %v328_v19 = vmul.f32 %v3037_v4, %v89_v17  ;;  %v112_v17 = vld [vmem:[#allocation3 + $0x1e8] sm:$0xff] }
  0x7c   :  { %404 = vadd.xlane.f32.xlu1 %v299_v21  ;;  %v91_v21 = vld [vmem:[#allocation3 + $0x140] sm:$0xff] }
  0x7d   :  { %402 = vadd.xlane.f32.xlu0 %v298_v22  ;;  %v331_v22 = vmul.f32 %v3037_v4, %v92_v20  ;;  %v330_v23 = vmul.f32 %v3037_v4, %v91_v21 }
  0x80   :  { %408 = vadd.xlane.f32.xlu1 %v301_v25 }
  0x81   :  { %406 = vadd.xlane.f32.xlu0 %v300_v26  ;;  %v94_v26 = vld [vmem:[#allocation3 + $0x158] sm:$0xff] }
  0x82   :  { %v333_v28 = vmul.f32 %v3037_v4, %v94_v26  ;;  %v113_v26 = vld [vmem:[#allocation3 + $0x1f0] sm:$0xff] }
  0x84   :  { %412 = vadd.xlane.f32.xlu1 %v303_v29  ;;  %v332_v29 = vmul.f32 %v3037_v4, %v93_v27 }
  0x85   :  { %410 = vadd.xlane.f32.xlu0 %v302_v30 }
  0x88   :  { %416 = vadd.xlane.f32.xlu1 %v305_v33  ;;  %v95_v33 = vld [vmem:[#allocation3 + $0x160] sm:$0xff] }
  0x89   :  { %414 = vadd.xlane.f32.xlu0 %v304_v34  ;;  %v335_v34 = vmul.f32 %v3037_v4, %v96_v32  ;;  %v334_v35 = vmul.f32 %v3037_v4, %v95_v33  ;;  %v116_v33 = vld [vmem:[#allocation3 + $0x208] sm:$0xff] }
  0x8c   :  { %420 = vadd.xlane.f32.xlu1 %v307_v37 }
  0x8d   :  { %418 = vadd.xlane.f32.xlu0 %v306_v38  ;;  %v98_v38 = vld [vmem:[#allocation3 + $0x178] sm:$0xff] }
  0x8e   :  { %v337_v40 = vmul.f32 %v3037_v4, %v98_v38 }
  0x90   :  { %424 = vadd.xlane.f32.xlu1 %v309_v41  ;;  %v336_v41 = vmul.f32 %v3037_v4, %v97_v39 }
  0x91   :  { %422 = vadd.xlane.f32.xlu0 %v308_v42 }
  0x94   :  { %428 = vadd.xlane.f32.xlu1 %v311_v45  ;;  %v99_v45 = vld [vmem:[#allocation3 + $0x180] sm:$0xff] }
  0x95   :  { %426 = vadd.xlane.f32.xlu0 %v310_v46  ;;  %v339_v46 = vmul.f32 %v3037_v4, %v100_v44  ;;  %v338_v47 = vmul.f32 %v3037_v4, %v99_v45  ;;  %v117_v44 = vld [vmem:[#allocation3 + $0x210] sm:$0xff] }
  0x98   :  { %432 = vadd.xlane.f32.xlu1 %v313_v49 }
  0x99   :  { %430 = vadd.xlane.f32.xlu0 %v312_v50  ;;  %v102_v50 = vld [vmem:[#allocation3 + $0x198] sm:$0xff] }
  0x9a   :  { %v341_v52 = vmul.f32 %v3037_v4, %v102_v50 }
  0x9c   :  { %436 = vadd.xlane.f32.xlu1 %v315_v53  ;;  %v340_v53 = vmul.f32 %v3037_v4, %v101_v51  ;;  %v120_v51 = vld [vmem:[#allocation3 + $0x228] sm:$0xff] }
  0x9d   :  { %434 = vadd.xlane.f32.xlu0 %v314_v54 }
  0xa0   :  { %440 = vadd.xlane.f32.xlu1 %v317_v57  ;;  %v103_v57 = vld [vmem:[#allocation3 + $0x1a0] sm:$0xff] }
  0xa1   :  { %438 = vadd.xlane.f32.xlu0 %v316_v58  ;;  %v343_v58 = vmul.f32 %v3037_v4, %v104_v56  ;;  %v342_v59 = vmul.f32 %v3037_v4, %v103_v57 }
  0xa4   :  { %444 = vadd.xlane.f32.xlu1 %v319_v61 }
  0xa5   :  { %442 = vadd.xlane.f32.xlu0 %v318_v62  ;;  %v106_v62 = vld [vmem:[#allocation3 + $0x1b8] sm:$0xff] }
  0xa6   :  { %v345_v0 = vmul.f32 %v3037_v4, %v106_v62  ;;  %v121_v62 = vld [vmem:[#allocation3 + $0x230] sm:$0xff] }
  0xa8   :  { %448 = vadd.xlane.f32.xlu1 %v321_v1  ;;  %v344_v1 = vmul.f32 %v3037_v4, %v105_v63 }
  0xa9   :  { %446 = vadd.xlane.f32.xlu0 %v320_v3 }
  0xac   :  { %452 = vadd.xlane.f32.xlu1 %v323_v7  ;;  %v107_v7 = vld [vmem:[#allocation3 + $0x1c0] sm:$0xff] }
  0xad   :  { %450 = vadd.xlane.f32.xlu0 %v322_v8  ;;  %v347_v8 = vmul.f32 %v3037_v4, %v108_v6  ;;  %v346_v9 = vmul.f32 %v3037_v4, %v107_v7  ;;  %v124_v7 = vld [vmem:[#allocation3 + $0x248] sm:$0xff] }
  0xb0   :  { %456 = vadd.xlane.f32.xlu1 %v325_v2 }
  0xb1   :  { %454 = vadd.xlane.f32.xlu0 %v324_v11  ;;  %v110_v11 = vld [vmem:[#allocation3 + $0x1d8] sm:$0xff] }
  0xb2   :  { %v349_v13 = vmul.f32 %v3037_v4, %v110_v11 }
  0xb4   :  { %460 = vadd.xlane.f32.xlu1 %v327_v14  ;;  %v348_v14 = vmul.f32 %v3037_v4, %v109_v12 }
  0xb5   :  { %458 = vadd.xlane.f32.xlu0 %v326_v15 }
  0xb8   :  { %464 = vadd.xlane.f32.xlu1 %v329_v18  ;;  %v111_v18 = vld [vmem:[#allocation3 + $0x1e0] sm:$0xff] }
  0xb9   :  { %462 = vadd.xlane.f32.xlu0 %v328_v19  ;;  %v3081_v24 = vpop.xlane.xlu1 %224  ;;  %v351_v19 = vmul.f32 %v3037_v4, %v112_v17  ;;  %v350_v20 = vmul.f32 %v3037_v4, %v111_v18  ;;  %v125_v17 = vld [vmem:[#allocation3 + $0x250] sm:$0xff] }
  0xba   :  { %5212 = vst [vmem:[#allocation12_spill] sm:$0xff] %v3081_v24  ;;  %v3083_v25 = vpop.xlane.xlu0 %220 }
  0xbb   :  { %5213 = vst [vmem:[#allocation13_spill] sm:$0xff] %v3083_v25 }
  0xbc   :  { %468 = vadd.xlane.f32.xlu1 %v331_v22 }
  0xbd   :  { %466 = vadd.xlane.f32.xlu0 %v330_v23  ;;  %v3087_v30 = vpop.xlane.xlu1 %226  ;;  %v114_v23 = vld [vmem:[#allocation3 + $0x1f8] sm:$0xff] }
  0xbe   :  { %5214 = vst [vmem:[#allocation14_spill] sm:$0xff] %v3087_v30  ;;  %v3089_v31 = vpop.xlane.xlu0 %222  ;;  %v353_v27 = vmul.f32 %v3037_v4, %v114_v23 }
  0xc0   :  { %472 = vadd.xlane.f32.xlu1 %v333_v28  ;;  %v352_v28 = vmul.f32 %v3037_v4, %v113_v26  ;;  %v128_v26 = vld [vmem:[#allocation3 + $0x268] sm:$0xff] }
  0xc1   :  { %470 = vadd.xlane.f32.xlu0 %v332_v29  ;;  %v3093_v36 = vpop.xlane.xlu1 %230 }
  0xc2   :  { %5215 = vst [vmem:[#allocation15_spill] sm:$0xff] %v3093_v36  ;;  %v3095_v37 = vpop.xlane.xlu0 %228 }
  0xc3   :  { %5216 = vst [vmem:[#allocation16_spill] sm:$0xff] %v3095_v37 }
  0xc4   :  { %476 = vadd.xlane.f32.xlu1 %v335_v34  ;;  %v115_v34 = vld [vmem:[#allocation3 + $0x200] sm:$0xff] }
  0xc5   :  { %474 = vadd.xlane.f32.xlu0 %v334_v35  ;;  %v3099_v42 = vpop.xlane.xlu1 %234  ;;  %v355_v35 = vmul.f32 %v3037_v4, %v116_v33  ;;  %v354_v38 = vmul.f32 %v3037_v4, %v115_v34 }
  0xc6   :  { %5217 = vst [vmem:[#allocation17_spill] sm:$0xff] %v3099_v42  ;;  %v3101_v43 = vpop.xlane.xlu0 %232 }
  0xc7   :  { %5218 = vst [vmem:[#allocation18_spill] sm:$0xff] %v3101_v43 }
  0xc8   :  { %480 = vadd.xlane.f32.xlu1 %v337_v40 }
  0xc9   :  { %478 = vadd.xlane.f32.xlu0 %v336_v41  ;;  %v3105_v48 = vpop.xlane.xlu1 %238  ;;  %v118_v41 = vld [vmem:[#allocation3 + $0x218] sm:$0xff] }
  0xca   :  { %5219 = vst [vmem:[#allocation19_spill] sm:$0xff] %v3105_v48  ;;  %v3107_v49 = vpop.xlane.xlu0 %236  ;;  %v357_v45 = vmul.f32 %v3037_v4, %v118_v41  ;;  %v129_v41 = vld [vmem:[#allocation3 + $0x270] sm:$0xff] }
  0xcb   :  { %5220 = vst [vmem:[#allocation20_spill] sm:$0xff] %v3107_v49 }
  0xcc   :  { %484 = vadd.xlane.f32.xlu1 %v339_v46  ;;  %v356_v46 = vmul.f32 %v3037_v4, %v117_v44 }
  0xcd   :  { %482 = vadd.xlane.f32.xlu0 %v338_v47  ;;  %v3111_v54 = vpop.xlane.xlu1 %242 }
  0xce   :  { %5221 = vst [vmem:[#allocation21_spill] sm:$0xff] %v3111_v54  ;;  %v3113_v55 = vpop.xlane.xlu0 %240 }
  0xcf   :  { %5222 = vst [vmem:[#allocation22_spill] sm:$0xff] %v3113_v55 }
  0xd0   :  { %488 = vadd.xlane.f32.xlu1 %v341_v52  ;;  %v119_v52 = vld [vmem:[#allocation3 + $0x220] sm:$0xff] }
  0xd1   :  { %486 = vadd.xlane.f32.xlu0 %v340_v53  ;;  %v3117_v60 = vpop.xlane.xlu1 %246  ;;  %v359_v53 = vmul.f32 %v3037_v4, %v120_v51  ;;  %v358_v56 = vmul.f32 %v3037_v4, %v119_v52  ;;  %v132_v52 = vld [vmem:[#allocation3 + $0x288] sm:$0xff] }
  0xd2   :  { %5223 = vst [vmem:[#allocation23_spill] sm:$0xff] %v3117_v60  ;;  %v3119_v61 = vpop.xlane.xlu0 %244 }
  0xd3   :  { %5224 = vst [vmem:[#allocation24_spill] sm:$0xff] %v3119_v61 }
  0xd4   :  { %492 = vadd.xlane.f32.xlu1 %v343_v58 }
  0xd5   :  { %490 = vadd.xlane.f32.xlu0 %v342_v59  ;;  %v3123_v3 = vpop.xlane.xlu1 %250  ;;  %v122_v59 = vld [vmem:[#allocation3 + $0x238] sm:$0xff] }
  0xd6   :  { %5225 = vst [vmem:[#allocation25_spill] sm:$0xff] %v3123_v3  ;;  %v3125_v5 = vpop.xlane.xlu0 %248  ;;  %v361_v63 = vmul.f32 %v3037_v4, %v122_v59 }
  0xd7   :  { %5226 = vst [vmem:[#allocation26_spill] sm:$0xff] %v3125_v5 }
  0xd8   :  { %496 = vadd.xlane.f32.xlu1 %v345_v0  ;;  %v360_v0 = vmul.f32 %v3037_v4, %v121_v62 }
  0xd9   :  { %494 = vadd.xlane.f32.xlu0 %v344_v1  ;;  %v3129_v10 = vpop.xlane.xlu1 %254 }
  0xda   :  { %5227 = vst [vmem:[#allocation27_spill] sm:$0xff] %v3129_v10  ;;  %v3131_v2 = vpop.xlane.xlu0 %252 }
  0xdb   :  { %5228 = vst [vmem:[#allocation28_spill] sm:$0xff] %v3131_v2 }
  0xdc   :  { %500 = vadd.xlane.f32.xlu1 %v347_v8  ;;  %v123_v8 = vld [vmem:[#allocation3 + $0x240] sm:$0xff] }
  0xdd   :  { %498 = vadd.xlane.f32.xlu0 %v346_v9  ;;  %v3135_v15 = vpop.xlane.xlu1 %258  ;;  %v363_v9 = vmul.f32 %v3037_v4, %v124_v7  ;;  %v362_v11 = vmul.f32 %v3037_v4, %v123_v8  ;;  %v133_v7 = vld [vmem:[#allocation3 + $0x290] sm:$0xff] }
  0xde   :  { %5229 = vst [vmem:[#allocation29_spill] sm:$0xff] %v3135_v15  ;;  %v3137_v16 = vpop.xlane.xlu0 %256 }
  0xdf   :  { %5230 = vst [vmem:[#allocation30_spill] sm:$0xff] %v3137_v16 }
  0xe0   :  { %504 = vadd.xlane.f32.xlu1 %v349_v13 }
  0xe1   :  { %502 = vadd.xlane.f32.xlu0 %v348_v14  ;;  %v3141_v21 = vpop.xlane.xlu1 %262  ;;  %v126_v14 = vld [vmem:[#allocation3 + $0x258] sm:$0xff] }
  0xe2   :  { %5231 = vst [vmem:[#allocation31_spill] sm:$0xff] %v3141_v21  ;;  %v3143_v22 = vpop.xlane.xlu0 %260  ;;  %v365_v18 = vmul.f32 %v3037_v4, %v126_v14 }
  0xe3   :  { %5232 = vst [vmem:[#allocation32_spill] sm:$0xff] %v3143_v22 }
  0xe4   :  { %508 = vadd.xlane.f32.xlu1 %v351_v19  ;;  %v364_v19 = vmul.f32 %v3037_v4, %v125_v17  ;;  %v136_v17 = vld [vmem:[#allocation3 + $0x2a8] sm:$0xff] }
  0xe5   :  { %506 = vadd.xlane.f32.xlu0 %v350_v20  ;;  %v3147_v29 = vpop.xlane.xlu1 %266 }
  0xe6   :  { %5233 = vst [vmem:[#allocation33_spill] sm:$0xff] %v3147_v29  ;;  %v3149_v32 = vpop.xlane.xlu0 %264 }
  0xe7   :  { %5234 = vst [vmem:[#allocation34_spill] sm:$0xff] %v3149_v32 }
  0xe8   :  { %512 = vadd.xlane.f32.xlu1 %v353_v27  ;;  %v127_v27 = vld [vmem:[#allocation3 + $0x260] sm:$0xff] }
  0xe9   :  { %510 = vadd.xlane.f32.xlu0 %v352_v28  ;;  %v3153_v39 = vpop.xlane.xlu1 %270  ;;  %v367_v28 = vmul.f32 %v3037_v4, %v128_v26  ;;  %v366_v33 = vmul.f32 %v3037_v4, %v127_v27 }
  0xea   :  { %5235 = vst [vmem:[#allocation35_spill] sm:$0xff] %v3153_v39  ;;  %v3155_v40 = vpop.xlane.xlu0 %268 }
  0xeb   :  { %5236 = vst [vmem:[#allocation36_spill] sm:$0xff] %v3155_v40 }
  0xec   :  { %516 = vadd.xlane.f32.xlu1 %v355_v35 }
  0xed   :  { %514 = vadd.xlane.f32.xlu0 %v354_v38  ;;  %v3159_v47 = vpop.xlane.xlu1 %274  ;;  %v130_v38 = vld [vmem:[#allocation3 + $0x278] sm:$0xff] }
  0xee   :  { %5237 = vst [vmem:[#allocation37_spill] sm:$0xff] %v3159_v47  ;;  %v3161_v50 = vpop.xlane.xlu0 %272  ;;  %v369_v44 = vmul.f32 %v3037_v4, %v130_v38  ;;  %v137_v38 = vld [vmem:[#allocation3 + $0x2b0] sm:$0xff] }
  0xef   :  { %5238 = vst [vmem:[#allocation38_spill] sm:$0xff] %v3161_v50 }
  0xf0   :  { %520 = vadd.xlane.f32.xlu1 %v357_v45  ;;  %v368_v45 = vmul.f32 %v3037_v4, %v129_v41 }
  0xf1   :  { %518 = vadd.xlane.f32.xlu0 %v356_v46  ;;  %v3165_v57 = vpop.xlane.xlu1 %278 }
  0xf2   :  { %5239 = vst [vmem:[#allocation39_spill] sm:$0xff] %v3165_v57  ;;  %v3167_v58 = vpop.xlane.xlu0 %276 }
  0xf3   :  { %5240 = vst [vmem:[#allocation40_spill] sm:$0xff] %v3167_v58 }
  0xf4   :  { %524 = vadd.xlane.f32.xlu1 %v359_v53  ;;  %v131_v53 = vld [vmem:[#allocation3 + $0x280] sm:$0xff] }
  0xf5   :  { %522 = vadd.xlane.f32.xlu0 %v358_v56  ;;  %v3171_v1 = vpop.xlane.xlu1 %282  ;;  %v371_v56 = vmul.f32 %v3037_v4, %v132_v52  ;;  %v370_v59 = vmul.f32 %v3037_v4, %v131_v53  ;;  %v376_v53 = vmul.f32 %v3037_v4, %v137_v38 }
  0xf6   :  { %5241 = vst [vmem:[#allocation41_spill] sm:$0xff] %v3171_v1  ;;  %v3173_v6 = vpop.xlane.xlu0 %280 }
  0xf7   :  { %5242 = vst [vmem:[#allocation42_spill] sm:$0xff] %v3173_v6  ;;  %v144_v6 = vld [vmem:[#allocation3 + $0x2e8] sm:$0xff] }
  0xf8   :  { %528 = vadd.xlane.f32.xlu1 %v361_v63 }
  0xf9   :  { %526 = vadd.xlane.f32.xlu0 %v360_v0  ;;  %v389_v12 = vpop.xlane.xlu1 %388  ;;  %v134_v0 = vld [vmem:[#allocation3 + $0x298] sm:$0xff] }
  0xfa   :  { %v387_v13 = vpop.xlane.xlu0 %386  ;;  %v373_v8 = vmul.f32 %v3037_v4, %v134_v0  ;;  %v579_v41 = vadd.f32 %v389_v12, %v3089_v31 }
  0xfc   :  { %532 = vadd.xlane.f32.xlu1 %v363_v9  ;;  %v372_v9 = vmul.f32 %v3037_v4, %v133_v7  ;;  %v139_v7 = vld [vmem:[#allocation3 + $0x2c0] sm:$0xff] }
  0xfd   :  { %530 = vadd.xlane.f32.xlu0 %v362_v11  ;;  %v393_v20 = vpop.xlane.xlu1 %392 }
  0xfe   :  { %v391_v23 = vpop.xlane.xlu0 %390 }
 0x100   :  { %536 = vadd.xlane.f32.xlu1 %v365_v18  ;;  %v135_v18 = vld [vmem:[#allocation3 + $0x2a0] sm:$0xff] }
 0x101   :  { %534 = vadd.xlane.f32.xlu0 %v364_v19  ;;  %v397_v34 = vpop.xlane.xlu1 %396  ;;  %v375_v19 = vmul.f32 %v3037_v4, %v136_v17  ;;  %v374_v26 = vmul.f32 %v3037_v4, %v135_v18  ;;  %v142_v18 = vld [vmem:[#allocation3 + $0x2d8] sm:$0xff] }
 0x102   :  { %v395_v35 = vpop.xlane.xlu0 %394 }
 0x104   :  { %540 = vadd.xlane.f32.xlu1 %v367_v28 }
 0x105   :  { %538 = vadd.xlane.f32.xlu0 %v366_v33  ;;  %v401_v46 = vpop.xlane.xlu1 %400  ;;  %v138_v33 = vld [vmem:[#allocation3 + $0x2b8] sm:$0xff] }
 0x106   :  { %v3183_v51 = vpop.xlane.xlu0 %398  ;;  %v377_v52 = vmul.f32 %v3037_v4, %v138_v33  ;;  %v378_v33 = vmul.f32 %v3037_v4, %v139_v7  ;;  %v585_v38 = vadd.f32 %v401_v46, %v3099_v42  ;;  %v146_v7 = vld [vmem:[#allocation3 + $0x2f8] sm:$0xff] }
 0x108   :  { %544 = vadd.xlane.f32.xlu1 %v369_v44  ;;  %v3204_v44 = vld [vmem:[#allocation2] ss:$0 sm:$0xff] }
 0x109   :  { %542 = vadd.xlane.f32.xlu0 %v368_v45  ;;  %v3187_v62 = vpop.xlane.xlu1 %404  ;;  %v578_v45 = vadd.f32 %v387_v13, %v3083_v25  ;;  %v580_v13 = vadd.f32 %v391_v23, %v3081_v24 }
 0x10a   :  { %v3189_v63 = vpop.xlane.xlu0 %402 }
 0x10b   :  { %v680_v12 = vadd.f32 %v3204_v44, %v578_v45 }
 0x10c   :  { %548 = vadd.xlane.f32.xlu1 %v371_v56  ;;  %v140_v56 = vld [vmem:[#allocation3 + $0x2c8] sm:$0xff] }
 0x10d   :  { %546 = vadd.xlane.f32.xlu0 %v370_v59  ;;  %v3193_v11 = vpop.xlane.xlu1 %408  ;;  %v379_v17 = vmul.f32 %v3037_v4, %v140_v56  ;;  %v381_v56 = vmul.f32 %v3037_v4, %v142_v18  ;;  %vm776_vm2 = vcmp.ge.f32.partialorder %v680_v12, 0.0  ;;  %v687_v18 = vadd.f32 %v3204_v44, %v585_v38 }
 0x10e   :  { %v3195_v14 = vpop.xlane.xlu0 %406  ;;  %v385_v38 = vmul.f32 %v3037_v4, %v146_v7  ;;  %v589_v7 = vadd.f32 %v3193_v11, %v3111_v54 }
 0x10f   :  { %vm783_vm7 = vcmp.ge.f32.partialorder %v687_v18, 0.0 }
 0x110   :  { %552 = vadd.xlane.f32.xlu1 %v373_v8  ;;  %v681_v8 = vadd.f32 %v3204_v44, %v579_v41 }
 0x111   :  { %550 = vadd.xlane.f32.xlu0 %v372_v9  ;;  %v3199_v27 = vpop.xlane.xlu1 %412  ;;  %v581_v9 = vadd.f32 %v393_v20, %v3087_v30  ;;  %v141_v20 = vld [vmem:[#allocation3 + $0x2d0] sm:$0xff] }
 0x112   :  { %v3201_v28 = vpop.xlane.xlu0 %410  ;;  %v873_v23 = vmul.f32 0.2, %v681_v8  ;;  %vm777_vm1 = vcmp.ge.f32.partialorder %v681_v8, 0.0 }
 0x114   :  { %556 = vadd.xlane.f32.xlu1 %v375_v19  ;;  %v583_v19 = vadd.f32 %v397_v34, %v3093_v36  ;;  %v872_v34 = vmul.f32 0.2, %v680_v12  ;;  %v584_v36 = vadd.f32 %v3183_v51, %v3101_v43 }
 0x115   :  { %554 = vadd.xlane.f32.xlu0 %v374_v26  ;;  %v3209_v59 = vpop.xlane.xlu1 %416  ;;  %v582_v26 = vadd.f32 %v395_v35, %v3095_v37  ;;  %v683_v35 = vadd.f32 %v3204_v44, %v581_v9  ;;  %v380_v37 = vmul.f32 %v3037_v4, %v141_v20  ;;  %v587_v9 = vadd.f32 %v3187_v62, %v3105_v48  ;;  %v145_v48 = vld [vmem:[#allocation3 + $0x2f0] sm:$0xff] }
 0x116   :  { %v3211_v0 = vpop.xlane.xlu0 %414  ;;  %v685_v46 = vadd.f32 %v3204_v44, %v583_v19  ;;  %v383_v19 = vmul.f32 %v3037_v4, %v144_v6  ;;  %v3250_v51 = vsel %vm776_vm2, %v680_v12, %v872_v34 }
 0x117   :  { %v684_v42 = vadd.f32 %v3204_v44, %v582_v26  ;;  %v3243_v26 = vsel %vm777_vm1, %v681_v8, %v873_v23  ;;  %5244 = vst [vmem:[#allocation44_spill] sm:$0xff] %v3250_v51  ;;  %vm779_vm3 = vcmp.ge.f32.partialorder %v683_v35, 0.0  ;;  %v875_v62 = vmul.f32 0.2, %v683_v35 }
 0x118   :  { %560 = vadd.xlane.f32.xlu1 %v377_v52  ;;  %v682_v52 = vadd.f32 %v3204_v44, %v580_v13  ;;  %5243 = vst [vmem:[#allocation43_spill] sm:$0xff] %v3243_v26  ;;  %vm781_vm5 = vcmp.ge.f32.partialorder %v685_v46, 0.0  ;;  %v877_v6 = vmul.f32 0.2, %v685_v46  ;;  %v879_v8 = vmul.f32 0.2, %v687_v18 }
 0x119   :  { %558 = vadd.xlane.f32.xlu0 %v376_v53  ;;  %v3222_v41 = vpop.xlane.xlu1 %420  ;;  %v143_v53 = vld [vmem:[#allocation3 + $0x2e0] sm:$0xff]  ;;  %v876_v43 = vmul.f32 0.2, %v684_v42  ;;  %vm780_vm6 = vcmp.ge.f32.partialorder %v684_v42, 0.0  ;;  %v689_v23 = vadd.f32 %v3204_v44, %v587_v9  ;;  %v591_v9 = vadd.f32 %v3199_v27, %v3117_v60 }
 0x11a   :  { %v3224_v45 = vpop.xlane.xlu0 %418  ;;  %v874_v20 = vmul.f32 0.2, %v682_v52  ;;  %vm778_vm4 = vcmp.ge.f32.partialorder %v682_v52, 0.0 }
 0x11b   :  { %vm785_vm9 = vcmp.ge.f32.partialorder %v689_v23, 0.0 }
 0x11c   :  { %564 = vadd.xlane.f32.xlu1 %v379_v17  ;;  %v586_v17 = vadd.f32 %v3189_v63, %v3107_v49  ;;  %v686_v63 = vadd.f32 %v3204_v44, %v584_v36  ;;  %v3268_v36 = vsel %vm779_vm3, %v683_v35, %v875_v62  ;;  %v384_v49 = vmul.f32 %v3037_v4, %v145_v48 }
 0x11d   :  { %562 = vadd.xlane.f32.xlu0 %v378_v33  ;;  %v3237_v13 = vpop.xlane.xlu1 %424  ;;  %v382_v33 = vmul.f32 %v3037_v4, %v143_v53  ;;  %5245 = vst [vmem:[#allocation45_spill] sm:$0xff] %v3268_v36  ;;  %v3278_v11 = vsel %vm778_vm4, %v682_v52, %v874_v20  ;;  %v3286_v35 = vsel %vm783_vm7, %v687_v18, %v879_v8  ;;  %v881_v4 = vmul.f32 0.2, %v689_v23 }
 0x11e   :  { %v3239_v24 = vpop.xlane.xlu0 %422  ;;  %v688_v34 = vadd.f32 %v3204_v44, %v586_v17  ;;  %v3275_v17 = vsel %vm1064_vm0, %v3250_v51, -inf  ;;  %5246 = vst [vmem:[#allocation46_spill] sm:$0xff] %v3278_v11  ;;  %5249 = vst [vmem:[#allocation49_spill] sm:$0xff] %v3286_v35  ;;  %vm782_vm8 = vcmp.ge.f32.partialorder %v686_v63, 0.0  ;;  %v878_v27 = vmul.f32 0.2, %v686_v63 }
 0x11f   :  { %v691_v52 = vadd.f32 %v3204_v44, %v589_v7  ;;  %v593_v18 = vadd.f32 %v3209_v59, %v3123_v3  ;;  %v3317_v59 = vsel %vm1064_vm0, %v3286_v35, -inf  ;;  %v3323_v7 = vsel %vm785_vm9, %v689_v23, %v881_v4 }
 0x120   :  { %568 = vadd.xlane.f32.xlu1 %v381_v56  ;;  %v588_v56 = vadd.f32 %v3195_v14, %v3113_v55  ;;  %v3281_v14 = vsel %vm781_vm5, %v685_v46, %v877_v6  ;;  %v880_v51 = vmul.f32 0.2, %v688_v34  ;;  %vm784_vm10 = vcmp.ge.f32.partialorder %v688_v34, 0.0  ;;  %5251 = vst [vmem:[#allocation51_spill] sm:$0xff] %v3323_v7 }
 0x121   :  { %566 = vadd.xlane.f32.xlu0 %v380_v37  ;;  %v3254_v53 = vpop.xlane.xlu1 %428  ;;  %v3265_v37 = vsel %vm1064_vm0, %v3243_v26, -inf  ;;  %5247 = vst [vmem:[#allocation47_spill] sm:$0xff] %v3281_v14  ;;  %v3284_v26 = vsel %vm780_vm6, %v684_v42, %v876_v43  ;;  %v693_v42 = vadd.f32 %v3204_v44, %v591_v9  ;;  %v590_v43 = vadd.f32 %v3201_v28, %v3119_v61 }
 0x122   :  { %v3256_v12 = vpop.xlane.xlu0 %426  ;;  %5248 = vst [vmem:[#allocation48_spill] sm:$0xff] %v3284_v26  ;;  %v690_v46 = vadd.f32 %v3204_v44, %v588_v56  ;;  %v3307_v20 = vsel %vm1064_vm0, %v3281_v14, -inf  ;;  %v592_v6 = vadd.f32 %v3211_v0, %v3125_v5  ;;  %v3313_v28 = vsel %vm1064_vm0, %v3284_v26, -inf }
 0x123   :  { %v3320_v8 = vsel %vm782_vm8, %v686_v63, %v878_v27  ;;  %v3326_v0 = vsel %vm784_vm10, %v688_v34, %v880_v51  ;;  %vm787_vm11 = vcmp.ge.f32.partialorder %v691_v52, 0.0  ;;  %v885_v26 = vmul.f32 0.2, %v693_v42 }
 0x124   :  { %572 = vadd.xlane.f32.xlu1 %v383_v19  ;;  %v3299_v19 = vsel %vm1064_vm0, %v3268_v36, -inf  ;;  %5250 = vst [vmem:[#allocation50_spill] sm:$0xff] %v3320_v8  ;;  %5252 = vst [vmem:[#allocation52_spill] sm:$0xff] %v3326_v0  ;;  %vm786_vm12 = vcmp.ge.f32.partialorder %v690_v46, 0.0  ;;  %v692_v14 = vadd.f32 %v3204_v44, %v590_v43  ;;  %v695_v35 = vadd.f32 %v3204_v44, %v593_v18 }
 0x125   :  { %570 = vadd.xlane.f32.xlu0 %v382_v33  ;;  %v433_v48 = vpop.xlane.xlu1 %432  ;;  %v3303_v33 = vsel %vm1064_vm0, %v3278_v11, -inf  ;;  %vm789_vm13 = vcmp.ge.f32.partialorder %v693_v42, 0.0  ;;  %v694_v63 = vadd.f32 %v3204_v44, %v592_v6  ;;  %v595_v23 = vadd.f32 %v3222_v41, %v3129_v10 }
 0x126   :  { %v3288_v62 = vpop.xlane.xlu0 %430  ;;  %v594_v27 = vadd.f32 %v3224_v45, %v3131_v2  ;;  %v3337_v51 = vsel %vm1064_vm0, %v3320_v8, -inf  ;;  %v3341_v34 = vsel %vm1064_vm0, %v3323_v7, -inf  ;;  %v597_v4 = vadd.f32 %v3237_v13, %v3135_v15 }
 0x127   :  { %5253 = vst [vmem:[#allocation53_spill] sm:$0xff] %v3337_v51  ;;  %5254 = vst [vmem:[#allocation54_spill] sm:$0xff] %v3341_v34  ;;  %v596_v43 = vadd.f32 %v3239_v24, %v3137_v16  ;;  %v3351_v41 = vsel %vm1064_vm0, %v3326_v0, -inf  ;;  %v599_v7 = vadd.f32 %v3254_v53, %v3141_v21  ;;  %v3361_v13 = vsel %vm789_vm13, %v693_v42, %v885_v26 }
 0x128   :  { %576 = vadd.xlane.f32.xlu1 %v385_v38  ;;  %v882_v38 = vmul.f32 0.2, %v690_v46  ;;  %5257 = vst [vmem:[#allocation57_spill] sm:$0xff] %v3361_v13  ;;  %vm788_vm14 = vcmp.ge.f32.partialorder %v692_v14, 0.0  ;;  %v884_v24 = vmul.f32 0.2, %v692_v14  ;;  %v697_v34 = vadd.f32 %v3204_v44, %v595_v23 }
 0x129   :  { %574 = vadd.xlane.f32.xlu0 %v384_v49  ;;  %v437_v56 = vpop.xlane.xlu1 %436  ;;  %v883_v49 = vmul.f32 0.2, %v691_v52  ;;  %v887_v11 = vmul.f32 0.2, %v695_v35  ;;  %vm791_vm15 = vcmp.ge.f32.partialorder %v695_v35, 0.0  ;;  %v696_v0 = vadd.f32 %v3204_v44, %v594_v27 }
 0x12a   :  { %v435_v9 = vpop.xlane.xlu0 %434  ;;  %v3357_v8 = vsel %vm786_vm12, %v690_v46, %v882_v38  ;;  %v886_v36 = vmul.f32 0.2, %v694_v63  ;;  %vm790_vm1 = vcmp.ge.f32.partialorder %v694_v63, 0.0  ;;  %v699_v46 = vadd.f32 %v3204_v44, %v597_v4 }
 0x12b   :  { %v3354_v45 = vsel %vm787_vm11, %v691_v52, %v883_v49  ;;  %5256 = vst [vmem:[#allocation56_spill] sm:$0xff] %v3357_v8  ;;  %v698_v53 = vadd.f32 %v3204_v44, %v596_v43  ;;  %v3373_v49 = vsel %vm1064_vm0, %v3357_v8, -inf  ;;  %v701_v38 = vadd.f32 %v3204_v44, %v599_v7 }
 0x12c   :  { %5255 = vst [vmem:[#allocation55_spill] sm:$0xff] %v3354_v45  ;;  %v3367_v52 = vsel %vm1064_vm0, %v3354_v45, -inf  ;;  %5258 = vst [vmem:[#allocation58_spill] sm:$0xff] %v3373_v49  ;;  %v598_v23 = vadd.f32 %v3256_v12, %v3143_v22  ;;  %v601_v27 = vadd.f32 %v433_v48, %v3147_v29  ;;  %v3381_v45 = vsel %vm1064_vm0, %v3361_v13, -inf }
 0x12d   :  { %v441_v18 = vpop.xlane.xlu1 %440  ;;  %v3384_v4 = vsel %vm788_vm14, %v692_v14, %v884_v24  ;;  %v3387_v43 = vsel %vm791_vm15, %v695_v35, %v887_v11  ;;  %v600_v8 = vadd.f32 %v3288_v62, %v3149_v32  ;;  %v3391_v49 = vsel %vm790_vm1, %v694_v63, %v886_v36 }
 0x12e   :  { %v3347_v6 = vpop.xlane.xlu0 %438  ;;  %5259 = vst [vmem:[#allocation59_spill] sm:$0xff] %v3384_v4  ;;  %5260 = vst [vmem:[#allocation60_spill] sm:$0xff] %v3387_v43  ;;  %vm793_vm2 = vcmp.ge.f32.partialorder %v697_v34, 0.0  ;;  %v889_v7 = vmul.f32 0.2, %v697_v34  ;;  %vm792_vm3 = vcmp.ge.f32.partialorder %v696_v0, 0.0  ;;  %v700_v11 = vadd.f32 %v3204_v44, %v598_v23 }
 0x12f   :  { %5261 = vst [vmem:[#allocation61_spill] sm:$0xff] %v3391_v49  ;;  %v888_v12 = vmul.f32 0.2, %v696_v0  ;;  %vm795_vm4 = vcmp.ge.f32.partialorder %v699_v46, 0.0  ;;  %v891_v48 = vmul.f32 0.2, %v699_v46  ;;  %v703_v35 = vadd.f32 %v3204_v44, %v601_v27 }
 0x130   :  { %v890_v29 = vmul.f32 0.2, %v698_v53  ;;  %vm794_vm5 = vcmp.ge.f32.partialorder %v698_v53, 0.0  ;;  %v893_v14 = vmul.f32 0.2, %v701_v38  ;;  %vm797_vm6 = vcmp.ge.f32.partialorder %v701_v38, 0.0 }
 0x131   :  { %v445_v26 = vpop.xlane.xlu1 %444  ;;  %v702_v36 = vadd.f32 %v3204_v44, %v600_v8  ;;  %v603_v62 = vadd.f32 %v437_v56, %v3153_v39  ;;  %v602_v63 = vadd.f32 %v435_v9, %v3155_v40  ;;  %v3402_v24 = vsel %vm1064_vm0, %v3384_v4, -inf }
 0x132   :  { %v443_v42 = vpop.xlane.xlu0 %442  ;;  %5262 = vst [vmem:[#allocation62_spill] sm:$0xff] %v3402_v24  ;;  %v3406_v32 = vsel %vm1064_vm0, %v3387_v43, -inf  ;;  %v3410_v23 = vsel %vm1064_vm0, %v3391_v49, -inf  ;;  %v605_v27 = vadd.f32 %v441_v18, %v3159_v47  ;;  %v3414_v8 = vsel %vm793_vm2, %v697_v34, %v889_v7 }
 0x133   :  { %5263 = vst [vmem:[#allocation63_spill] sm:$0xff] %v3406_v32  ;;  %5264 = vst [vmem:[#allocation64_spill] sm:$0xff] %v3410_v23  ;;  %v3417_v56 = vsel %vm792_vm3, %v696_v0, %v888_v12  ;;  %v3420_v9 = vsel %vm795_vm4, %v699_v46, %v891_v48  ;;  %v3422_v4 = vsel %vm794_vm5, %v698_v53, %v890_v29  ;;  %vm796_vm7 = vcmp.ge.f32.partialorder %v700_v11, 0.0 }
 0x134   :  { %5265 = vst [vmem:[#allocation65_spill] sm:$0xff] %v3414_v8  ;;  %5266 = vst [vmem:[#allocation66_spill] sm:$0xff] %v3417_v56  ;;  %v3424_v32 = vsel %vm797_vm6, %v701_v38, %v893_v14  ;;  %v892_v49 = vmul.f32 0.2, %v700_v11  ;;  %v895_v23 = vmul.f32 0.2, %v703_v35  ;;  %v705_v34 = vadd.f32 %v3204_v44, %v603_v62 }
 0x135   :  { %v449_v13 = vpop.xlane.xlu1 %448  ;;  %5267 = vst [vmem:[#allocation67_spill] sm:$0xff] %v3420_v9  ;;  %5268 = vst [vmem:[#allocation68_spill] sm:$0xff] %v3422_v4  ;;  %vm799_vm8 = vcmp.ge.f32.partialorder %v703_v35, 0.0  ;;  %v894_v18 = vmul.f32 0.2, %v702_v36  ;;  %v704_v7 = vadd.f32 %v3204_v44, %v602_v63  ;;  %vm798_vm9 = vcmp.ge.f32.partialorder %v702_v36, 0.0 }
 0x136   :  { %v3393_v22 = vpop.xlane.xlu0 %446  ;;  %5269 = vst [vmem:[#allocation69_spill] sm:$0xff] %v3424_v32  ;;  %v707_v0 = vadd.f32 %v3204_v44, %v605_v27  ;;  %v604_v29 = vadd.f32 %v3347_v6, %v3161_v50  ;;  %v607_v46 = vadd.f32 %v445_v26, %v3165_v57  ;;  %v3434_v53 = vsel %vm1064_vm0, %v3414_v8, -inf }
 0x137   :  { %v3438_v38 = vsel %vm1064_vm0, %v3417_v56, -inf  ;;  %v3442_v12 = vsel %vm1064_vm0, %v3420_v9, -inf  ;;  %v606_v48 = vadd.f32 %v443_v42, %v3167_v58  ;;  %v3447_v6 = vsel %vm1064_vm0, %v3422_v4, -inf }
 0x138   :  { %5270 = vst [vmem:[#allocation70_spill] sm:$0xff] %v3447_v6  ;;  %v3451_v26 = vsel %vm1064_vm0, %v3424_v32, -inf  ;;  %v3454_v63 = vsel %vm796_vm7, %v700_v11, %v892_v49  ;;  %v3457_v27 = vsel %vm799_vm8, %v703_v35, %v895_v23  ;;  %v3459_v9 = vsel %vm798_vm9, %v702_v36, %v894_v18 }
 0x139   :  { %v453_v40 = vpop.xlane.xlu1 %452  ;;  %5271 = vst [vmem:[#allocation71_spill] sm:$0xff] %v3451_v26  ;;  %5272 = vst [vmem:[#allocation72_spill] sm:$0xff] %v3454_v63  ;;  %vm801_vm10 = vcmp.ge.f32.partialorder %v705_v34, 0.0  ;;  %v897_v42 = vmul.f32 0.2, %v705_v34  ;;  %vm800_vm11 = vcmp.ge.f32.partialorder %v704_v7, 0.0  ;;  %v706_v4 = vadd.f32 %v3204_v44, %v604_v29 }
 0x13a   :  { %v451_v43 = vpop.xlane.xlu0 %450  ;;  %5273 = vst [vmem:[#allocation73_spill] sm:$0xff] %v3457_v27  ;;  %5274 = vst [vmem:[#allocation74_spill] sm:$0xff] %v3459_v9  ;;  %v896_v56 = vmul.f32 0.2, %v704_v7  ;;  %v899_v8 = vmul.f32 0.2, %v707_v0  ;;  %v709_v6 = vadd.f32 %v3204_v44, %v607_v46  ;;  %v708_v49 = vadd.f32 %v3204_v44, %v606_v48 }
 0x13b   :  { %v3465_v32 = vsel %vm1064_vm0, %v3454_v63, -inf  ;;  %vm803_vm12 = vcmp.ge.f32.partialorder %v707_v0, 0.0  ;;  %v609_v11 = vadd.f32 %v449_v13, %v3171_v1  ;;  %v3471_v23 = vsel %vm1064_vm0, %v3457_v27, -inf  ;;  %v5280_v1 = vld [vmem:[#allocation12_spill] sm:$0xff] }
 0x13c   :  { %5275 = vst [vmem:[#allocation75_spill] sm:$0xff] %v3465_v32  ;;  %5276 = vst [vmem:[#allocation76_spill] sm:$0xff] %v3471_v23  ;;  %v3475_v18 = vsel %vm1064_vm0, %v3459_v9, -inf  ;;  %v611_v29 = vadd.f32 %v453_v40, %v3089_v31  ;;  %v610_v46 = vadd.f32 %v451_v43, %v3083_v25  ;;  %v3480_v63 = vsel %vm801_vm10, %v705_v34, %v897_v42 }
 0x13d   :  { %v457_v14 = vpop.xlane.xlu1 %456  ;;  %5277 = vst [vmem:[#allocation77_spill] sm:$0xff] %v3475_v18  ;;  %5278 = vst [vmem:[#allocation78_spill] sm:$0xff] %v3480_v63  ;;  %v3482_v48 = vsel %vm800_vm11, %v704_v7, %v896_v56  ;;  %v3486_v26 = vsel %vm803_vm12, %v707_v0, %v899_v8  ;;  %vm802_vm13 = vcmp.ge.f32.partialorder %v706_v4, 0.0  ;;  %v898_v27 = vmul.f32 0.2, %v706_v4  ;;  %v5282_v18 = vld [vmem:[#allocation42_spill] sm:$0xff] }
 0x13e   :  { %v455_v62 = vpop.xlane.xlu0 %454  ;;  %5279 = vst [vmem:[#allocation79_spill] sm:$0xff] %v3482_v48  ;;  %v613_v13 = vadd.f32 %v457_v14, %v3087_v30  ;;  %5281 = vst [vmem:[#allocation80_spill] sm:$0xff] %v3486_v26  ;;  %v901_v23 = vmul.f32 0.2, %v709_v6  ;;  %vm805_vm14 = vcmp.ge.f32.partialorder %v709_v6, 0.0  ;;  %v711_v40 = vadd.f32 %v3204_v44, %v609_v11 }
 0x13f   :  { %v612_v32 = vadd.f32 %v455_v62, %v5280_v1  ;;  %v900_v9 = vmul.f32 0.2, %v708_v49  ;;  %v608_v43 = vadd.f32 %v3393_v22, %v5282_v18  ;;  %v3493_v56 = vsel %vm1064_vm0, %v3480_v63, -inf  ;;  %v5285_v22 = vld [vmem:[#allocation15_spill] sm:$0xff] }
 0x140   :  { %5283 = vst [vmem:[#allocation81_spill] sm:$0xff] %v3493_v56  ;;  %vm804_vm15 = vcmp.ge.f32.partialorder %v708_v49, 0.0  ;;  %v713_v8 = vadd.f32 %v3204_v44, %v611_v29  ;;  %v712_v7 = vadd.f32 %v3204_v44, %v610_v46  ;;  %v3499_v0 = vsel %vm1064_vm0, %v3482_v48, -inf  ;;  %v5289_v46 = vld [vmem:[#allocation16_spill] sm:$0xff] }
 0x141   :  { %v461_v35 = vpop.xlane.xlu1 %460  ;;  %5284 = vst [vmem:[#allocation82_spill] sm:$0xff] %v3499_v0  ;;  %v715_v14 = vadd.f32 %v3204_v44, %v613_v13  ;;  %v714_v62 = vadd.f32 %v3204_v44, %v612_v32  ;;  %v3506_v18 = vsel %vm1064_vm0, %v3486_v26, -inf  ;;  %v3509_v63 = vsel %vm802_vm13, %v706_v4, %v898_v27 }
 0x142   :  { %v459_v36 = vpop.xlane.xlu0 %458  ;;  %v615_v11 = vadd.f32 %v461_v35, %v5285_v22  ;;  %5286 = vst [vmem:[#allocation83_spill] sm:$0xff] %v3506_v18  ;;  %5287 = vst [vmem:[#allocation84_spill] sm:$0xff] %v3509_v63  ;;  %v3512_v29 = vsel %vm805_vm14, %v709_v6, %v901_v23  ;;  %v3515_v48 = vsel %vm804_vm15, %v708_v49, %v900_v9  ;;  %vm807_vm1 = vcmp.ge.f32.partialorder %v711_v40, 0.0  ;;  %v5291_v9 = vld [vmem:[#allocation17_spill] sm:$0xff]  ;;  %v5292_v23 = vld [vmem:[#allocation18_spill] sm:$0xff] }
 0x143   :  { %5288 = vst [vmem:[#allocation85_spill] sm:$0xff] %v3512_v29  ;;  %v614_v1 = vadd.f32 %v459_v36, %v5289_v46  ;;  %5290 = vst [vmem:[#allocation86_spill] sm:$0xff] %v3515_v48  ;;  %v903_v13 = vmul.f32 0.2, %v711_v40  ;;  %v710_v32 = vadd.f32 %v3204_v44, %v608_v43  ;;  %vm809_vm2 = vcmp.ge.f32.partialorder %v713_v8, 0.0 }
 0x144   :  { %v905_v22 = vmul.f32 0.2, %v713_v8  ;;  %vm808_vm3 = vcmp.ge.f32.partialorder %v712_v7, 0.0  ;;  %v904_v26 = vmul.f32 0.2, %v712_v7  ;;  %vm811_vm4 = vcmp.ge.f32.partialorder %v715_v14, 0.0 }
 0x145   :  { %v465_v34 = vpop.xlane.xlu1 %464  ;;  %v907_v4 = vmul.f32 0.2, %v715_v14  ;;  %v906_v27 = vmul.f32 0.2, %v714_v62  ;;  %v717_v6 = vadd.f32 %v3204_v44, %v615_v11  ;;  %vm810_vm5 = vcmp.ge.f32.partialorder %v714_v62, 0.0 }
 0x146   :  { %v463_v42 = vpop.xlane.xlu0 %462  ;;  %v716_v36 = vadd.f32 %v3204_v44, %v614_v1  ;;  %v617_v49 = vadd.f32 %v465_v34, %v5291_v9  ;;  %v3524_v43 = vsel %vm1064_vm0, %v3509_v63, -inf  ;;  %v3528_v18 = vsel %vm1064_vm0, %v3512_v29, -inf }
 0x147   :  { %v616_v46 = vadd.f32 %v463_v42, %v5292_v23  ;;  %5293 = vst [vmem:[#allocation87_spill] sm:$0xff] %v3524_v43  ;;  %5294 = vst [vmem:[#allocation88_spill] sm:$0xff] %v3528_v18  ;;  %v3532_v0 = vsel %vm1064_vm0, %v3515_v48, -inf  ;;  %v902_v11 = vmul.f32 0.2, %v710_v32  ;;  %v3535_v1 = vsel %vm807_vm1, %v711_v40, %v903_v13  ;;  %v5297_v13 = vld [vmem:[#allocation19_spill] sm:$0xff] }
 0x148   :  { %5295 = vst [vmem:[#allocation89_spill] sm:$0xff] %v3532_v0  ;;  %5296 = vst [vmem:[#allocation90_spill] sm:$0xff] %v3535_v1  ;;  %vm806_vm6 = vcmp.ge.f32.partialorder %v710_v32, 0.0  ;;  %v3538_v34 = vsel %vm809_vm2, %v713_v8, %v905_v22  ;;  %v3541_v42 = vsel %vm808_vm3, %v712_v7, %v904_v26  ;;  %v3544_v29 = vsel %vm811_vm4, %v715_v14, %v907_v4  ;;  %v5299_v8 = vld [vmem:[#allocation20_spill] sm:$0xff] }
 0x149   :  { %v469_v30 = vpop.xlane.xlu1 %468  ;;  %v3546_v63 = vsel %vm810_vm5, %v714_v62, %v906_v27  ;;  %vm813_vm7 = vcmp.ge.f32.partialorder %v717_v6, 0.0  ;;  %v909_v48 = vmul.f32 0.2, %v717_v6  ;;  %v908_v0 = vmul.f32 0.2, %v716_v36 }
 0x14a   :  { %v467_v35 = vpop.xlane.xlu0 %466  ;;  %v719_v23 = vadd.f32 %v3204_v44, %v617_v49  ;;  %v718_v40 = vadd.f32 %v3204_v44, %v616_v46  ;;  %v619_v9 = vadd.f32 %v469_v30, %v5297_v13  ;;  %v3551_v18 = vsel %vm806_vm6, %v710_v32, %v902_v11 }
 0x14b   :  { %5298 = vst [vmem:[#allocation91_spill] sm:$0xff] %v3551_v18  ;;  %vm812_vm8 = vcmp.ge.f32.partialorder %v716_v36, 0.0  ;;  %v618_v26 = vadd.f32 %v467_v35, %v5299_v8  ;;  %v3557_v62 = vsel %vm1064_vm0, %v3535_v1, -inf  ;;  %v3561_v4 = vsel %vm1064_vm0, %v3538_v34, -inf }
 0x14c   :  { %5300 = vst [vmem:[#allocation92_spill] sm:$0xff] %v3557_v62  ;;  %v3565_v30 = vsel %vm1064_vm0, %v3541_v42, -inf  ;;  %v3570_v32 = vsel %vm1064_vm0, %v3544_v29, -inf  ;;  %v3577_v35 = vsel %vm813_vm7, %v717_v6, %v909_v48  ;;  %v3580_v49 = vsel %vm812_vm8, %v716_v36, %v908_v0 }
 0x14d   :  { %v473_v56 = vpop.xlane.xlu1 %472  ;;  %5301 = vst [vmem:[#allocation93_spill] sm:$0xff] %v3577_v35  ;;  %5302 = vst [vmem:[#allocation94_spill] sm:$0xff] %v3580_v49  ;;  %v911_v11 = vmul.f32 0.2, %v719_v23  ;;  %v910_v1 = vmul.f32 0.2, %v718_v40  ;;  %v721_v62 = vadd.f32 %v3204_v44, %v619_v9  ;;  %v5365_v43 = vmax.f32 %v3265_v37, %v3561_v4 }
 0x14e   :  { %v471_v25 = vpop.xlane.xlu0 %470  ;;  %v621_v7 = vadd.f32 %v473_v56, %v3111_v54  ;;  %v3574_v56 = vsel %vm1064_vm0, %v3546_v63, -inf  ;;  %vm815_vm9 = vcmp.ge.f32.partialorder %v719_v23, 0.0  ;;  %vm814_vm10 = vcmp.ge.f32.partialorder %v718_v40, 0.0  ;;  %v5368_v4 = vld [vmem:[#allocation44_spill] sm:$0xff] }
 0x14f   :  { %v620_v46 = vadd.f32 %v471_v25, %v3113_v55  ;;  %v720_v25 = vadd.f32 %v3204_v44, %v618_v26  ;;  %v3602_v48 = vsel %vm1064_vm0, %v3580_v49, -inf  ;;  %v3604_v6 = vsel %vm815_vm9, %v719_v23, %v911_v11 }
 0x150   :  { %v723_v18 = vadd.f32 %v3204_v44, %v621_v7  ;;  %v3597_v7 = vsel %vm1064_vm0, %v3577_v35, -inf  ;;  %vm817_vm11 = vcmp.ge.f32.partialorder %v721_v62, 0.0 }
 0x151   :  { %v477_v14 = vpop.xlane.xlu1 %476  ;;  %v722_v0 = vadd.f32 %v3204_v44, %v620_v46  ;;  %v3606_v46 = vsel %vm814_vm10, %v718_v40, %v910_v1  ;;  %vm816_vm12 = vcmp.ge.f32.partialorder %v720_v25, 0.0  ;;  %v912_v9 = vmul.f32 0.2, %v720_v25 }
 0x152   :  { %v475_v22 = vpop.xlane.xlu0 %474  ;;  %v623_v27 = vadd.f32 %v477_v14, %v3117_v60  ;;  %5303 = vst [vmem:[#allocation95_spill] sm:$0xff] %v3606_v46  ;;  %vm819_vm13 = vcmp.ge.f32.partialorder %v723_v18, 0.0  ;;  %v915_v60 = vmul.f32 0.2, %v723_v18 }
 0x153   :  { %v622_v36 = vadd.f32 %v475_v22, %v3119_v61  ;;  %v913_v22 = vmul.f32 0.2, %v721_v62  ;;  %v914_v8 = vmul.f32 0.2, %v722_v0  ;;  %vm818_vm14 = vcmp.ge.f32.partialorder %v722_v0, 0.0 }
 0x154   :  { %v725_v14 = vadd.f32 %v3204_v44, %v623_v27  ;;  %v3632_v11 = vsel %vm819_vm13, %v723_v18, %v915_v60 }
 0x155   :  { %v481_v55 = vpop.xlane.xlu1 %480  ;;  %v724_v13 = vadd.f32 %v3204_v44, %v622_v36  ;;  %v3619_v36 = vsel %vm1064_vm0, %v3604_v6, -inf  ;;  %5307 = vst [vmem:[#allocation99_spill] sm:$0xff] %v3632_v11 }
 0x156   :  { %v479_v54 = vpop.xlane.xlu0 %478  ;;  %v625_v27 = vadd.f32 %v481_v55, %v3123_v3  ;;  %v917_v49 = vmul.f32 0.2, %v725_v14  ;;  %vm821_vm15 = vcmp.ge.f32.partialorder %v725_v14, 0.0  ;;  %v3623_v55 = vsel %vm1064_vm0, %v3606_v46, -inf }
 0x157   :  { %v624_v23 = vadd.f32 %v479_v54, %v3125_v5  ;;  %5304 = vst [vmem:[#allocation96_spill] sm:$0xff] %v3623_v55  ;;  %v3626_v54 = vsel %vm817_vm11, %v721_v62, %v913_v22  ;;  %vm820_vm1 = vcmp.ge.f32.partialorder %v724_v13, 0.0 }
 0x158   :  { %5305 = vst [vmem:[#allocation97_spill] sm:$0xff] %v3626_v54  ;;  %v727_v5 = vadd.f32 %v3204_v44, %v625_v27  ;;  %v3637_v3 = vsel %vm821_vm15, %v725_v14, %v917_v49 }
 0x159   :  { %v485_v26 = vpop.xlane.xlu1 %484  ;;  %5309 = vst [vmem:[#allocation101_spill] sm:$0xff] %v3637_v3  ;;  %v726_v46 = vadd.f32 %v3204_v44, %v624_v23  ;;  %v3666_v23 = vsel %vm1064_vm0, %v3637_v3, -inf }
 0x15a   :  { %v483_v61 = vpop.xlane.xlu0 %482  ;;  %v627_v1 = vadd.f32 %v485_v26, %v3129_v10  ;;  %v3629_v26 = vsel %vm816_vm12, %v720_v25, %v912_v9  ;;  %vm823_vm2 = vcmp.ge.f32.partialorder %v727_v5, 0.0 }
 0x15b   :  { %v626_v35 = vadd.f32 %v483_v61, %v3131_v2  ;;  %5306 = vst [vmem:[#allocation98_spill] sm:$0xff] %v3629_v26  ;;  %v3634_v61 = vsel %vm818_vm14, %v722_v0, %v914_v8  ;;  %v916_v2 = vmul.f32 0.2, %v724_v13  ;;  %v3649_v8 = vsel %vm1064_vm0, %v3626_v54, -inf  ;;  %v5319_v54 = vld [vmem:[#allocation32_spill] sm:$0xff] }
 0x15c   :  { %5308 = vst [vmem:[#allocation100_spill] sm:$0xff] %v3634_v61  ;;  %v729_v62 = vadd.f32 %v3204_v44, %v627_v1  ;;  %v3653_v49 = vsel %vm1064_vm0, %v3629_v26, -inf  ;;  %v3657_v0 = vsel %vm1064_vm0, %v3632_v11, -inf  ;;  %vm822_vm3 = vcmp.ge.f32.partialorder %v726_v46, 0.0 }
 0x15d   :  { %v489_v40 = vpop.xlane.xlu1 %488  ;;  %v728_v60 = vadd.f32 %v3204_v44, %v626_v35  ;;  %5310 = vst [vmem:[#allocation102_spill] sm:$0xff] %v3657_v0  ;;  %v3662_v35 = vsel %vm1064_vm0, %v3634_v61, -inf  ;;  %v3668_v1 = vsel %vm820_vm1, %v724_v13, %v916_v2  ;;  %v918_v9 = vmul.f32 0.2, %v726_v46  ;;  %v5313_v61 = vld [vmem:[#allocation54_spill] sm:$0xff] }
 0x15e   :  { %v487_v10 = vpop.xlane.xlu0 %486  ;;  %v629_v18 = vadd.f32 %v489_v40, %v3135_v15  ;;  %5311 = vst [vmem:[#allocation103_spill] sm:$0xff] %v3662_v35  ;;  %5312 = vst [vmem:[#allocation104_spill] sm:$0xff] %v3668_v1  ;;  %v919_v40 = vmul.f32 0.2, %v727_v5  ;;  %v921_v25 = vmul.f32 0.2, %v729_v62 }
 0x15f   :  { %v628_v14 = vadd.f32 %v487_v10, %v3137_v16  ;;  %vm825_vm4 = vcmp.ge.f32.partialorder %v729_v62, 0.0  ;;  %v920_v15 = vmul.f32 0.2, %v728_v60  ;;  %vm824_vm5 = vcmp.ge.f32.partialorder %v728_v60, 0.0  ;;  %v5321_v35 = vld [vmem:[#allocation33_spill] sm:$0xff] }
 0x160   :  { %v731_v10 = vadd.f32 %v3204_v44, %v629_v18  ;;  %v3683_v18 = vsel %vm1064_vm0, %v3668_v1, -inf  ;;  %v3694_v11 = vsel %vm825_vm4, %v729_v62, %v921_v25 }
 0x161   :  { %v493_v22 = vpop.xlane.xlu1 %492  ;;  %v730_v2 = vadd.f32 %v3204_v44, %v628_v14  ;;  %5315 = vst [vmem:[#allocation54_spill] sm:$0xff] %v3683_v18  ;;  %v3691_v14 = vsel %vm822_vm3, %v726_v46, %v918_v9  ;;  %5318 = vst [vmem:[#allocation107_spill] sm:$0xff] %v3694_v11  ;;  %v3697_v0 = vsel %vm824_vm5, %v728_v60, %v920_v15  ;;  %v5322_v9 = vld [vmem:[#allocation34_spill] sm:$0xff] }
 0x162   :  { %v491_v27 = vpop.xlane.xlu0 %490  ;;  %v631_v16 = vadd.f32 %v493_v22, %v3141_v21  ;;  %v3686_v22 = vsel %vm823_vm2, %v727_v5, %v919_v40  ;;  %5317 = vst [vmem:[#allocation106_spill] sm:$0xff] %v3691_v14  ;;  %5320 = vst [vmem:[#allocation108_spill] sm:$0xff] %v3697_v0  ;;  %v923_v51 = vmul.f32 0.2, %v731_v10  ;;  %vm827_vm6 = vcmp.ge.f32.partialorder %v731_v10, 0.0 }
 0x163   :  { %5316 = vst [vmem:[#allocation105_spill] sm:$0xff] %v3686_v22  ;;  %v630_v21 = vadd.f32 %v491_v27, %v5319_v54  ;;  %v3705_v40 = vsel %vm1064_vm0, %v3686_v22, -inf  ;;  %v922_v46 = vmul.f32 0.2, %v730_v2  ;;  %v3709_v15 = vsel %vm1064_vm0, %v3691_v14, -inf  ;;  %v5325_v14 = vld [vmem:[#allocation36_spill] sm:$0xff] }
 0x164   :  { %v733_v1 = vadd.f32 %v3204_v44, %v631_v16  ;;  %v3713_v16 = vsel %vm1064_vm0, %v3694_v11, -inf  ;;  %vm826_vm7 = vcmp.ge.f32.partialorder %v730_v2, 0.0  ;;  %v3718_v27 = vsel %vm1064_vm0, %v3697_v0, -inf  ;;  %v5327_v0 = vld [vmem:[#allocation64_spill] sm:$0xff] }
 0x165   :  { %v497_v13 = vpop.xlane.xlu1 %496  ;;  %5323 = vst [vmem:[#allocation109_spill] sm:$0xff] %v3718_v27  ;;  %v3722_v3 = vsel %vm827_vm6, %v731_v10, %v923_v51  ;;  %v2932_v11 = vmov 0   ;;  %v3730_v24 = vsel %vm826_vm7, %v730_v2, %v922_v46 }
 0x166   :  { %v495_v26 = vpop.xlane.xlu0 %494  ;;  %v633_v55 = vadd.f32 %v497_v13, %v5321_v35  ;;  %v732_v13 = vadd.f32 %v3204_v44, %v630_v21  ;;  %5324 = vst [vmem:[#allocation110_spill] sm:$0xff] %v3722_v3  ;;  %v925_v35 = vmul.f32 0.2, %v733_v1  ;;  %2501 = vset.pattern.permute.xlu1 %v2932_v11  ;;  %2500 = vset.pattern.permute.xlu0 %v2932_v11  ;;  %vm829_vm8 = vcmp.ge.f32.partialorder %v733_v1, 0.0 }
 0x167   :  { %v632_v60 = vadd.f32 %v495_v26, %v5322_v9  ;;  %v5326_v26 = vld [vmem:[#allocation63_spill] sm:$0xff]  ;;  %v3742_v2 = vsel %vm1064_vm0, %v3722_v3, -inf }
 0x168   :  { %v735_v54 = vadd.f32 %v3204_v44, %v633_v55  ;;  %5328 = vst [vmem:[#allocation63_spill] sm:$0xff] %v3730_v24  ;;  %v924_v46 = vmul.f32 0.2, %v732_v13  ;;  %v3744_v18 = vsel %vm829_vm8, %v733_v1, %v925_v35  ;;  %vm828_vm9 = vcmp.ge.f32.partialorder %v732_v13, 0.0 }
 0x169   :  { %v501_v62 = vpop.xlane.xlu1 %500  ;;  %v734_v10 = vadd.f32 %v3204_v44, %v632_v60  ;;  %5329 = vst [vmem:[#allocation64_spill] sm:$0xff] %v3744_v18 }
 0x16a   :  { %v499_v25 = vpop.xlane.xlu0 %498  ;;  %v635_v5 = vadd.f32 %v501_v62, %v3153_v39  ;;  %v927_v60 = vmul.f32 0.2, %v735_v54  ;;  %vm831_vm10 = vcmp.ge.f32.partialorder %v735_v54, 0.0  ;;  %v3759_v39 = vsel %vm828_vm9, %v732_v13, %v924_v46 }
 0x16b   :  { %v634_v22 = vadd.f32 %v499_v25, %v5325_v14  ;;  %5332 = vst [vmem:[#allocation113_spill] sm:$0xff] %v3759_v39  ;;  %vm830_vm11 = vcmp.ge.f32.partialorder %v734_v10, 0.0  ;;  %v3773_v46 = vsel %vm1064_vm0, %v3759_v39, -inf }
 0x16c   :  { %v737_v55 = vadd.f32 %v3204_v44, %v635_v5  ;;  %5336 = vst [vmem:[#allocation117_spill] sm:$0xff] %v3773_v46 }
 0x16d   :  { %v505_v21 = vpop.xlane.xlu1 %504  ;;  %v736_v5 = vadd.f32 %v3204_v44, %v634_v22  ;;  %v3757_v22 = vsel %vm1064_vm0, %v3744_v18, -inf }
 0x16e   :  { %v503_v51 = vpop.xlane.xlu0 %502  ;;  %v637_v62 = vadd.f32 %v505_v21, %v3159_v47  ;;  %v3749_v21 = vsel %vm1064_vm0, %v3730_v24, -inf  ;;  %v926_v47 = vmul.f32 0.2, %v734_v10  ;;  %v929_v14 = vmul.f32 0.2, %v737_v55  ;;  %5331 = vst [vmem:[#allocation112_spill] sm:$0xff] %v3757_v22 }
 0x16f   :  { %v636_v25 = vadd.f32 %v503_v51, %v3161_v50  ;;  %5330 = vst [vmem:[#allocation111_spill] sm:$0xff] %v3749_v21  ;;  %vm833_vm12 = vcmp.ge.f32.partialorder %v737_v55, 0.0  ;;  %v3761_v24 = vsel %vm831_vm10, %v735_v54, %v927_v60  ;;  %vm832_vm13 = vcmp.ge.f32.partialorder %v736_v5, 0.0 }
 0x170   :  { %v739_v51 = vadd.f32 %v3204_v44, %v637_v62  ;;  %5333 = vst [vmem:[#allocation114_spill] sm:$0xff] %v3761_v24  ;;  %v928_v62 = vmul.f32 0.2, %v736_v5  ;;  %v3767_v18 = vsel %vm833_vm12, %v737_v55, %v929_v14  ;;  %v3777_v60 = vsel %vm1064_vm0, %v3761_v24, -inf  ;;  %v5339_v14 = vld [vmem:[#allocation71_spill] sm:$0xff] }
 0x171   :  { %v738_v9 = vadd.f32 %v3204_v44, %v636_v25  ;;  %v509_v11 = vpop.xlane.xlu1 %508  ;;  %5335 = vst [vmem:[#allocation116_spill] sm:$0xff] %v3767_v18  ;;  %5337 = vst [vmem:[#allocation118_spill] sm:$0xff] %v3777_v60  ;;  %v3795_v24 = vsel %vm1064_vm0, %v3767_v18, -inf  ;;  %v5350_v18 = vld [vmem:[#allocation13_spill] sm:$0xff] }
 0x172   :  { %v507_v50 = vpop.xlane.xlu0 %506  ;;  %v639_v35 = vadd.f32 %v509_v11, %v3165_v57  ;;  %v931_v25 = vmul.f32 0.2, %v739_v51  ;;  %vm835_vm14 = vcmp.ge.f32.partialorder %v739_v51, 0.0  ;;  %v3765_v57 = vsel %vm830_vm11, %v734_v10, %v926_v47  ;;  %5343 = vst [vmem:[#allocation121_spill] sm:$0xff] %v3795_v24  ;;  %v5345_v10 = vld [vmem:[#allocation75_spill] sm:$0xff] }
 0x173   :  { %v638_v1 = vadd.f32 %v507_v50, %v3167_v58  ;;  %v930_v27 = vmul.f32 0.2, %v738_v9  ;;  %5334 = vst [vmem:[#allocation115_spill] sm:$0xff] %v3765_v57  ;;  %vm834_vm15 = vcmp.ge.f32.partialorder %v738_v9, 0.0  ;;  %v3784_v55 = vsel %vm832_vm13, %v736_v5, %v928_v62  ;;  %v5363_v5 = vld [vmem:[#allocation15_spill] sm:$0xff] }
 0x174   :  { %v741_v3 = vadd.f32 %v3204_v44, %v639_v35  ;;  %5340 = vst [vmem:[#allocation71_spill] sm:$0xff] %v3784_v55  ;;  %v3791_v54 = vsel %vm1064_vm0, %v3765_v57, -inf  ;;  %v3807_v57 = vsel %vm1064_vm0, %v3784_v55, -inf  ;;  %v5354_v55 = vld [vmem:[#allocation41_spill] sm:$0xff] }
 0x175   :  { %v740_v11 = vadd.f32 %v3204_v44, %v638_v1  ;;  %v513_v50 = vpop.xlane.xlu1 %512  ;;  %v3787_v1 = vsel %vm835_vm14, %v739_v51, %v931_v25  ;;  %5342 = vst [vmem:[#allocation120_spill] sm:$0xff] %v3791_v54  ;;  %v3797_v39 = vsel %vm834_vm15, %v738_v9, %v930_v27  ;;  %5348 = vst [vmem:[#allocation123_spill] sm:$0xff] %v3807_v57  ;;  %v5359_v51 = vld [vmem:[#allocation14_spill] sm:$0xff] }
 0x176   :  { %v511_v58 = vpop.xlane.xlu0 %510  ;;  %v933_v13 = vmul.f32 0.2, %v741_v3  ;;  %vm837_vm1 = vcmp.ge.f32.partialorder %v741_v3, 0.0  ;;  %5341 = vst [vmem:[#allocation119_spill] sm:$0xff] %v3787_v1  ;;  %5344 = vst [vmem:[#allocation122_spill] sm:$0xff] %v3797_v39  ;;  %v3811_v9 = vsel %vm1064_vm0, %v3787_v1, -inf  ;;  %v641_v60 = vadd.f32 %v513_v50, %v5354_v55 }
 0x177   :  { %v932_v47 = vmul.f32 0.2, %v740_v11  ;;  %vm836_vm2 = vcmp.ge.f32.partialorder %v740_v11, 0.0  ;;  %5349 = vst [vmem:[#allocation124_spill] sm:$0xff] %v3811_v9  ;;  %v5360_v55 = vld [vmem:[#allocation12_spill] sm:$0xff] }
 0x178   :  { %v3803_v25 = vsel %vm837_vm1, %v741_v3, %v933_v13  ;;  %v3821_v13 = vsel %vm1064_vm0, %v3797_v39, -inf  ;;  %v5369_v39 = vmax.f32 %v3299_v19, %v3570_v32 }
 0x179   :  { %v517_v21 = vpop.xlane.xlu1 %516  ;;  %5347 = vst [vmem:[#allocation75_spill] sm:$0xff] %v3803_v25  ;;  %5353 = vst [vmem:[#allocation13_spill] sm:$0xff] %v3821_v13  ;;  %v3826_v1 = vsel %vm1064_vm0, %v3803_v25, -inf  ;;  %v3828_v62 = vsel %vm836_vm2, %v740_v11, %v932_v47  ;;  %v5361_v47 = vld [vmem:[#allocation42_spill] sm:$0xff] }
 0x17a   :  { %v515_v35 = vpop.xlane.xlu0 %514  ;;  %v643_v27 = vadd.f32 %v517_v21, %v3089_v31  ;;  %5355 = vst [vmem:[#allocation125_spill] sm:$0xff] %v3826_v1  ;;  %5356 = vst [vmem:[#allocation126_spill] sm:$0xff] %v3828_v62  ;;  %v3841_v25 = vadd.f32 %v511_v58, %v5361_v47  ;;  %v3847_v46 = vsel %vm1064_vm0, %v3828_v62, -inf }
 0x17b   :  { %v642_v22 = vadd.f32 %v515_v35, %v5350_v18 }
 0x17c   :  { %v745_v31 = vadd.f32 %v3204_v44, %v643_v27  ;;  %v5364_v27 = vld [vmem:[#allocation16_spill] sm:$0xff] }
 0x17d   :  { %v744_v18 = vadd.f32 %v3204_v44, %v642_v22  ;;  %v521_v21 = vpop.xlane.xlu1 %520 }
 0x17e   :  { %v519_v35 = vpop.xlane.xlu0 %518  ;;  %v645_v50 = vadd.f32 %v521_v21, %v5359_v51  ;;  %vm841_vm3 = vcmp.ge.f32.partialorder %v745_v31, 0.0  ;;  %v937_v22 = vmul.f32 0.2, %v745_v31  ;;  %v3850_v51 = vadd.f32 %v3204_v44, %v641_v60 }
 0x17f   :  { %v644_v54 = vadd.f32 %v519_v35, %v5360_v55  ;;  %vm840_vm4 = vcmp.ge.f32.partialorder %v744_v18, 0.0  ;;  %v936_v24 = vmul.f32 0.2, %v744_v18 }
 0x180   :  { %v1033_v55 = vsel %vm841_vm3, %v745_v31, %v937_v22  ;;  %v747_v21 = vadd.f32 %v3204_v44, %v645_v50  ;;  %v3864_v22 = vld [vmem:[#allocation2] ss:$0 sm:$0xff] }
 0x181   :  { %v746_v58 = vadd.f32 %v3204_v44, %v644_v54  ;;  %v525_v35 = vpop.xlane.xlu1 %524  ;;  %v1073_v47 = vsel %vm1064_vm0, %v1033_v55, -inf  ;;  %v1032_v13 = vsel %vm840_vm4, %v744_v18, %v936_v24  ;;  %v5366_v44 = vmax.f32 %v3275_v17, %v3565_v30 }
 0x182   :  { %v523_v11 = vpop.xlane.xlu0 %522  ;;  %v647_v1 = vadd.f32 %v525_v35, %v5363_v5  ;;  %v1074_v9 = vmax.f32 %v5365_v43, %v1073_v47  ;;  %v1068_v60 = vsel %vm1064_vm0, %v1032_v13, -inf  ;;  %vm843_vm5 = vcmp.ge.f32.partialorder %v747_v21, 0.0  ;;  %v5367_v5 = vld [vmem:[#allocation43_spill] sm:$0xff] }
 0x183   :  { %v646_v62 = vadd.f32 %v523_v11, %v5364_v27  ;;  %v939_v31 = vmul.f32 0.2, %v747_v21  ;;  %v1069_v54 = vmax.f32 %v5366_v44, %v1068_v60  ;;  %vm842_vm6 = vcmp.ge.f32.partialorder %v746_v58, 0.0 }
 0x184   :  { %v938_v50 = vmul.f32 0.2, %v746_v58  ;;  %v749_v24 = vadd.f32 %v3864_v22, %v647_v1  ;;  %v1226_v18 = vsub.f32 %v5367_v5, %v1074_v9  ;;  %v1258_v11 = vsub.f32 %v3538_v34, %v1074_v9 }
 0x185   :  { %v1290_v37 = vsub.f32 %v1033_v55, %v1074_v9  ;;  %v1035_v43 = vsel %vm843_vm5, %v747_v21, %v939_v31  ;;  %v1225_v47 = vsub.f32 %v5368_v4, %v1069_v54  ;;  %v1257_v27 = vsub.f32 %v3541_v42, %v1069_v54  ;;  %v5370_v9 = vld [vmem:[#allocation45_spill] sm:$0xff] }
 0x186   :  { %v1289_v35 = vsub.f32 %v1032_v13, %v1069_v54  ;;  %v1083_v17 = vsel %vm1064_vm0, %v1035_v43, -inf  ;;  %v1323_v30 = vmul.f32 1.442695, %v1226_v18  ;;  %v1387_v60 = vmul.f32 1.442695, %v1258_v11  ;;  %v529_v54 = vpop.xlane.xlu1 %528  ;;  %v527_v18 = vpop.xlane.xlu0 %526 }
 0x187   :  { %v1451_v44 = vmul.f32 1.442695, %v1290_v37  ;;  %v1084_v1 = vmax.f32 %v5369_v39, %v1083_v17  ;;  %v1321_v57 = vmul.f32 1.442695, %v1225_v47  ;;  %v1385_v5 = vmul.f32 1.442695, %v1257_v27 }
 0x188   :  { %v1449_v3 = vmul.f32 1.442695, %v1289_v35  ;;  %v1034_v34 = vsel %vm842_vm6, %v746_v58, %v938_v50  ;;  %2502 = vpow2.f32 %v1323_v30  ;;  %vm845_vm7 = vcmp.ge.f32.partialorder %v749_v24, 0.0  ;;  %v5373_v47 = vld [vmem:[#allocation18_spill] sm:$0xff] }
 0x189   :  { %v1228_v55 = vsub.f32 %v5370_v9, %v1084_v1  ;;  %v1260_v42 = vsub.f32 %v3544_v29, %v1084_v1  ;;  %v1292_v13 = vsub.f32 %v1035_v43, %v1084_v1  ;;  %2504 = vpow2.f32 %v1387_v60  ;;  %v5372_v43 = vld [vmem:[#allocation17_spill] sm:$0xff]  ;;  %v5374_v35 = vld [vmem:[#allocation46_spill] sm:$0xff]  ;;  %v5376_v1 = vld [vmem:[#allocation47_spill] sm:$0xff] }
 0x18a   :  { %v1078_v21 = vsel %vm1064_vm0, %v1034_v34, -inf  ;;  %v941_v31 = vmul.f32 0.2, %v749_v24  ;;  %2506 = vpow2.f32 %v1451_v44  ;;  %v5371_v58 = vmax.f32 %v3303_v33, %v3574_v56 }
 0x18b   :  { %v1327_v39 = vmul.f32 1.442695, %v1228_v55  ;;  %v1391_v19 = vmul.f32 1.442695, %v1260_v42  ;;  %v1455_v32 = vmul.f32 1.442695, %v1292_v13  ;;  %2508 = vpow2.f32 %v1321_v57 }
 0x18c   :  { %v1079_v50 = vmax.f32 %v5371_v58, %v1078_v21  ;;  %v1037_v11 = vsel %vm845_vm7, %v749_v24, %v941_v31  ;;  %v748_v29 = vadd.f32 %v3864_v22, %v646_v62  ;;  %2510 = vpow2.f32 %v1385_v5 }
 0x18d   :  { %v1093_v37 = vsel %vm1064_vm0, %v1037_v11, -inf  ;;  %v649_v4 = vadd.f32 %v529_v54, %v5372_v43  ;;  %v648_v27 = vadd.f32 %v527_v18, %v5373_v47  ;;  %2512 = vpow2.f32 %v1449_v3  ;;  %v5377_v3 = vld [vmem:[#allocation93_spill] sm:$0xff]  ;;  %v5382_v47 = vld [vmem:[#allocation48_spill] sm:$0xff] }
 0x18e   :  { %v1227_v17 = vsub.f32 %v5374_v35, %v1079_v50  ;;  %v1259_v30 = vsub.f32 %v3546_v63, %v1079_v50  ;;  %v1291_v57 = vsub.f32 %v1034_v34, %v1079_v50  ;;  %2514 = vpow2.f32 %v1327_v39 }
 0x18f   :  { %v5375_v33 = vmax.f32 %v3307_v20, %v3597_v7  ;;  %vm844_vm8 = vcmp.ge.f32.partialorder %v748_v29, 0.0  ;;  %v940_v62 = vmul.f32 0.2, %v748_v29  ;;  %2516 = vpow2.f32 %v1391_v19 }
 0x190   :  { %v1325_v24 = vmul.f32 1.442695, %v1227_v17  ;;  %v1389_v60 = vmul.f32 1.442695, %v1259_v30  ;;  %v1453_v44 = vmul.f32 1.442695, %v1291_v57  ;;  %2518 = vpow2.f32 %v1455_v32 }
 0x191   :  { %v1094_v56 = vmax.f32 %v5375_v33, %v1093_v37  ;;  %v1036_v63 = vsel %vm844_vm8, %v748_v29, %v940_v62  ;;  %v751_v34 = vadd.f32 %v3864_v22, %v649_v4  ;;  %v3895_v42 = vadd.f32 %v3864_v22, %v648_v27 }
 0x192   :  { %2520 = vpow2.f32 %v1325_v24  ;;  %v3897_v20 = vpop.eup %2502  ;;  %v1088_v18 = vsel %vm1064_vm0, %v1036_v63, -inf  ;;  %v5380_v32 = vmax.f32 %v3313_v28, %v3602_v48  ;;  %v5383_v28 = vld [vmem:[#allocation94_spill] sm:$0xff]  ;;  %vm839_vm4 = vcmp.ge.f32.partialorder %v3850_v51, 0.0 }
 0x193   :  { %v1230_v5 = vsub.f32 %v5376_v1, %v1094_v56  ;;  %v1262_v9 = vsub.f32 %v5377_v3, %v1094_v56  ;;  %v1294_v55 = vsub.f32 %v1037_v11, %v1094_v56  ;;  %2522 = vpow2.f32 %v1389_v60  ;;  %v3899_v31 = vpop.eup %2504 }
 0x194   :  { %5378 = vst [vmem:[#allocation14_spill] sm:$0xff] %v3899_v31  ;;  %v1518_v54 = vsel %vm1064_vm0, %v3897_v20, 0.0  ;;  %2524 = vpow2.f32 %v1453_v44  ;;  %vm847_vm9 = vcmp.ge.f32.partialorder %v751_v34, 0.0  ;;  %v3904_v39 = vpop.eup %2506  ;;  %v1519_v19 = vsel %vm1064_vm0, %v3899_v31, 0.0 }
 0x195   :  { %v1331_v7 = vmul.f32 1.442695, %v1230_v5  ;;  %v1395_v13 = vmul.f32 1.442695, %v1262_v9  ;;  %v1459_v21 = vmul.f32 1.442695, %v1294_v55  ;;  %v1089_v58 = vmax.f32 %v5380_v32, %v1088_v18  ;;  %v3911_v11 = vpop.eup %2508  ;;  %v533_v55 = vpop.xlane.xlu1 %532 }
 0x196   :  { %5379 = vst [vmem:[#allocation12_spill] sm:$0xff] %v3904_v39  ;;  %v943_v50 = vmul.f32 0.2, %v751_v34  ;;  %v1520_v29 = vadd.f32 %v1519_v19, %v1518_v54  ;;  %v1521_v37 = vsel %vm1064_vm0, %v3904_v39, 0.0  ;;  %vm846_vm10 = vcmp.ge.f32.partialorder %v3895_v42, 0.0  ;;  %v3916_v43 = vpop.eup %2510 }
 0x197   :  { %2526 = vpow2.f32 %v1331_v7  ;;  %5381 = vst [vmem:[#allocation15_spill] sm:$0xff] %v3916_v43  ;;  %v1513_v4 = vsel %vm1064_vm0, %v3911_v11, 0.0  ;;  %v1229_v27 = vsub.f32 %v5382_v47, %v1089_v58  ;;  %v1261_v48 = vsub.f32 %v5383_v28, %v1089_v58  ;;  %v3922_v35 = vpop.eup %2512 }
 0x198   :  { %2528 = vpow2.f32 %v1395_v13  ;;  %5384 = vst [vmem:[#allocation16_spill] sm:$0xff] %v3922_v35  ;;  %v1522_v17 = vadd.f32 %v1521_v37, %v1520_v29  ;;  %v1514_v30 = vsel %vm1064_vm0, %v3916_v43, 0.0  ;;  %v1293_v57 = vsub.f32 %v1036_v63, %v1089_v58  ;;  %v3927_v56 = vpop.eup %2514  ;;  %v5389_v29 = vld [vmem:[#allocation49_spill] sm:$0xff] }
 0x199   :  { %2530 = vpow2.f32 %v1459_v21  ;;  %v1039_v33 = vsel %vm847_vm9, %v751_v34, %v943_v50  ;;  %v1515_v62 = vadd.f32 %v1514_v30, %v1513_v4  ;;  %v1516_v24 = vsel %vm1064_vm0, %v3922_v35, 0.0  ;;  %v3931_v1 = vpop.eup %2516 }
 0x19a   :  { %v1329_v60 = vmul.f32 1.442695, %v1229_v27  ;;  %v1393_v44 = vmul.f32 1.442695, %v1261_v48  ;;  %5385 = vst [vmem:[#allocation43_spill] sm:$0xff] %v3931_v1  ;;  %2532 = vrcp.f32 %v1522_v17  ;;  %v1528_v5 = vsel %vm1064_vm0, %v3927_v56, 0.0  ;;  %v3936_v63 = vpop.eup %2518 }
 0x19b   :  { %v1457_v3 = vmul.f32 1.442695, %v1293_v57  ;;  %v1103_v9 = vsel %vm1064_vm0, %v1039_v33, -inf  ;;  %5386 = vst [vmem:[#allocation44_spill] sm:$0xff] %v3936_v63  ;;  %v1517_v34 = vadd.f32 %v1516_v24, %v1515_v62  ;;  %v1529_v7 = vsel %vm1064_vm0, %v3931_v1, 0.0  ;;  %v5473_v1 = vld [vmem:[#allocation30_spill] sm:$0xff] }
 0x19c   :  { %2534 = vpow2.f32 %v1329_v60  ;;  %v5387_v13 = vmax.f32 %v3317_v59, %v3619_v36  ;;  %v3943_v54 = vpop.eup %2520  ;;  %v1530_v18 = vadd.f32 %v1529_v7, %v1528_v5  ;;  %v1531_v19 = vsel %vm1064_vm0, %v3936_v63, 0.0 }
 0x19d   :  { %2536 = vpow2.f32 %v1393_v44  ;;  %v942_v32 = vmul.f32 0.2, %v3895_v42  ;;  %v3948_v58 = vpop.eup %2522  ;;  %v1523_v50 = vsel %vm1064_vm0, %v3943_v54, 0.0  ;;  %v537_v44 = vpop.xlane.xlu1 %536 }
 0x19e   :  { %v1104_v21 = vmax.f32 %v5387_v13, %v1103_v9  ;;  %5388 = vst [vmem:[#allocation45_spill] sm:$0xff] %v3948_v58  ;;  %2538 = vrcp.f32 %v1517_v34  ;;  %v3954_v36 = vpop.eup %2524  ;;  %v1532_v4 = vadd.f32 %v1531_v19, %v1530_v18  ;;  %v1524_v47 = vsel %vm1064_vm0, %v3948_v58, 0.0  ;;  %v5394_v18 = vld [vmem:[#allocation96_spill] sm:$0xff] }
 0x19f   :  { %5390 = vst [vmem:[#allocation17_spill] sm:$0xff] %v3954_v36  ;;  %2540 = vpow2.f32 %v1457_v3  ;;  %v1525_v48 = vadd.f32 %v1524_v47, %v1523_v50  ;;  %v1526_v17 = vsel %vm1064_vm0, %v3954_v36, 0.0  ;;  %v1038_v60 = vsel %vm846_vm10, %v3895_v42, %v942_v32  ;;  %v5396_v32 = vld [vmem:[#allocation19_spill] sm:$0xff]  ;;  %v5415_v36 = vld [vmem:[#allocation52_spill] sm:$0xff] }
 0x1a0   :  { %v1232_v37 = vsub.f32 %v5389_v29, %v1104_v21  ;;  %v1264_v59 = vsub.f32 %v3604_v6, %v1104_v21  ;;  %v1296_v27 = vsub.f32 %v1039_v33, %v1104_v21  ;;  %2542 = vrcp.f32 %v1532_v4  ;;  %v531_v33 = vpop.xlane.xlu0 %530  ;;  %v5393_v21 = vld [vmem:[#allocation53_spill] sm:$0xff]  ;;  %v5397_v29 = vld [vmem:[#allocation20_spill] sm:$0xff] }
 0x1a1   :  { %v3958_v28 = vpop.eup %2526  ;;  %v1527_v3 = vadd.f32 %v1526_v17, %v1525_v48  ;;  %v1098_v34 = vsel %vm1064_vm0, %v1038_v60, -inf  ;;  %v5395_v19 = vmax.f32 %v5393_v21, %v5394_v18  ;;  %v651_v50 = vadd.f32 %v533_v55, %v5396_v32  ;;  %v5400_v48 = vld [vmem:[#allocation50_spill] sm:$0xff] }
 0x1a2   :  { %v1335_v30 = vmul.f32 1.442695, %v1232_v37  ;;  %v1399_v57 = vmul.f32 1.442695, %v1264_v59  ;;  %v3962_v62 = vpop.eup %2528  ;;  %v1538_v6 = vsel %vm1064_vm0, %v3958_v28, 0.0  ;;  %v650_v37 = vadd.f32 %v531_v33, %v5397_v29  ;;  %v5398_v59 = vld [vmem:[#allocation21_spill] sm:$0xff] }
 0x1a3   :  { %5391 = vst [vmem:[#allocation18_spill] sm:$0xff] %v3962_v62  ;;  %v1463_v24 = vmul.f32 1.442695, %v1296_v27  ;;  %v3969_v5 = vpop.eup %2530  ;;  %v1539_v9 = vsel %vm1064_vm0, %v3962_v62, 0.0  ;;  %v1099_v42 = vmax.f32 %v5395_v19, %v1098_v34  ;;  %v653_v4 = vadd.f32 %v537_v44, %v5398_v59  ;;  %v541_v59 = vpop.xlane.xlu1 %540 }
 0x1a4   :  { %5392 = vst [vmem:[#allocation46_spill] sm:$0xff] %v3969_v5  ;;  %2544 = vpow2.f32 %v1335_v30  ;;  %v1540_v7 = vadd.f32 %v1539_v9, %v1538_v6  ;;  %v1541_v13 = vsel %vm1064_vm0, %v3969_v5, 0.0  ;;  %v3982_v47 = vpop.eup %2532  ;;  %v5401_v30 = vld [vmem:[#allocation95_spill] sm:$0xff]  ;;  %v753_v34 = vadd.f32 %v3864_v22, %v651_v50  ;;  %v535_v50 = vpop.xlane.xlu0 %534  ;;  %v5416_v5 = vld [vmem:[#allocation98_spill] sm:$0xff] }
 0x1a5   :  { %2546 = vpow2.f32 %v1399_v57  ;;  %5399 = vst [vmem:[#allocation47_spill] sm:$0xff] %v3982_v47  ;;  %v1231_v17 = vsub.f32 %v5400_v48, %v1099_v42  ;;  %v1263_v6 = vsub.f32 %v5401_v30, %v1099_v42  ;;  %v1295_v9 = vsub.f32 %v1038_v60, %v1099_v42 }
 0x1a6   :  { %2548 = vrcp.f32 %v1527_v3  ;;  %v1542_v27 = vadd.f32 %v1541_v13, %v1540_v7  ;;  %v3986_v57 = vpop.eup %2534  ;;  %v752_v3 = vadd.f32 %v3864_v22, %v650_v37  ;;  %v755_v55 = vadd.f32 %v3864_v22, %v653_v4 }
 0x1a7   :  { %2550 = vpow2.f32 %v1463_v24  ;;  %v3991_v33 = vpop.eup %2536  ;;  %v1533_v44 = vsel %vm1064_vm0, %v3986_v57, 0.0  ;;  %v1333_v24 = vmul.f32 1.442695, %v1231_v17  ;;  %v1397_v7 = vmul.f32 1.442695, %v1263_v6 }
 0x1a8   :  { %5402 = vst [vmem:[#allocation93_spill] sm:$0xff] %v3991_v33  ;;  %2552 = vrcp.f32 %v1542_v27  ;;  %v3995_v13 = vpop.eup %2538  ;;  %v1534_v21 = vsel %vm1064_vm0, %v3991_v33, 0.0  ;;  %v1461_v60 = vmul.f32 1.442695, %v1295_v9  ;;  %vm849_vm11 = vcmp.ge.f32.partialorder %v753_v34, 0.0  ;;  %v539_v63 = vpop.xlane.xlu0 %538 }
 0x1a9   :  { %5403 = vst [vmem:[#allocation48_spill] sm:$0xff] %v3995_v13  ;;  %v945_v18 = vmul.f32 0.2, %v753_v34  ;;  %v3999_v19 = vpop.eup %2540  ;;  %v1535_v42 = vadd.f32 %v1534_v21, %v1533_v44  ;;  %2554 = vpow2.f32 %v1333_v24  ;;  %vm848_vm12 = vcmp.ge.f32.partialorder %v752_v3, 0.0 }
 0x1aa   :  { %5404 = vst [vmem:[#allocation94_spill] sm:$0xff] %v3999_v19  ;;  %v944_v32 = vmul.f32 0.2, %v752_v3  ;;  %v1536_v29 = vsel %vm1064_vm0, %v3999_v19, 0.0  ;;  %2556 = vpow2.f32 %v1397_v7  ;;  %vm851_vm13 = vcmp.ge.f32.partialorder %v755_v55, 0.0  ;;  %v4003_v4 = vpop.eup %2542  ;;  %v5407_v7 = vld [vmem:[#allocation22_spill] sm:$0xff] }
 0x1ab   :  { %v1041_v37 = vsel %vm849_vm11, %v753_v34, %v945_v18  ;;  %5405 = vst [vmem:[#allocation49_spill] sm:$0xff] %v4003_v4  ;;  %v1537_v27 = vadd.f32 %v1536_v29, %v1535_v42  ;;  %2558 = vpow2.f32 %v1461_v60  ;;  %v5406_v6 = vmax.f32 %v5313_v61, %v3649_v8  ;;  %v5410_v42 = vld [vmem:[#allocation23_spill] sm:$0xff] }
 0x1ac   :  { %v1113_v48 = vsel %vm1064_vm0, %v1041_v37, -inf  ;;  %v1040_v17 = vsel %vm848_vm12, %v752_v3, %v944_v32  ;;  %v947_v24 = vmul.f32 0.2, %v755_v55  ;;  %v652_v34 = vadd.f32 %v535_v50, %v5407_v7  ;;  %v5412_v8 = vld [vmem:[#allocation51_spill] sm:$0xff]  ;;  %v5413_v50 = vld [vmem:[#allocation97_spill] sm:$0xff] }
 0x1ad   :  { %v1114_v9 = vmax.f32 %v5406_v6, %v1113_v48  ;;  %v1108_v44 = vsel %vm1064_vm0, %v1040_v17, -inf  ;;  %2560 = vrcp.f32 %v1537_v27  ;;  %v5409_v3 = vmax.f32 %v3351_v41, %v3653_v49 }
 0x1ae   :  { %v4006_v30 = vpop.eup %2544  ;;  %v655_v32 = vadd.f32 %v541_v59, %v5410_v42  ;;  %v1043_v42 = vsel %vm851_vm13, %v755_v55, %v947_v24 }
 0x1af   :  { %v4013_v21 = vpop.eup %2546  ;;  %v1548_v60 = vsel %vm1064_vm0, %v4006_v30, 0.0  ;;  %v1109_v18 = vmax.f32 %v5409_v3, %v1108_v44  ;;  %v1234_v48 = vsub.f32 %v5412_v8, %v1114_v9  ;;  %v1266_v6 = vsub.f32 %v5413_v50, %v1114_v9 }
 0x1b0   :  { %5408 = vst [vmem:[#allocation53_spill] sm:$0xff] %v4013_v21  ;;  %v4021_v29 = vpop.eup %2548  ;;  %v1549_v61 = vsel %vm1064_vm0, %v4013_v21, 0.0  ;;  %v1298_v7 = vsub.f32 %v1041_v37, %v1114_v9  ;;  %v757_v24 = vadd.f32 %v3864_v22, %v655_v32 }
 0x1b1   :  { %5411 = vst [vmem:[#allocation96_spill] sm:$0xff] %v4021_v29  ;;  %v4027_v27 = vpop.eup %2550  ;;  %v1550_v19 = vadd.f32 %v1549_v61, %v1548_v60  ;;  %v1233_v35 = vsub.f32 %v5415_v36, %v1109_v18  ;;  %v1265_v41 = vsub.f32 %v5416_v5, %v1109_v18  ;;  %v1297_v49 = vsub.f32 %v1040_v17, %v1109_v18  ;;  %v5418_v18 = vld [vmem:[#allocation102_spill] sm:$0xff] }
 0x1b2   :  { %5414 = vst [vmem:[#allocation19_spill] sm:$0xff] %v4027_v27  ;;  %v1551_v59 = vsel %vm1064_vm0, %v4027_v27, 0.0  ;;  %v1339_v44 = vmul.f32 1.442695, %v1234_v48  ;;  %v1403_v3 = vmul.f32 1.442695, %v1266_v6  ;;  %v4034_v8 = vpop.eup %2552  ;;  %v754_v5 = vadd.f32 %v3864_v22, %v652_v34 }
 0x1b3   :  { %5417 = vst [vmem:[#allocation20_spill] sm:$0xff] %v4034_v8  ;;  %v1552_v50 = vadd.f32 %v1551_v59, %v1550_v19  ;;  %v1467_v37 = vmul.f32 1.442695, %v1298_v7  ;;  %v1337_v9 = vmul.f32 1.442695, %v1233_v35  ;;  %v1123_v36 = vsel %vm1064_vm0, %v1043_v42, -inf  ;;  %v4038_v17 = vpop.eup %2554 }
 0x1b4   :  { %v1401_v39 = vmul.f32 1.442695, %v1265_v41  ;;  %2562 = vpow2.f32 %v1339_v44  ;;  %v1465_v60 = vmul.f32 1.442695, %v1297_v49  ;;  %v5419_v61 = vmax.f32 %v3367_v52, %v5418_v18  ;;  %v5420_v48 = vld [vmem:[#allocation24_spill] sm:$0xff]  ;;  %v4045_v6 = vpop.eup %2556  ;;  %v5423_v52 = vld [vmem:[#allocation55_spill] sm:$0xff] }
 0x1b5   :  { %2564 = vrcp.f32 %v1552_v50  ;;  %v654_v19 = vadd.f32 %v539_v63, %v5420_v48  ;;  %5421 = vst [vmem:[#allocation21_spill] sm:$0xff] %v4045_v6  ;;  %v1543_v35 = vsel %vm1064_vm0, %v4038_v17, 0.0  ;;  %vm850_vm14 = vcmp.ge.f32.partialorder %v754_v5, 0.0  ;;  %v4049_v34 = vpop.eup %2558  ;;  %v5424_v59 = vld [vmem:[#allocation99_spill] sm:$0xff]  ;;  %v545_v48 = vpop.xlane.xlu1 %544 }
 0x1b6   :  { %v1124_v55 = vmax.f32 %v5419_v61, %v1123_v36  ;;  %2566 = vpow2.f32 %v1403_v3  ;;  %v946_v7 = vmul.f32 0.2, %v754_v5  ;;  %5422 = vst [vmem:[#allocation50_spill] sm:$0xff] %v4049_v34  ;;  %v1544_v41 = vsel %vm1064_vm0, %v4045_v6, 0.0 }
 0x1b7   :  { %2568 = vpow2.f32 %v1467_v37  ;;  %v1545_v44 = vadd.f32 %v1544_v41, %v1543_v35  ;;  %v1546_v63 = vsel %vm1064_vm0, %v4049_v34, 0.0  ;;  %v4057_v36 = vpop.eup %2560  ;;  %v5427_v35 = vld [vmem:[#allocation103_spill] sm:$0xff]  ;;  %vm853_vm15 = vcmp.ge.f32.partialorder %v757_v24, 0.0 }
 0x1b8   :  { %v1236_v49 = vsub.f32 %v5423_v52, %v1124_v55  ;;  %v1268_v32 = vsub.f32 %v5424_v59, %v1124_v55  ;;  %2570 = vpow2.f32 %v1337_v9  ;;  %v1300_v50 = vsub.f32 %v1043_v42, %v1124_v55  ;;  %5425 = vst [vmem:[#allocation95_spill] sm:$0xff] %v4057_v36  ;;  %v5426_v59 = vld [vmem:[#allocation58_spill] sm:$0xff] }
 0x1b9   :  { %2572 = vpow2.f32 %v1401_v39  ;;  %v1042_v61 = vsel %vm850_vm14, %v754_v5, %v946_v7  ;;  %v1547_v27 = vadd.f32 %v1546_v63, %v1545_v44  ;;  %v5428_v41 = vmax.f32 %v5426_v59, %v5427_v35  ;;  %v5429_v5 = vld [vmem:[#allocation25_spill] sm:$0xff]  ;;  %v543_v63 = vpop.xlane.xlu0 %542 }
 0x1ba   :  { %v1343_v3 = vmul.f32 1.442695, %v1236_v49  ;;  %v1407_v18 = vmul.f32 1.442695, %v1268_v32  ;;  %2574 = vpow2.f32 %v1465_v60  ;;  %v1471_v37 = vmul.f32 1.442695, %v1300_v50 }
 0x1bb   :  { %v1118_v52 = vsel %vm1064_vm0, %v1042_v61, -inf  ;;  %v949_v9 = vmul.f32 0.2, %v757_v24  ;;  %v4065_v42 = vadd.f32 %v3864_v22, %v3841_v25  ;;  %v756_v39 = vadd.f32 %v3864_v22, %v654_v19  ;;  %v5430_v60 = vld [vmem:[#allocation56_spill] sm:$0xff] }
 0x1bc   :  { %2576 = vpow2.f32 %v1343_v3  ;;  %v1119_v6 = vmax.f32 %v5428_v41, %v1118_v52  ;;  %v657_v55 = vadd.f32 %v545_v48, %v5429_v5  ;;  %v5431_v49 = vld [vmem:[#allocation100_spill] sm:$0xff] }
 0x1bd   :  { %2578 = vrcp.f32 %v1547_v27  ;;  %v1045_v3 = vsel %vm853_vm15, %v757_v24, %v949_v9  ;;  %vm852_vm1 = vcmp.ge.f32.partialorder %v756_v39, 0.0  ;;  %v948_v52 = vmul.f32 0.2, %v756_v39  ;;  %v5434_v24 = vld [vmem:[#allocation26_spill] sm:$0xff] }
 0x1be   :  { %2580 = vpow2.f32 %v1407_v18  ;;  %v1235_v7 = vsub.f32 %v5430_v60, %v1119_v6  ;;  %v1267_v32 = vsub.f32 %v5431_v49, %v1119_v6  ;;  %v1299_v44 = vsub.f32 %v1042_v61, %v1119_v6  ;;  %v4071_v50 = vpop.eup %2562 }
 0x1bf   :  { %2582 = vpow2.f32 %v1471_v37  ;;  %v4073_v25 = vpop.eup %2564  ;;  %v1558_v27 = vsel %vm1064_vm0, %v4071_v50, 0.0  ;;  %v1133_v18 = vsel %vm1064_vm0, %v1045_v3, -inf  ;;  %v5433_v6 = vmax.f32 %v3381_v45, %v3666_v23  ;;  %v5436_v23 = vld [vmem:[#allocation57_spill] sm:$0xff] }
 0x1c0   :  { %v1341_v19 = vmul.f32 1.442695, %v1235_v7  ;;  %v1405_v48 = vmul.f32 1.442695, %v1267_v32  ;;  %v4078_v59 = vpop.eup %2566  ;;  %v1469_v35 = vmul.f32 1.442695, %v1299_v44  ;;  %v1044_v37 = vsel %vm852_vm1, %v756_v39, %v948_v52 }
 0x1c1   :  { %5432 = vst [vmem:[#allocation22_spill] sm:$0xff] %v4078_v59  ;;  %v1134_v61 = vmax.f32 %v5433_v6, %v1133_v18  ;;  %v656_v41 = vadd.f32 %v543_v63, %v5434_v24  ;;  %v4084_v9 = vpop.eup %2568  ;;  %v1559_v5 = vsel %vm1064_vm0, %v4078_v59, 0.0  ;;  %v1128_v60 = vsel %vm1064_vm0, %v1044_v37, -inf  ;;  %v5438_v52 = vld [vmem:[#allocation101_spill] sm:$0xff] }
 0x1c2   :  { %5435 = vst [vmem:[#allocation23_spill] sm:$0xff] %v4084_v9  ;;  %2584 = vpow2.f32 %v1341_v19  ;;  %v759_v7 = vadd.f32 %v3864_v22, %v657_v55  ;;  %v4090_v49 = vpop.eup %2570  ;;  %v1560_v32 = vadd.f32 %v1559_v5, %v1558_v27  ;;  %v1561_v45 = vsel %vm1064_vm0, %v4084_v9, 0.0  ;;  %v5440_v5 = vld [vmem:[#allocation62_spill] sm:$0xff] }
 0x1c3   :  { %2586 = vpow2.f32 %v1405_v48  ;;  %v1238_v39 = vsub.f32 %v5436_v23, %v1134_v61  ;;  %v4095_v44 = vpop.eup %2572  ;;  %v1553_v63 = vsel %vm1064_vm0, %v4090_v49, 0.0  ;;  %v1270_v19 = vsub.f32 %v5438_v52, %v1134_v61  ;;  %v5441_v48 = vld [vmem:[#allocation54_spill] sm:$0xff] }
 0x1c4   :  { %5437 = vst [vmem:[#allocation51_spill] sm:$0xff] %v4095_v44  ;;  %2588 = vpow2.f32 %v1469_v35  ;;  %v1302_v18 = vsub.f32 %v1045_v3, %v1134_v61  ;;  %v4100_v6 = vpop.eup %2574  ;;  %v1562_v55 = vadd.f32 %v1561_v45, %v1560_v32  ;;  %v1554_v27 = vsel %vm1064_vm0, %v4095_v44, 0.0  ;;  %v5443_v61 = vld [vmem:[#allocation59_spill] sm:$0xff]  ;;  %v5444_v45 = vld [vmem:[#allocation104_spill] sm:$0xff] }
 0x1c5   :  { %5439 = vst [vmem:[#allocation97_spill] sm:$0xff] %v4100_v6  ;;  %v1347_v24 = vmul.f32 1.442695, %v1238_v39  ;;  %v5442_v34 = vmax.f32 %v5440_v5, %v5441_v48  ;;  %v1555_v33 = vadd.f32 %v1554_v27, %v1553_v63  ;;  %v1411_v58 = vmul.f32 1.442695, %v1270_v19  ;;  %v549_v5 = vpop.xlane.xlu1 %548 }
 0x1c6   :  { %v4107_v9 = vpop.eup %2576  ;;  %v1475_v59 = vmul.f32 1.442695, %v1302_v18  ;;  %v758_v35 = vadd.f32 %v3864_v22, %v656_v41  ;;  %2590 = vrcp.f32 %v1562_v55  ;;  %v1556_v63 = vsel %vm1064_vm0, %v4100_v6, 0.0 }
 0x1c7   :  { %v1129_v23 = vmax.f32 %v5442_v34, %v1128_v60  ;;  %v4110_v52 = vpop.eup %2578  ;;  %v1568_v3 = vsel %vm1064_vm0, %v4107_v9, 0.0  ;;  %v5446_v34 = vld [vmem:[#allocation89_spill] sm:$0xff]  ;;  %2592 = vpow2.f32 %v1347_v24  ;;  %v1557_v18 = vadd.f32 %v1556_v63, %v1555_v33  ;;  %v547_v60 = vpop.xlane.xlu0 %546 }
 0x1c8   :  { %v4116_v44 = vpop.eup %2580  ;;  %2594 = vpow2.f32 %v1411_v58  ;;  %vm855_vm2 = vcmp.ge.f32.partialorder %v759_v7, 0.0  ;;  %v951_v6 = vmul.f32 0.2, %v759_v7  ;;  %vm854_vm3 = vcmp.ge.f32.partialorder %v758_v35, 0.0 }
 0x1c9   :  { %v1237_v32 = vsub.f32 %v5443_v61, %v1129_v23  ;;  %v1269_v39 = vsub.f32 %v5444_v45, %v1129_v23  ;;  %5445 = vst [vmem:[#allocation52_spill] sm:$0xff] %v4116_v44  ;;  %v1301_v41 = vsub.f32 %v1044_v37, %v1129_v23  ;;  %v4122_v19 = vpop.eup %2582  ;;  %v1569_v55 = vsel %vm1064_vm0, %v4116_v44, 0.0  ;;  %v5449_v23 = vld [vmem:[#allocation27_spill] sm:$0xff] }
 0x1ca   :  { %5447 = vst [vmem:[#allocation98_spill] sm:$0xff] %v4122_v19  ;;  %v1570_v48 = vadd.f32 %v1569_v55, %v1568_v3  ;;  %v1571_v61 = vsel %vm1064_vm0, %v4122_v19, 0.0  ;;  %2596 = vpow2.f32 %v1475_v59  ;;  %v950_v37 = vmul.f32 0.2, %v758_v35  ;;  %v5451_v59 = vld [vmem:[#allocation28_spill] sm:$0xff] }
 0x1cb   :  { %v1345_v27 = vmul.f32 1.442695, %v1237_v32  ;;  %v1409_v45 = vmul.f32 1.442695, %v1269_v39  ;;  %v1473_v58 = vmul.f32 1.442695, %v1301_v41  ;;  %v659_v32 = vadd.f32 %v549_v5, %v5449_v23 }
 0x1cc   :  { %v4128_v24 = vpop.eup %2584  ;;  %v1572_v33 = vadd.f32 %v1571_v61, %v1570_v48  ;;  %v1047_v63 = vsel %vm855_vm2, %v759_v7, %v951_v6  ;;  %v1046_v55 = vsel %vm854_vm3, %v758_v35, %v950_v37  ;;  %v658_v19 = vadd.f32 %v547_v60, %v5451_v59  ;;  %v553_v35 = vpop.xlane.xlu1 %552  ;;  %v5456_v59 = vld [vmem:[#allocation60_spill] sm:$0xff] }
 0x1cd   :  { %5448 = vst [vmem:[#allocation102_spill] sm:$0xff] %v4128_v24  ;;  %2598 = vpow2.f32 %v1345_v27  ;;  %v4132_v3 = vpop.eup %2586  ;;  %v1563_v39 = vsel %vm1064_vm0, %v4128_v24, 0.0  ;;  %v1143_v27 = vsel %vm1064_vm0, %v1047_v63, -inf  ;;  %v1138_v41 = vsel %vm1064_vm0, %v1046_v55, -inf }
 0x1ce   :  { %5450 = vst [vmem:[#allocation24_spill] sm:$0xff] %v4132_v3  ;;  %v4137_v44 = vpop.eup %2588  ;;  %v1564_v43 = vsel %vm1064_vm0, %v4132_v3, 0.0  ;;  %2600 = vpow2.f32 %v1409_v45  ;;  %v935_v5 = vmul.f32 0.2, %v3850_v51  ;;  %v5453_v7 = vmax.f32 %v5326_v26, %v3705_v40 }
 0x1cf   :  { %5452 = vst [vmem:[#allocation55_spill] sm:$0xff] %v4137_v44  ;;  %2602 = vrcp.f32 %v1557_v18  ;;  %v1565_v48 = vadd.f32 %v1564_v43, %v1563_v39  ;;  %v1566_v60 = vsel %vm1064_vm0, %v4137_v44, 0.0  ;;  %v5454_v61 = vmax.f32 %v5327_v0, %v3709_v15  ;;  %v5457_v43 = vld [vmem:[#allocation105_spill] sm:$0xff] }
 0x1d0   :  { %v1144_v6 = vmax.f32 %v5453_v7, %v1143_v27  ;;  %2604 = vrcp.f32 %v1572_v33  ;;  %v761_v37 = vadd.f32 %v3864_v22, %v659_v32  ;;  %v4153_v23 = vpop.eup %2590  ;;  %v760_v40 = vadd.f32 %v3864_v22, %v658_v19  ;;  %v5458_v33 = vld [vmem:[#allocation61_spill] sm:$0xff]  ;;  %v5459_v7 = vld [vmem:[#allocation106_spill] sm:$0xff] }
 0x1d1   :  { %v1139_v45 = vmax.f32 %v5454_v61, %v1138_v41  ;;  %5455 = vst [vmem:[#allocation99_spill] sm:$0xff] %v4153_v23  ;;  %v4158_v26 = vpop.eup %2592  ;;  %2606 = vpow2.f32 %v1473_v58  ;;  %v5460_v0 = vld [vmem:[#allocation29_spill] sm:$0xff]  ;;  %v1567_v32 = vadd.f32 %v1566_v60, %v1565_v48  ;;  %vm838_vm8 = vcmp.ge.f32.partialorder %v4065_v42, 0.0 }
 0x1d2   :  { %v1240_v18 = vsub.f32 %v5456_v59, %v1144_v6  ;;  %v1272_v39 = vsub.f32 %v5457_v43, %v1144_v6  ;;  %v1304_v3 = vsub.f32 %v1047_v63, %v1144_v6  ;;  %v661_v15 = vadd.f32 %v553_v35, %v5460_v0  ;;  %v4163_v41 = vpop.eup %2594 }
 0x1d3   :  { %v1239_v27 = vsub.f32 %v5458_v33, %v1139_v45  ;;  %v1271_v44 = vsub.f32 %v5459_v7, %v1139_v45  ;;  %5461 = vst [vmem:[#allocation58_spill] sm:$0xff] %v4163_v41  ;;  %v1578_v61 = vsel %vm1064_vm0, %v4158_v26, 0.0  ;;  %v1579_v19 = vsel %vm1064_vm0, %v4163_v41, 0.0 }
 0x1d4   :  { %v1351_v59 = vmul.f32 1.442695, %v1240_v18  ;;  %v1415_v43 = vmul.f32 1.442695, %v1272_v39  ;;  %v1303_v63 = vsub.f32 %v1046_v55, %v1139_v45  ;;  %vm857_vm5 = vcmp.ge.f32.partialorder %v761_v37, 0.0  ;;  %v4169_v58 = vpop.eup %2596 }
 0x1d5   :  { %v1349_v6 = vmul.f32 1.442695, %v1239_v27  ;;  %5462 = vst [vmem:[#allocation103_spill] sm:$0xff] %v4169_v58  ;;  %v1580_v33 = vadd.f32 %v1579_v19, %v1578_v61  ;;  %v1479_v7 = vmul.f32 1.442695, %v1304_v3  ;;  %vm856_vm6 = vcmp.ge.f32.partialorder %v760_v40, 0.0 }
 0x1d6   :  { %2608 = vpow2.f32 %v1351_v59  ;;  %v1413_v48 = vmul.f32 1.442695, %v1271_v44  ;;  %v953_v60 = vmul.f32 0.2, %v761_v37  ;;  %v952_v0 = vmul.f32 0.2, %v760_v40 }
 0x1d7   :  { %v4171_v35 = vpop.eup %2598  ;;  %2610 = vpow2.f32 %v1415_v43  ;;  %v4176_v18 = vsel %vm839_vm4, %v3850_v51, %v935_v5  ;;  %v4179_v55 = vmul.f32 0.2, %v4065_v42  ;;  %v763_v45 = vadd.f32 %v3864_v22, %v661_v15 }
 0x1d8   :  { %5463 = vst [vmem:[#allocation25_spill] sm:$0xff] %v4171_v35  ;;  %2612 = vrcp.f32 %v1567_v32  ;;  %v4182_v39 = vpop.eup %2600  ;;  %v1477_v3 = vmul.f32 1.442695, %v1303_v63  ;;  %v1049_v27 = vsel %vm857_vm5, %v761_v37, %v953_v60  ;;  %v1048_v44 = vsel %vm856_vm6, %v760_v40, %v952_v0  ;;  %v5466_v37 = vld [vmem:[#allocation109_spill] sm:$0xff]  ;;  %v551_v0 = vpop.xlane.xlu0 %550 }
 0x1d9   :  { %5464 = vst [vmem:[#allocation56_spill] sm:$0xff] %v4182_v39  ;;  %2614 = vpow2.f32 %v1349_v6  ;;  %v4185_v61 = vpop.eup %2602  ;;  %v1581_v59 = vsel %vm1064_vm0, %v4169_v58, 0.0  ;;  %v1153_v51 = vsel %vm1064_vm0, %v1049_v27, -inf  ;;  %v1148_v5 = vsel %vm1064_vm0, %v1048_v44, -inf }
 0x1da   :  { %2616 = vpow2.f32 %v1479_v7  ;;  %v4191_v32 = vpop.eup %2604  ;;  %v1582_v15 = vadd.f32 %v1581_v59, %v1580_v33  ;;  %v5465_v43 = vmax.f32 %v3434_v53, %v3713_v16  ;;  %v5467_v40 = vmax.f32 %v3438_v38, %v5466_v37  ;;  %v5469_v33 = vld [vmem:[#allocation65_spill] sm:$0xff]  ;;  %v5470_v59 = vld [vmem:[#allocation107_spill] sm:$0xff]  ;;  %v557_v38 = vpop.xlane.xlu1 %556 }
 0x1db   :  { %2618 = vpow2.f32 %v1413_v48  ;;  %v1573_v6 = vsel %vm1064_vm0, %v4171_v35, 0.0  ;;  %v1574_v7 = vsel %vm1064_vm0, %v4182_v39, 0.0  ;;  %vm859_vm7 = vcmp.ge.f32.partialorder %v763_v45, 0.0  ;;  %v4203_v58 = vpop.eup %2606 }
 0x1dc   :  { %v1154_v19 = vmax.f32 %v5465_v43, %v1153_v51  ;;  %v1149_v63 = vmax.f32 %v5467_v40, %v1148_v5  ;;  %v955_v60 = vmul.f32 0.2, %v763_v45  ;;  %5468 = vst [vmem:[#allocation100_spill] sm:$0xff] %v4203_v58  ;;  %v5471_v51 = vld [vmem:[#allocation66_spill] sm:$0xff]  ;;  %2620 = vpow2.f32 %v1477_v3  ;;  %v5472_v5 = vld [vmem:[#allocation108_spill] sm:$0xff] }
 0x1dd   :  { %v660_v31 = vadd.f32 %v551_v0, %v5473_v1  ;;  %2622 = vrcp.f32 %v1582_v15 }
 0x1de   :  { %v1242_v48 = vsub.f32 %v5469_v33, %v1154_v19  ;;  %v1274_v53 = vsub.f32 %v5470_v59, %v1154_v19  ;;  %v1306_v16 = vsub.f32 %v1049_v27, %v1154_v19  ;;  %v1241_v43 = vsub.f32 %v5471_v51, %v1149_v63  ;;  %v5474_v59 = vld [vmem:[#allocation31_spill] sm:$0xff] }
 0x1df   :  { %v1273_v37 = vsub.f32 %v5472_v5, %v1149_v63  ;;  %v1305_v40 = vsub.f32 %v1048_v44, %v1149_v63  ;;  %v1051_v41 = vsel %vm859_vm7, %v763_v45, %v955_v60  ;;  %v1575_v33 = vadd.f32 %v1574_v7, %v1573_v6 }
 0x1e0   :  { %v1355_v21 = vmul.f32 1.442695, %v1242_v48  ;;  %v1419_v39 = vmul.f32 1.442695, %v1274_v53  ;;  %v1483_v62 = vmul.f32 1.442695, %v1306_v16  ;;  %v4210_v35 = vpop.eup %2608  ;;  %v663_v27 = vadd.f32 %v557_v38, %v5474_v59  ;;  %v555_v59 = vpop.xlane.xlu0 %554 }
 0x1e1   :  { %v1353_v24 = vmul.f32 1.442695, %v1241_v43  ;;  %v4213_v19 = vpop.eup %2610  ;;  %v1417_v3 = vmul.f32 1.442695, %v1273_v37  ;;  %v1163_v51 = vsel %vm1064_vm0, %v1051_v41, -inf  ;;  %v762_v45 = vadd.f32 %v3864_v22, %v660_v31  ;;  %v5479_v48 = vld [vmem:[#allocation67_spill] sm:$0xff] }
 0x1e2   :  { %5475 = vst [vmem:[#allocation26_spill] sm:$0xff] %v4213_v19  ;;  %2624 = vpow2.f32 %v1355_v21  ;;  %v4217_v44 = vpop.eup %2612  ;;  %v1588_v1 = vsel %vm1064_vm0, %v4210_v35, 0.0  ;;  %v1589_v15 = vsel %vm1064_vm0, %v4213_v19, 0.0  ;;  %v5476_v63 = vmax.f32 %v3442_v12, %v3742_v2  ;;  %v5480_v2 = vld [vmem:[#allocation110_spill] sm:$0xff] }
 0x1e3   :  { %2626 = vpow2.f32 %v1419_v39  ;;  %v4226_v7 = vpop.eup %2614  ;;  %v1576_v31 = vsel %vm1064_vm0, %v4203_v58, 0.0  ;;  %v1481_v21 = vmul.f32 1.442695, %v1305_v40  ;;  %v765_v60 = vadd.f32 %v3864_v22, %v663_v27  ;;  %v5521_v19 = vld [vmem:[#allocation74_spill] sm:$0xff] }
 0x1e4   :  { %v1164_v6 = vmax.f32 %v5476_v63, %v1163_v51  ;;  %5477 = vst [vmem:[#allocation57_spill] sm:$0xff] %v4226_v7  ;;  %2628 = vpow2.f32 %v1483_v62  ;;  %v4232_v0 = vpop.eup %2616  ;;  %v1583_v39 = vsel %vm1064_vm0, %v4226_v7, 0.0  ;;  %v1590_v43 = vadd.f32 %v1589_v15, %v1588_v1 }
 0x1e5   :  { %5478 = vst [vmem:[#allocation101_spill] sm:$0xff] %v4232_v0  ;;  %2630 = vpow2.f32 %v1353_v24  ;;  %v4238_v16 = vpop.eup %2618  ;;  %vm858_vm9 = vcmp.ge.f32.partialorder %v762_v45, 0.0  ;;  %v954_v38 = vmul.f32 0.2, %v762_v45  ;;  %v1577_v27 = vadd.f32 %v1576_v31, %v1575_v33  ;;  %v5484_v31 = vld [vmem:[#allocation70_spill] sm:$0xff] }
 0x1e6   :  { %v1244_v12 = vsub.f32 %v5479_v48, %v1164_v6  ;;  %v1276_v53 = vsub.f32 %v5480_v2, %v1164_v6  ;;  %5481 = vst [vmem:[#allocation62_spill] sm:$0xff] %v4238_v16  ;;  %2632 = vpow2.f32 %v1417_v3  ;;  %v1584_v62 = vsel %vm1064_vm0, %v4238_v16, 0.0  ;;  %v4244_v63 = vpop.eup %2620  ;;  %v5485_v2 = vld [vmem:[#allocation111_spill] sm:$0xff] }
 0x1e7   :  { %v1308_v5 = vsub.f32 %v1051_v41, %v1164_v6  ;;  %v1591_v24 = vsel %vm1064_vm0, %v4232_v0, 0.0  ;;  %v1585_v51 = vadd.f32 %v1584_v62, %v1583_v39  ;;  %2634 = vpow2.f32 %v1481_v21  ;;  %5482 = vst [vmem:[#allocation54_spill] sm:$0xff] %v4244_v63  ;;  %v5483_v41 = vld [vmem:[#allocation32_spill] sm:$0xff] }
 0x1e8   :  { %v1359_v37 = vmul.f32 1.442695, %v1244_v12  ;;  %v1423_v40 = vmul.f32 1.442695, %v1276_v53  ;;  %v1050_v1 = vsel %vm858_vm9, %v762_v45, %v954_v38  ;;  %vm861_vm10 = vcmp.ge.f32.partialorder %v765_v60, 0.0  ;;  %v4248_v12 = vpop.eup %2622 }
 0x1e9   :  { %v957_v3 = vmul.f32 0.2, %v765_v60  ;;  %v1592_v15 = vadd.f32 %v1591_v24, %v1590_v43  ;;  %v1158_v48 = vsel %vm1064_vm0, %v1050_v1, -inf  ;;  %v662_v6 = vadd.f32 %v555_v59, %v5483_v41 }
 0x1ea   :  { %2636 = vpow2.f32 %v1359_v37  ;;  %v1487_v33 = vmul.f32 1.442695, %v1308_v5  ;;  %v5486_v53 = vmax.f32 %v5484_v31, %v5485_v2  ;;  %v1676_v62 = vmul.f32 %v3982_v47, %v3897_v20 }
 0x1eb   :  { %2638 = vpow2.f32 %v1423_v40  ;;  %v1053_v21 = vsel %vm861_vm10, %v765_v60, %v957_v3  ;;  %v1586_v43 = vsel %vm1064_vm0, %v4244_v63, 0.0  ;;  %v764_v37 = vadd.f32 %v3864_v22, %v662_v6  ;;  %v5488_v60 = vld [vmem:[#allocation68_spill] sm:$0xff]  ;;  %v5489_v3 = vld [vmem:[#allocation63_spill] sm:$0xff] }
 0x1ec   :  { %v1159_v39 = vmax.f32 %v5486_v53, %v1158_v48  ;;  %v4255_v45 = vpop.eup %2624  ;;  %2640 = vrcp.f32 %v1577_v27  ;;  %v1173_v38 = vsel %vm1064_vm0, %v1053_v21, -inf  ;;  %v1587_v5 = vadd.f32 %v1586_v43, %v1585_v51  ;;  %1808 = vperm.xlu1 %2501, %v1676_v62   ;;  %v5491_v22 = vld [vmem:[#allocation112_spill] sm:$0xff]  ;;  %v561_v51 = vpop.xlane.xlu1 %560 }
 0x1ed   :  { %v4261_v40 = vpop.eup %2626  ;;  %v1598_v59 = vsel %vm1064_vm0, %v4255_v45, 0.0  ;;  %2642 = vrcp.f32 %v1592_v15  ;;  %v5492_v6 = vmax.f32 %v5339_v14, %v5491_v22  ;;  %v4280_v53 = vsel %vm838_vm8, %v4065_v42, %v4179_v55 }
 0x1ee   :  { %5487 = vst [vmem:[#allocation59_spill] sm:$0xff] %v4261_v40  ;;  %v1243_v24 = vsub.f32 %v5488_v60, %v1159_v39  ;;  %v1275_v20 = vsub.f32 %v5489_v3, %v1159_v39  ;;  %v4267_v48 = vpop.eup %2628  ;;  %v1599_v27 = vsel %vm1064_vm0, %v4261_v40, 0.0  ;;  %v1307_v41 = vsub.f32 %v1050_v1, %v1159_v39  ;;  %v5495_v1 = vld [vmem:[#allocation69_spill] sm:$0xff]  ;;  %v5496_v3 = vld [vmem:[#allocation64_spill] sm:$0xff] }
 0x1ef   :  { %5490 = vst [vmem:[#allocation104_spill] sm:$0xff] %v4267_v48  ;;  %v1174_v31 = vmax.f32 %v5492_v6, %v1173_v38  ;;  %v4274_v2 = vpop.eup %2630  ;;  %v1600_v62 = vadd.f32 %v1599_v27, %v1598_v59  ;;  %2644 = vpow2.f32 %v1487_v33  ;;  %v956_v15 = vmul.f32 0.2, %v764_v37  ;;  %v5497_v6 = vld [vmem:[#allocation33_spill] sm:$0xff] }
 0x1f0   :  { %5493 = vst [vmem:[#allocation89_spill] sm:$0xff] %v4274_v2  ;;  %v4282_v43 = vpop.eup %2632  ;;  %v1357_v60 = vmul.f32 1.442695, %v1243_v24  ;;  %vm860_vm11 = vcmp.ge.f32.partialorder %v764_v37, 0.0  ;;  %2646 = vrcp.f32 %v1587_v5  ;;  %v1421_v38 = vmul.f32 1.442695, %v1275_v20 }
 0x1f1   :  { %5494 = vst [vmem:[#allocation27_spill] sm:$0xff] %v4282_v43  ;;  %v1246_v39 = vsub.f32 %v5495_v1, %v1174_v31  ;;  %v1278_v14 = vsub.f32 %v5496_v3, %v1174_v31  ;;  %v1310_v22 = vsub.f32 %v1053_v21, %v1174_v31  ;;  %v665_v63 = vadd.f32 %v561_v51, %v5497_v6  ;;  %v4287_v58 = vpop.eup %2634 }
 0x1f2   :  { %5498 = vst [vmem:[#allocation28_spill] sm:$0xff] %v4287_v58  ;;  %v1601_v42 = vsel %vm1064_vm0, %v4267_v48, 0.0  ;;  %v1593_v55 = vsel %vm1064_vm0, %v4274_v2, 0.0  ;;  %v4293_v33 = vmul.f32 1.442695, %v1307_v41  ;;  %v1594_v5 = vsel %vm1064_vm0, %v4282_v43, 0.0 }
 0x1f3   :  { %v1363_v59 = vmul.f32 1.442695, %v1246_v39  ;;  %v1602_v27 = vadd.f32 %v1601_v42, %v1600_v62  ;;  %v1427_v21 = vmul.f32 1.442695, %v1278_v14  ;;  %v1052_v20 = vsel %vm860_vm11, %v764_v37, %v956_v15  ;;  %v5500_v62 = vld [vmem:[#allocation117_spill] sm:$0xff]  ;;  %v559_v15 = vpop.xlane.xlu0 %558 }
 0x1f4   :  { %v4295_v24 = vpop.eup %2636  ;;  %2648 = vpow2.f32 %v1357_v60  ;;  %v1491_v1 = vmul.f32 1.442695, %v1310_v22  ;;  %v1168_v3 = vsel %vm1064_vm0, %v1052_v20, -inf  ;;  %v5501_v39 = vmax.f32 %v5345_v10, %v5500_v62  ;;  %v4309_v42 = vld [vmem:[#allocation2] ss:$0 sm:$0xff]  ;;  %v5503_v10 = vld [vmem:[#allocation113_spill] sm:$0xff] }
 0x1f5   :  { %v4299_v31 = vpop.eup %2638  ;;  %v1608_v51 = vsel %vm1064_vm0, %v4295_v24, 0.0  ;;  %2650 = vpow2.f32 %v1363_v59  ;;  %v767_v37 = vadd.f32 %v4309_v42, %v665_v63  ;;  %v1595_v48 = vadd.f32 %v1594_v5, %v1593_v55  ;;  %v5502_v59 = vld [vmem:[#allocation72_spill] sm:$0xff] }
 0x1f6   :  { %5499 = vst [vmem:[#allocation60_spill] sm:$0xff] %v4299_v31  ;;  %v1609_v41 = vsel %vm1064_vm0, %v4299_v31, 0.0  ;;  %v1169_v6 = vmax.f32 %v5501_v39, %v1168_v3  ;;  %v4312_v14 = vpop.eup %2640  ;;  %v1596_v60 = vsel %vm1064_vm0, %v4287_v58, 0.0  ;;  %2652 = vpow2.f32 %v1421_v38  ;;  %v565_v39 = vpop.xlane.xlu1 %564  ;;  %v5506_v31 = vld [vmem:[#allocation35_spill] sm:$0xff] }
 0x1f7   :  { %v1674_v22 = vmul.f32 %v3995_v13, %v3911_v11  ;;  %2654 = vpow2.f32 %v1427_v21  ;;  %v4320_v43 = vpop.eup %2642  ;;  %v1610_v63 = vadd.f32 %v1609_v41, %v1608_v51  ;;  %vm863_vm12 = vcmp.ge.f32.partialorder %v767_v37, 0.0  ;;  %v5505_v11 = vld [vmem:[#allocation34_spill] sm:$0xff] }
 0x1f8   :  { %v1245_v0 = vsub.f32 %v5502_v59, %v1169_v6  ;;  %v1277_v3 = vsub.f32 %v5503_v10, %v1169_v6  ;;  %v1309_v62 = vsub.f32 %v1052_v20, %v1169_v6  ;;  %2656 = vpow2.f32 %v1491_v1 }
 0x1f9   :  { %v959_v55 = vmul.f32 0.2, %v767_v37  ;;  %1803 = vperm.xlu0 %2500, %v1674_v22   ;;  %v4322_v5 = vpop.eup %2644  ;;  %v664_v21 = vadd.f32 %v559_v15, %v5505_v11  ;;  %2658 = vrcp.f32 %v1602_v27  ;;  %v667_v10 = vadd.f32 %v565_v39, %v5506_v31  ;;  %v5508_v27 = vld [vmem:[#allocation76_spill] sm:$0xff] }
 0x1fa   :  { %5504 = vst [vmem:[#allocation105_spill] sm:$0xff] %v4322_v5  ;;  %v1361_v38 = vmul.f32 1.442695, %v1245_v0  ;;  %v1425_v58 = vmul.f32 1.442695, %v1277_v3  ;;  %v1678_v20 = vmul.f32 %v4021_v29, %v3943_v54  ;;  %v4328_v6 = vpop.eup %2646  ;;  %v1597_v51 = vadd.f32 %v1596_v60, %v1595_v48  ;;  %v563_v0 = vpop.xlane.xlu0 %562 }
 0x1fb   :  { %v1489_v16 = vmul.f32 1.442695, %v1309_v62  ;;  %v1055_v59 = vsel %vm863_vm12, %v767_v37, %v959_v55  ;;  %5507 = vst [vmem:[#allocation61_spill] sm:$0xff] %v4328_v6  ;;  %v766_v41 = vadd.f32 %v4309_v42, %v664_v21  ;;  %v1611_v22 = vsel %vm1064_vm0, %v4322_v5, 0.0  ;;  %v5509_v37 = vld [vmem:[#allocation118_spill] sm:$0xff]  ;;  %v5511_v62 = vld [vmem:[#allocation73_spill] sm:$0xff] }
 0x1fc   :  { %2660 = vpow2.f32 %v1361_v38  ;;  %v1183_v1 = vsel %vm1064_vm0, %v1055_v59, -inf  ;;  %v5510_v15 = vmax.f32 %v5508_v27, %v5509_v37  ;;  %v769_v3 = vadd.f32 %v4309_v42, %v667_v10  ;;  %1813 = vperm.xlu1 %2501, %v1678_v20   ;;  %v5512_v55 = vld [vmem:[#allocation114_spill] sm:$0xff]  ;;  %v5513_v21 = vld [vmem:[#allocation36_spill] sm:$0xff] }
 0x1fd   :  { %2662 = vpow2.f32 %v1425_v58  ;;  %v1612_v54 = vadd.f32 %v1611_v22, %v1610_v63  ;;  %vm862_vm13 = vcmp.ge.f32.partialorder %v766_v41, 0.0  ;;  %v958_v48 = vmul.f32 0.2, %v766_v41 }
 0x1fe   :  { %v1184_v31 = vmax.f32 %v5510_v15, %v1183_v1  ;;  %2664 = vpow2.f32 %v1489_v16  ;;  %v4338_v60 = vpop.eup %2648  ;;  %v666_v58 = vadd.f32 %v563_v0, %v5513_v21  ;;  %vm865_vm14 = vcmp.ge.f32.partialorder %v769_v3, 0.0 }
 0x1ff   :  { %v4343_v5 = vpop.eup %2650  ;;  %2666 = vpow2.f32 %v4293_v33  ;;  %v1054_v1 = vsel %vm862_vm13, %v766_v41, %v958_v48  ;;  %v961_v10 = vmul.f32 0.2, %v769_v3  ;;  %v5515_v41 = vld [vmem:[#allocation77_spill] sm:$0xff] }
 0x200   :  { %v1248_v39 = vsub.f32 %v5511_v62, %v1184_v31  ;;  %v1280_v38 = vsub.f32 %v5512_v55, %v1184_v31  ;;  %v1312_v11 = vsub.f32 %v1055_v59, %v1184_v31  ;;  %v4346_v63 = vpop.eup %2652  ;;  %2668 = vrcp.f32 %v1597_v51  ;;  %v5516_v31 = vld [vmem:[#allocation120_spill] sm:$0xff]  ;;  %v569_v55 = vpop.xlane.xlu1 %568 }
 0x201   :  { %v1618_v16 = vsel %vm1064_vm0, %v4343_v5, 0.0  ;;  %v4350_v27 = vpop.eup %2654  ;;  %2670 = vrcp.f32 %v1612_v54  ;;  %v1178_v0 = vsel %vm1064_vm0, %v1054_v1, -inf  ;;  %v1057_v37 = vsel %vm865_vm14, %v769_v3, %v961_v10  ;;  %v5518_v3 = vld [vmem:[#allocation81_spill] sm:$0xff] }
 0x202   :  { %v1367_v20 = vmul.f32 1.442695, %v1248_v39  ;;  %v1431_v22 = vmul.f32 1.442695, %v1280_v38  ;;  %v1495_v59 = vmul.f32 1.442695, %v1312_v11  ;;  %v4353_v15 = vpop.eup %2656  ;;  %v5517_v51 = vmax.f32 %v5515_v41, %v5516_v31 }
 0x203   :  { %5514 = vst [vmem:[#allocation106_spill] sm:$0xff] %v4353_v15  ;;  %v1619_v33 = vsel %vm1064_vm0, %v4350_v27, 0.0  ;;  %v1193_v62 = vsel %vm1064_vm0, %v1057_v37, -inf  ;;  %v768_v39 = vadd.f32 %v4309_v42, %v666_v58  ;;  %v1621_v54 = vsel %vm1064_vm0, %v4353_v15, 0.0  ;;  %v5519_v11 = vld [vmem:[#allocation121_spill] sm:$0xff]  ;;  %v4367_v40 = vpop.eup %2658  ;;  %v5525_v15 = vld [vmem:[#allocation116_spill] sm:$0xff] }
 0x204   :  { %v1179_v48 = vmax.f32 %v5517_v51, %v1178_v0  ;;  %v1620_v38 = vadd.f32 %v1619_v33, %v1618_v16  ;;  %2672 = vpow2.f32 %v1367_v20  ;;  %v5520_v21 = vmax.f32 %v5518_v3, %v5519_v11  ;;  %v5522_v0 = vld [vmem:[#allocation115_spill] sm:$0xff]  ;;  %v5524_v16 = vld [vmem:[#allocation78_spill] sm:$0xff] }
 0x205   :  { %2674 = vpow2.f32 %v1431_v22  ;;  %vm864_vm15 = vcmp.ge.f32.partialorder %v768_v39, 0.0 }
 0x206   :  { %v1194_v10 = vmax.f32 %v5520_v21, %v1193_v62  ;;  %v1247_v41 = vsub.f32 %v5521_v19, %v1179_v48  ;;  %v1279_v31 = vsub.f32 %v5522_v0, %v1179_v48  ;;  %v1311_v51 = vsub.f32 %v1054_v1, %v1179_v48  ;;  %v4371_v29 = vpop.eup %2660  ;;  %v567_v21 = vpop.xlane.xlu0 %566 }
 0x207   :  { %5523 = vst [vmem:[#allocation29_spill] sm:$0xff] %v4371_v29  ;;  %v1622_v58 = vadd.f32 %v1621_v54, %v1620_v38  ;;  %2676 = vpow2.f32 %v1495_v59  ;;  %v4375_v13 = vpop.eup %2662  ;;  %v1613_v62 = vsel %vm1064_vm0, %v4371_v29, 0.0  ;;  %v573_v0 = vpop.xlane.xlu1 %572 }
 0x208   :  { %v1250_v33 = vsub.f32 %v5524_v16, %v1194_v10  ;;  %v1282_v20 = vsub.f32 %v5525_v15, %v1194_v10  ;;  %v1365_v3 = vmul.f32 1.442695, %v1247_v41  ;;  %v1429_v22 = vmul.f32 1.442695, %v1279_v31  ;;  %v4379_v19 = vpop.eup %2664 }
 0x209   :  { %v1314_v11 = vsub.f32 %v1057_v37, %v1194_v10  ;;  %5526 = vst [vmem:[#allocation109_spill] sm:$0xff] %v4379_v19  ;;  %2678 = vrcp.f32 %v1622_v58  ;;  %v1614_v1 = vsel %vm1064_vm0, %v4375_v13, 0.0  ;;  %v1493_v48 = vmul.f32 1.442695, %v1311_v51  ;;  %v4385_v16 = vpop.eup %2666  ;;  %v5528_v51 = vld [vmem:[#allocation37_spill] sm:$0xff] }
 0x20a   :  { %v1371_v59 = vmul.f32 1.442695, %v1250_v33  ;;  %v1615_v38 = vadd.f32 %v1614_v1, %v1613_v62  ;;  %v1616_v15 = vsel %vm1064_vm0, %v4379_v19, 0.0  ;;  %2680 = vpow2.f32 %v1365_v3  ;;  %v4387_v41 = vpop.eup %2668  ;;  %v5529_v3 = vld [vmem:[#allocation38_spill] sm:$0xff]  ;;  %v5530_v19 = vld [vmem:[#allocation39_spill] sm:$0xff] }
 0x20b   :  { %v1435_v54 = vmul.f32 1.442695, %v1282_v20  ;;  %2682 = vpow2.f32 %v1429_v22  ;;  %v1499_v37 = vmul.f32 1.442695, %v1314_v11  ;;  %v960_v10 = vmul.f32 0.2, %v768_v39  ;;  %v4392_v62 = vpop.eup %2670 }
 0x20c   :  { %5527 = vst [vmem:[#allocation65_spill] sm:$0xff] %v4387_v41  ;;  %v1617_v31 = vadd.f32 %v1616_v15, %v1615_v38  ;;  %2684 = vpow2.f32 %v1493_v48  ;;  %v669_v58 = vadd.f32 %v569_v55, %v5528_v51  ;;  %v1680_v33 = vmul.f32 %v4003_v4, %v3927_v56  ;;  %v5532_v56 = vld [vmem:[#allocation82_spill] sm:$0xff]  ;;  %v5533_v38 = vld [vmem:[#allocation123_spill] sm:$0xff]  ;;  %v5538_v4 = vld [vmem:[#allocation40_spill] sm:$0xff] }
 0x20d   :  { %2686 = vpow2.f32 %v1371_v59  ;;  %v1056_v20 = vsel %vm864_vm15, %v768_v39, %v960_v10  ;;  %v668_v1 = vadd.f32 %v567_v21, %v5529_v3  ;;  %v671_v22 = vadd.f32 %v573_v0, %v5530_v19  ;;  %v5536_v51 = vld [vmem:[#allocation79_spill] sm:$0xff] }
 0x20e   :  { %2688 = vrcp.f32 %v1617_v31  ;;  %v1188_v11 = vsel %vm1064_vm0, %v1056_v20, -inf  ;;  %v771_v47 = vadd.f32 %v4309_v42, %v669_v58  ;;  %1818 = vperm.xlu1 %2501, %v1680_v33   ;;  %v1682_v55 = vmul.f32 %v4057_v36, %v3986_v57  ;;  %v4400_v48 = vpop.eup %2672  ;;  %v571_v57 = vpop.xlane.xlu0 %570  ;;  %v5537_v33 = vld [vmem:[#allocation71_spill] sm:$0xff] }
 0x20f   :  { %5531 = vst [vmem:[#allocation107_spill] sm:$0xff] %v4400_v48  ;;  %2690 = vpow2.f32 %v1435_v54  ;;  %v5534_v59 = vmax.f32 %v5532_v56, %v5533_v38  ;;  %v770_v15 = vadd.f32 %v4309_v42, %v668_v1  ;;  %v773_v19 = vadd.f32 %v4309_v42, %v671_v22  ;;  %v4407_v21 = vpop.eup %2674 }
 0x210   :  { %v1628_v0 = vsel %vm1064_vm0, %v4400_v48, 0.0  ;;  %2692 = vpow2.f32 %v1499_v37  ;;  %vm867_vm1 = vcmp.ge.f32.partialorder %v771_v47, 0.0  ;;  %v963_v10 = vmul.f32 0.2, %v771_v47 }
 0x211   :  { %v1189_v39 = vmax.f32 %v5534_v59, %v1188_v11  ;;  %v4411_v31 = vpop.eup %2676  ;;  %v1629_v54 = vsel %vm1064_vm0, %v4407_v21, 0.0  ;;  %vm866_vm2 = vcmp.ge.f32.partialorder %v770_v15, 0.0  ;;  %v670_v29 = vadd.f32 %v571_v57, %v5538_v4 }
 0x212   :  { %5535 = vst [vmem:[#allocation66_spill] sm:$0xff] %v4411_v31  ;;  %v1630_v22 = vadd.f32 %v1629_v54, %v1628_v0  ;;  %v1631_v11 = vsel %vm1064_vm0, %v4411_v31, 0.0  ;;  %v1059_v56 = vsel %vm867_vm1, %v771_v47, %v963_v10  ;;  %1823 = vperm.xlu1 %2501, %v1682_v55   ;;  %vm869_vm3 = vcmp.ge.f32.partialorder %v773_v19, 0.0  ;;  %v5541_v55 = vld [vmem:[#allocation83_spill] sm:$0xff]  ;;  %v5542_v0 = vld [vmem:[#allocation124_spill] sm:$0xff] }
 0x213   :  { %v1249_v58 = vsub.f32 %v5536_v51, %v1189_v39  ;;  %v1281_v3 = vsub.f32 %v5537_v33, %v1189_v39  ;;  %v1313_v1 = vsub.f32 %v1056_v20, %v1189_v39  ;;  %v4419_v37 = vpop.eup %2678  ;;  %v1203_v33 = vsel %vm1064_vm0, %v1059_v56, -inf }
 0x214   :  { %v4422_v41 = vpop.eup %2680  ;;  %v1632_v51 = vadd.f32 %v1631_v11, %v1630_v22  ;;  %v962_v20 = vmul.f32 0.2, %v770_v15  ;;  %v5543_v10 = vmax.f32 %v5541_v55, %v5542_v0  ;;  %v5546_v55 = vld [vmem:[#allocation80_spill] sm:$0xff] }
 0x215   :  { %v1369_v38 = vmul.f32 1.442695, %v1249_v58  ;;  %v1433_v59 = vmul.f32 1.442695, %v1281_v3  ;;  %v1497_v36 = vmul.f32 1.442695, %v1313_v1  ;;  %v4425_v39 = vpop.eup %2682  ;;  %v772_v1 = vadd.f32 %v4309_v42, %v670_v29 }
 0x216   :  { %5539 = vst [vmem:[#allocation108_spill] sm:$0xff] %v4422_v41  ;;  %5540 = vst [vmem:[#allocation30_spill] sm:$0xff] %v4425_v39  ;;  %v1623_v47 = vsel %vm1064_vm0, %v4422_v41, 0.0  ;;  %v1204_v54 = vmax.f32 %v5543_v10, %v1203_v33  ;;  %v965_v58 = vmul.f32 0.2, %v773_v19  ;;  %v4432_v3 = vpop.eup %2684  ;;  %v1624_v4 = vsel %vm1064_vm0, %v4425_v39, 0.0 }
 0x217   :  { %2694 = vpow2.f32 %v1369_v38  ;;  %5544 = vst [vmem:[#allocation31_spill] sm:$0xff] %v4432_v3  ;;  %v1058_v57 = vsel %vm866_vm2, %v770_v15, %v962_v20  ;;  %v4438_v22 = vpop.eup %2686  ;;  %v1625_v11 = vadd.f32 %v1624_v4, %v1623_v47  ;;  %v1626_v38 = vsel %vm1064_vm0, %v4432_v3, 0.0  ;;  %v5547_v10 = vld [vmem:[#allocation119_spill] sm:$0xff] }
 0x218   :  { %2696 = vrcp.f32 %v1632_v51  ;;  %5545 = vst [vmem:[#allocation67_spill] sm:$0xff] %v4438_v22  ;;  %v1252_v33 = vsub.f32 %v5546_v55, %v1204_v54  ;;  %v4443_v0 = vpop.eup %2688  ;;  %v1638_v51 = vsel %vm1064_vm0, %v4438_v22, 0.0  ;;  %v1284_v41 = vsub.f32 %v5547_v10, %v1204_v54  ;;  %v5548_v22 = vld [vmem:[#allocation87_spill] sm:$0xff] }
 0x219   :  { %2698 = vpow2.f32 %v1433_v59  ;;  %v1316_v15 = vsub.f32 %v1059_v56, %v1204_v54  ;;  %v4448_v20 = vpop.eup %2690  ;;  %v1627_v29 = vadd.f32 %v1626_v38, %v1625_v11  ;;  %v1198_v47 = vsel %vm1064_vm0, %v1058_v57, -inf  ;;  %v5552_v38 = vld [vmem:[#allocation122_spill] sm:$0xff] }
 0x21a   :  { %2700 = vpow2.f32 %v1497_v36  ;;  %v1375_v31 = vmul.f32 1.442695, %v1252_v33  ;;  %v1061_v4 = vsel %vm869_vm3, %v773_v19, %v965_v58  ;;  %v4452_v59 = vpop.eup %2692  ;;  %v1639_v55 = vsel %vm1064_vm0, %v4448_v20, 0.0  ;;  %v5549_v36 = vld [vmem:[#allocation13_spill] sm:$0xff]  ;;  %v5551_v19 = vld [vmem:[#allocation84_spill] sm:$0xff] }
 0x21b   :  { %v1439_v3 = vmul.f32 1.442695, %v1284_v41  ;;  %v1503_v2 = vmul.f32 1.442695, %v1316_v15  ;;  %v5550_v48 = vmax.f32 %v5548_v22, %v5549_v36  ;;  %2702 = vrcp.f32 %v1627_v29  ;;  %v5553_v41 = vld [vmem:[#allocation88_spill] sm:$0xff]  ;;  %v5554_v15 = vld [vmem:[#allocation125_spill] sm:$0xff] }
 0x21c   :  { %v1640_v56 = vadd.f32 %v1639_v55, %v1638_v51  ;;  %v1641_v54 = vsel %vm1064_vm0, %v4452_v59, 0.0  ;;  %v1213_v11 = vsel %vm1064_vm0, %v1061_v4, -inf  ;;  %2704 = vpow2.f32 %v1375_v31  ;;  %v5557_v31 = vld [vmem:[#allocation85_spill] sm:$0xff] }
 0x21d   :  { %v1199_v10 = vmax.f32 %v5550_v48, %v1198_v47  ;;  %2706 = vpow2.f32 %v1439_v3  ;;  %v5555_v7 = vmax.f32 %v5553_v41, %v5554_v15  ;;  %vm868_vm4 = vcmp.ge.f32.partialorder %v772_v1, 0.0  ;;  %v577_v48 = vpop.xlane.xlu1 %576  ;;  %v5560_v15 = vld [vmem:[#allocation91_spill] sm:$0xff] }
 0x21e   :  { %v1642_v6 = vadd.f32 %v1641_v54, %v1640_v56  ;;  %2708 = vpow2.f32 %v1503_v2  ;;  %v1221_v3 = vsel %vm1064_vm0, %v4176_v18, -inf  ;;  %v5559_v56 = vld [vmem:[#allocation41_spill] sm:$0xff] }
 0x21f   :  { %v1251_v58 = vsub.f32 %v5551_v19, %v1199_v10  ;;  %v1283_v33 = vsub.f32 %v5552_v38, %v1199_v10  ;;  %v1315_v39 = vsub.f32 %v1058_v57, %v1199_v10  ;;  %v1214_v22 = vmax.f32 %v5555_v7, %v1213_v11  ;;  %v5558_v19 = vld [vmem:[#allocation75_spill] sm:$0xff] }
 0x220   :  { %2710 = vrcp.f32 %v1642_v6  ;;  %v964_v7 = vmul.f32 0.2, %v772_v1  ;;  %v673_v2 = vadd.f32 %v577_v48, %v5559_v56  ;;  %v5561_v48 = vld [vmem:[#allocation92_spill] sm:$0xff]  ;;  %v5564_v56 = vld [vmem:[#allocation86_spill] sm:$0xff] }
 0x221   :  { %v1373_v51 = vmul.f32 1.442695, %v1251_v58  ;;  %v1437_v29 = vmul.f32 1.442695, %v1283_v33  ;;  %v1501_v47 = vmul.f32 1.442695, %v1315_v39  ;;  %v4467_v55 = vpop.eup %2694  ;;  %v1254_v36 = vsub.f32 %v5557_v31, %v1214_v22 }
 0x222   :  { %5556 = vst [vmem:[#allocation110_spill] sm:$0xff] %v4467_v55  ;;  %v1286_v38 = vsub.f32 %v5558_v19, %v1214_v22  ;;  %v1318_v57 = vsub.f32 %v1061_v4, %v1214_v22  ;;  %v4471_v10 = vpop.eup %2696  ;;  %v4482_v4 = vsel %vm1064_vm0, %v4280_v53, -inf  ;;  %v1060_v33 = vsel %vm868_vm4, %v772_v1, %v964_v7  ;;  %v575_v19 = vpop.xlane.xlu0 %574 }
 0x223   :  { %2712 = vpow2.f32 %v1373_v51  ;;  %v4476_v54 = vpop.eup %2698  ;;  %v1379_v39 = vmul.f32 1.442695, %v1254_v36  ;;  %v775_v41 = vadd.f32 %v4309_v42, %v673_v2  ;;  %v4488_v22 = vsel %vm1064_vm0, %v5560_v15, -inf }
 0x224   :  { %2714 = vpow2.f32 %v1437_v29  ;;  %v1443_v11 = vmul.f32 1.442695, %v1286_v38  ;;  %v1507_v6 = vmul.f32 1.442695, %v1318_v57  ;;  %v4478_v58 = vpop.eup %2700  ;;  %v1222_v51 = vmax.f32 %v5561_v48, %v1221_v3 }
 0x225   :  { %2716 = vpow2.f32 %v1501_v47  ;;  %v1208_v29 = vsel %vm1064_vm0, %v1060_v33, -inf  ;;  %v5562_v31 = vmax.f32 %v5446_v34, %v3847_v46  ;;  %vm871_vm5 = vcmp.ge.f32.partialorder %v775_v41, 0.0  ;;  %v4495_v1 = vpop.eup %2702  ;;  %v5565_v34 = vld [vmem:[#allocation126_spill] sm:$0xff] }
 0x226   :  { %2718 = vpow2.f32 %v1379_v39  ;;  %v967_v47 = vmul.f32 0.2, %v775_v41  ;;  %v1692_v57 = vmul.f32 %v4153_v23, %v4071_v50  ;;  %v1684_v3 = vmul.f32 %v4034_v8, %v3958_v28  ;;  %v4503_v7 = vpop.eup %2704  ;;  %v5566_v28 = vld [vmem:[#allocation42_spill] sm:$0xff] }
 0x227   :  { %2720 = vpow2.f32 %v1443_v11  ;;  %v1209_v36 = vmax.f32 %v5562_v31, %v1208_v29  ;;  %5563 = vst [vmem:[#allocation32_spill] sm:$0xff] %v4503_v7  ;;  %v4507_v48 = vpop.eup %2706  ;;  %v1633_v29 = vsel %vm1064_vm0, %v4467_v55, 0.0  ;;  %v672_v31 = vadd.f32 %v575_v19, %v5566_v28  ;;  %v5569_v19 = vld [vmem:[#allocation90_spill] sm:$0xff] }
 0x228   :  { %2722 = vpow2.f32 %v1507_v6  ;;  %v1063_v11 = vsel %vm871_vm5, %v775_v41, %v967_v47  ;;  %v1648_v6 = vsel %vm1064_vm0, %v4503_v7, 0.0  ;;  %1848 = vperm.xlu0 %2500, %v1692_v57   ;;  %1828 = vperm.xlu1 %2501, %v1684_v3   ;;  %v4515_v38 = vpop.eup %2708 }
 0x229   :  { %v1253_v46 = vsub.f32 %v5564_v56, %v1209_v36  ;;  %v1285_v2 = vsub.f32 %v5565_v34, %v1209_v36  ;;  %v1317_v39 = vsub.f32 %v1060_v33, %v1209_v36  ;;  %v1223_v50 = vsel %vm1064_vm0, %v1063_v11, -inf  ;;  %5567 = vst [vmem:[#allocation70_spill] sm:$0xff] %v4515_v38 }
 0x22a   :  { %v1649_v33 = vsel %vm1064_vm0, %v4507_v48, 0.0  ;;  %v1224_v47 = vmax.f32 %v1222_v51, %v1223_v50  ;;  %v4519_v56 = vpop.eup %2710  ;;  %v1634_v34 = vsel %vm1064_vm0, %v4476_v54, 0.0  ;;  %v774_v57 = vadd.f32 %v4309_v42, %v672_v31 }
 0x22b   :  { %v1377_v41 = vmul.f32 1.442695, %v1253_v46  ;;  %v1441_v36 = vmul.f32 1.442695, %v1285_v2  ;;  %v1650_v23 = vadd.f32 %v1649_v33, %v1648_v6  ;;  %v1505_v8 = vmul.f32 1.442695, %v1317_v39 }
 0x22c   :  { %v1256_v28 = vsub.f32 %v5569_v19, %v1224_v47  ;;  %v1288_v55 = vsub.f32 %v4176_v18, %v1224_v47  ;;  %v1320_v7 = vsub.f32 %v1063_v11, %v1224_v47  ;;  %v1603_v51 = vsel %vm1064_vm0, %v4338_v60, 0.0 }
 0x22d   :  { %v4524_v3 = vpop.eup %2712  ;;  %2724 = vpow2.f32 %v1377_v41  ;;  %v1651_v2 = vsel %vm1064_vm0, %v4515_v38, 0.0  ;;  %v1635_v31 = vadd.f32 %v1634_v34, %v1633_v29  ;;  %vm870_vm6 = vcmp.ge.f32.partialorder %v774_v57, 0.0 }
 0x22e   :  { %5568 = vst [vmem:[#allocation111_spill] sm:$0xff] %v4524_v3  ;;  %v4528_v46 = vpop.eup %2714  ;;  %v1643_v39 = vsel %vm1064_vm0, %v4524_v3, 0.0  ;;  %2726 = vpow2.f32 %v1441_v36  ;;  %v1383_v18 = vmul.f32 1.442695, %v1256_v28  ;;  %v1447_v11 = vmul.f32 1.442695, %v1288_v55 }
 0x22f   :  { %v4536_v42 = vpop.eup %2716  ;;  %v1644_v6 = vsel %vm1064_vm0, %v4528_v46, 0.0  ;;  %2728 = vpow2.f32 %v1505_v8  ;;  %v1652_v33 = vadd.f32 %v1651_v2, %v1650_v23  ;;  %v1511_v41 = vmul.f32 1.442695, %v1320_v7 }
 0x230   :  { %v4540_v50 = vpop.eup %2718  ;;  %2730 = vpow2.f32 %v1383_v18  ;;  %v966_v36 = vmul.f32 0.2, %v774_v57  ;;  %v1696_v3 = vmul.f32 %v4191_v32, %v4107_v9  ;;  %v1645_v8 = vadd.f32 %v1644_v6, %v1643_v39 }
 0x231   :  { %v4542_v47 = vpop.eup %2720  ;;  %v1658_v19 = vsel %vm1064_vm0, %v4540_v50, 0.0  ;;  %2732 = vpow2.f32 %v1447_v11  ;;  %v1686_v23 = vmul.f32 %v4110_v52, %v4038_v17  ;;  %v1604_v7 = vsel %vm1064_vm0, %v4346_v63, 0.0 }
 0x232   :  { %v4548_v38 = vpop.eup %2722  ;;  %v1659_v55 = vsel %vm1064_vm0, %v4542_v47, 0.0  ;;  %2734 = vpow2.f32 %v1511_v41  ;;  %v1062_v34 = vsel %vm870_vm6, %v774_v57, %v966_v36  ;;  %1858 = vperm.xlu0 %2500, %v1696_v3   ;;  %v1636_v9 = vsel %vm1064_vm0, %v4478_v58, 0.0 }
 0x233   :  { %v1660_v29 = vadd.f32 %v1659_v55, %v1658_v19  ;;  %v1661_v28 = vsel %vm1064_vm0, %v4548_v38, 0.0  ;;  %v1218_v2 = vsel %vm1064_vm0, %v1062_v34, -inf  ;;  %1833 = vperm.xlu1 %2501, %v1686_v23   ;;  %v1700_v39 = vmul.f32 %v4248_v12, %v4158_v26 }
 0x234   :  { %v1637_v17 = vadd.f32 %v1636_v9, %v1635_v31  ;;  %v1646_v6 = vsel %vm1064_vm0, %v4536_v42, 0.0  ;;  %v5570_v57 = vmax.f32 %v4488_v22, %v4482_v4  ;;  %2736 = vrcp.f32 %v1652_v33 }
 0x235   :  { %v1662_v18 = vadd.f32 %v1661_v28, %v1660_v29  ;;  %v1647_v11 = vadd.f32 %v1646_v6, %v1645_v8  ;;  %v1688_v41 = vmul.f32 %v4073_v25, %v4006_v30  ;;  %v1704_v55 = vmul.f32 %v4320_v43, %v4210_v35 }
 0x236   :  { %v1219_v3 = vmax.f32 %v5570_v57, %v1218_v2  ;;  %1868 = vperm.xlu0 %2500, %v1700_v39   ;;  %v1605_v4 = vadd.f32 %v1604_v7, %v1603_v51  ;;  %v1690_v35 = vmul.f32 %v4185_v61, %v4090_v49  ;;  %v1606_v28 = vsel %vm1064_vm0, %v4385_v16, 0.0  ;;  %v5571_v57 = vld [vmem:[#allocation102_spill] sm:$0xff] }
 0x237   :  { %v4570_v19 = vpop.eup %2724  ;;  %2738 = vrcp.f32 %v1662_v18  ;;  %1838 = vperm.xlu1 %2501, %v1688_v41  }
 0x238   :  { %v1255_v36 = vsub.f32 %v5560_v15, %v1219_v3  ;;  %v1287_v26 = vsub.f32 %v4280_v53, %v1219_v3  ;;  %v1319_v31 = vsub.f32 %v1062_v34, %v1219_v3  ;;  %v4576_v23 = vpop.eup %2726  ;;  %v1653_v22 = vsel %vm1064_vm0, %v4570_v19, 0.0 }
 0x239   :  { %v4580_v30 = vpop.eup %2728  ;;  %2740 = vrcp.f32 %v1637_v17  ;;  %v1654_v15 = vsel %vm1064_vm0, %v4576_v23, 0.0  ;;  %v1708_v34 = vmul.f32 %v4367_v40, %v4255_v45  ;;  %v1607_v17 = vadd.f32 %v1606_v28, %v1605_v4  ;;  %v5575_v28 = vld [vmem:[#allocation30_spill] sm:$0xff] }
 0x23a   :  { %v1381_v53 = vmul.f32 1.442695, %v1255_v36  ;;  %v1445_v33 = vmul.f32 1.442695, %v1287_v26  ;;  %2742 = vrcp.f32 %v1647_v11  ;;  %v1655_v8 = vadd.f32 %v1654_v15, %v1653_v22  ;;  %v4586_v51 = vpop.eup %2730  ;;  %1878 = vperm.xlu0 %2500, %v1704_v55  }
 0x23b   :  { %v1509_v29 = vmul.f32 1.442695, %v1319_v31  ;;  %v1656_v7 = vsel %vm1064_vm0, %v4580_v30, 0.0  ;;  %v2733_v9 = vpop.eup %2732  ;;  %v1668_v39 = vsel %vm1064_vm0, %v4586_v51, 0.0  ;;  %1843 = vperm.xlu1 %2501, %v1690_v35   ;;  %v1694_v45 = vmul.f32 %v4217_v44, %v5571_v57  ;;  %v5572_v31 = vld [vmem:[#allocation25_spill] sm:$0xff] }
 0x23c   :  { %2744 = vpow2.f32 %v1381_v53  ;;  %v1657_v2 = vadd.f32 %v1656_v7, %v1655_v8  ;;  %v2735_v49 = vpop.eup %2734  ;;  %v1669_v6 = vsel %vm1064_vm0, %v2733_v9, 0.0  ;;  %v1712_v11 = vmul.f32 %v4392_v62, %v4295_v24  ;;  %v5573_v7 = vld [vmem:[#allocation57_spill] sm:$0xff] }
 0x23d   :  { %2746 = vpow2.f32 %v1445_v33  ;;  %v1670_v18 = vadd.f32 %v1669_v6, %v1668_v39  ;;  %v1671_v3 = vsel %vm1064_vm0, %v2735_v49, 0.0  ;;  %v1698_v55 = vmul.f32 %v4312_v14, %v5572_v31 }
 0x23e   :  { %2748 = vpow2.f32 %v1509_v29  ;;  %1888 = vperm.xlu0 %2500, %v1708_v34   ;;  %v2737_v41 = vpop.eup %2736  ;;  %v1716_v22 = vmul.f32 %v4419_v37, %v4343_v5  ;;  %v4608_v15 = vmul.f32 %v4419_v37, %v4350_v27  ;;  %v4612_v24 = vmul.f32 %v4471_v10, %v4407_v21  ;;  %v5574_v34 = vld [vmem:[#allocation61_spill] sm:$0xff] }
 0x23f   :  { %2750 = vrcp.f32 %v1657_v2  ;;  %v1672_v36 = vadd.f32 %v1671_v3, %v1670_v18  ;;  %1853 = vperm.xlu1 %2501, %v1694_v45   ;;  %v4616_v33 = vmul.f32 %v4519_v56, %v4448_v20  ;;  %v4621_v29 = vmul.f32 %v2737_v41, %v4507_v48 }
 0x240   :  { %2752 = vrcp.f32 %v1607_v17  ;;  %v4625_v5 = vmul.f32 %v4443_v0, %v4375_v13  ;;  %v1702_v20 = vmul.f32 %v5574_v34, %v5573_v7  ;;  %v4636_v2 = vmul.f32 %v4495_v1, %v5575_v28 }
 0x241   :  { %v2739_v26 = vpop.eup %2738  ;;  %2754 = vrcp.f32 %v1672_v36  ;;  %v5578_v36 = vld [vmem:[#allocation65_spill] sm:$0xff] }
 0x242   :  { %1898 = vperm.xlu0 %2500, %v1712_v11   ;;  %v4628_v27 = vmul.f32 %v2739_v26, %v4542_v47  ;;  %v5576_v47 = vld [vmem:[#allocation107_spill] sm:$0xff]  ;;  %v5577_v11 = vld [vmem:[#allocation89_spill] sm:$0xff] }
 0x243   :  { %v2741_v4 = vpop.eup %2740  ;;  %1863 = vperm.xlu1 %2501, %v1698_v55   ;;  %v1720_v17 = vmul.f32 %v4471_v10, %v5576_v47  ;;  %v1706_v31 = vmul.f32 %v5578_v36, %v5577_v11  ;;  %v5581_v47 = vld [vmem:[#allocation32_spill] sm:$0xff] }
 0x244   :  { %v2743_v53 = vpop.eup %2742  ;;  %v4639_v48 = vmul.f32 %v2741_v4, %v4476_v54  ;;  %v4683_v11 = vmul.f32 %v2741_v4, %v4478_v58 }
 0x245   :  { %v4645_v6 = vmul.f32 %v2743_v53, %v4528_v46 }
 0x246   :  { %v4618_v8 = vpop.eup %2744  ;;  %1908 = vperm.xlu0 %2500, %v1716_v22   ;;  %v5579_v22 = vld [vmem:[#allocation67_spill] sm:$0xff] }
 0x247   :  { %v2747_v35 = vpop.eup %2746  ;;  %v1663_v21 = vsel %vm1064_vm0, %v4618_v8, 0.0  ;;  %1873 = vperm.xlu1 %2501, %v1702_v20   ;;  %v1724_v7 = vmul.f32 %v4519_v56, %v5579_v22 }
 0x248   :  { %v2749_v39 = vpop.eup %2748  ;;  %v1664_v13 = vsel %vm1064_vm0, %v2747_v35, 0.0 }
 0x249   :  { %v2751_v18 = vpop.eup %2750  ;;  %v1665_v57 = vadd.f32 %v1664_v13, %v1663_v21  ;;  %v1666_v45 = vsel %vm1064_vm0, %v2749_v39, 0.0  ;;  %v4667_v13 = vmul.f32 %v4519_v56, %v4452_v59  ;;  %v4686_v59 = vmul.f32 %v2743_v53, %v4536_v42 }
 0x24a   :  { %v4649_v3 = vmul.f32 %v2751_v18, %v4576_v23  ;;  %v4653_v55 = vpop.eup %2752  ;;  %1918 = vperm.xlu0 %2500, %v1720_v17   ;;  %v5580_v23 = vld [vmem:[#allocation66_spill] sm:$0xff]  ;;  %v1728_v17 = vmul.f32 %v2737_v41, %v5581_v47  ;;  %v4689_v56 = vmul.f32 %v2751_v18, %v4580_v30 }
 0x24b   :  { %v1667_v54 = vadd.f32 %v1666_v45, %v1665_v57  ;;  %v2755_v46 = vpop.eup %2754  ;;  %1883 = vperm.xlu1 %2501, %v1706_v31   ;;  %v1710_v20 = vmul.f32 %v4653_v55, %v4338_v60  ;;  %v4663_v28 = vmul.f32 %v4471_v10, %v5580_v23  ;;  %v5582_v57 = vld [vmem:[#allocation70_spill] sm:$0xff]  ;;  %v1732_v31 = vmul.f32 %v2739_v26, %v4540_v50 }
 0x24c   :  { %v4657_v21 = vmul.f32 %v2755_v46, %v2733_v9  ;;  %v4671_v45 = vmul.f32 %v2737_v41, %v5582_v57  ;;  %v4674_v9 = vmul.f32 %v2739_v26, %v4548_v38  ;;  %v4680_v10 = vmul.f32 %v2755_v46, %v2735_v49  ;;  %v5584_v41 = vld [vmem:[#allocation29_spill] sm:$0xff]  ;;  %v5586_v30 = vld [vmem:[#allocation110_spill] sm:$0xff]  ;;  %v5589_v26 = vld [vmem:[#allocation111_spill] sm:$0xff] }
 0x24d   :  { %2756 = vrcp.f32 %v1667_v54  ;;  %v5583_v54 = vld [vmem:[#allocation31_spill] sm:$0xff]  ;;  %v1714_v38 = vmul.f32 %v4443_v0, %v5584_v41  ;;  %v1736_v58 = vmul.f32 %v2755_v46, %v4586_v51  ;;  %v1722_v23 = vmul.f32 %v2741_v4, %v5586_v30  ;;  %v5587_v47 = vld [vmem:[#allocation14_spill] sm:$0xff] }
 0x24e   :  { %1928 = vperm.xlu0 %2500, %v1724_v7   ;;  %v4678_v60 = vmul.f32 %v4495_v1, %v5583_v54  ;;  %v5585_v7 = vld [vmem:[#allocation108_spill] sm:$0xff]  ;;  %v1726_v57 = vmul.f32 %v2743_v53, %v5589_v26  ;;  %v5591_v54 = vld [vmem:[#allocation49_spill] sm:$0xff]  ;;  %v1730_v51 = vmul.f32 %v2751_v18, %v4570_v19  ;;  %v5595_v53 = vld [vmem:[#allocation15_spill] sm:$0xff] }
 0x24f   :  { %1893 = vperm.xlu1 %2501, %v1710_v20   ;;  %v1718_v49 = vmul.f32 %v4495_v1, %v5585_v7  ;;  %v5590_v1 = vld [vmem:[#allocation43_spill] sm:$0xff]  ;;  %v5596_v7 = vld [vmem:[#allocation48_spill] sm:$0xff]  ;;  %v5599_v18 = vld [vmem:[#allocation45_spill] sm:$0xff] }
 0x250   :  { %v1740_v41 = vmul.f32 %v5591_v54, %v5590_v1  ;;  %v5598_v30 = vld [vmem:[#allocation99_spill] sm:$0xff]  ;;  %v5604_v1 = vld [vmem:[#allocation58_spill] sm:$0xff] }
 0x251   :  { %v5603_v26 = vld [vmem:[#allocation95_spill] sm:$0xff] }
 0x252   :  { %1938 = vperm.xlu0 %2500, %v1728_v17   ;;  %v5588_v17 = vld [vmem:[#allocation47_spill] sm:$0xff] }
 0x253   :  { %1903 = vperm.xlu1 %2501, %v1714_v38   ;;  %v1738_v50 = vmul.f32 %v5588_v17, %v5587_v47  ;;  %v5594_v38 = vld [vmem:[#allocation53_spill] sm:$0xff] }
 0x256   :  { %1948 = vperm.xlu0 %2500, %v1732_v31   ;;  %v1744_v31 = vmul.f32 %v4073_v25, %v5594_v38  ;;  %v5607_v38 = vld [vmem:[#allocation51_spill] sm:$0xff] }
 0x257   :  { %v2757_v22 = vpop.eup %2756  ;;  %1913 = vperm.xlu1 %2501, %v1718_v49   ;;  %v1737_v49 = vmul.f32 %v5596_v7, %v5595_v53  ;;  %v5608_v53 = vld [vmem:[#allocation59_spill] sm:$0xff] }
 0x258   :  { %v4697_v20 = vmul.f32 %v2757_v22, %v2747_v35  ;;  %v4699_v42 = vmul.f32 %v2757_v22, %v2749_v39  ;;  %v5592_v35 = vld [vmem:[#allocation18_spill] sm:$0xff]  ;;  %v5593_v39 = vld [vmem:[#allocation20_spill] sm:$0xff]  ;;  %v1734_v4 = vmul.f32 %v2757_v22, %v4618_v8  ;;  %v5602_v22 = vld [vmem:[#allocation93_spill] sm:$0xff] }
 0x259   :  { %v1742_v46 = vmul.f32 %v5593_v39, %v5592_v35 }
 0x25a   :  { %1958 = vperm.xlu0 %2500, %v1736_v58   ;;  %v5597_v58 = vld [vmem:[#allocation22_spill] sm:$0xff] }
 0x25b   :  { %1923 = vperm.xlu1 %2501, %v1722_v23   ;;  %v1746_v19 = vmul.f32 %v5598_v30, %v5597_v58  ;;  %v5600_v23 = vld [vmem:[#allocation96_spill] sm:$0xff] }
 0x25c   :  { %v1739_v47 = vmul.f32 %v5600_v23, %v5599_v18  ;;  %v5609_v58 = vld [vmem:[#allocation24_spill] sm:$0xff] }
 0x25d   :  { %v5610_v18 = vld [vmem:[#allocation60_spill] sm:$0xff] }
 0x25e   :  { %1968 = vperm.xlu0 %2500, %v1738_v50   ;;  %v5601_v50 = vld [vmem:[#allocation52_spill] sm:$0xff] }
 0x25f   :  { %1933 = vperm.xlu1 %2501, %v1726_v57   ;;  %v1748_v8 = vmul.f32 %v4191_v32, %v5601_v50  ;;  %v1741_v57 = vmul.f32 %v5603_v26, %v5602_v22  ;;  %v5611_v50 = vld [vmem:[#allocation56_spill] sm:$0xff]  ;;  %v5612_v22 = vld [vmem:[#allocation62_spill] sm:$0xff] }
 0x262   :  { %1978 = vperm.xlu0 %2500, %v1740_v41   ;;  %v1750_v41 = vmul.f32 %v4248_v12, %v5604_v1  ;;  %v5613_v1 = vld [vmem:[#allocation27_spill] sm:$0xff] }
 0x263   :  { %1943 = vperm.xlu1 %2501, %v1730_v51   ;;  %v5605_v51 = vld [vmem:[#allocation21_spill] sm:$0xff] }
 0x264   :  { %v1743_v35 = vmul.f32 %v4110_v52, %v5605_v51  ;;  %v1755_v51 = vmul.f32 %v4653_v55, %v4346_v63  ;;  %v5614_v63 = vld [vmem:[#allocation12_spill] sm:$0xff] }
 0x266   :  { %1988 = vperm.xlu0 %2500, %v1742_v46   ;;  %v5606_v46 = vld [vmem:[#allocation26_spill] sm:$0xff] }
 0x267   :  { %1953 = vperm.xlu1 %2501, %v1734_v4   ;;  %v1752_v4 = vmul.f32 %v4320_v43, %v5606_v46  ;;  %v5618_v46 = vld [vmem:[#allocation16_spill] sm:$0xff] }
 0x26a   :  { %1998 = vperm.xlu0 %2500, %v1744_v31   ;;  %v1745_v31 = vmul.f32 %v4185_v61, %v5607_v38 }
 0x26b   :  { %1963 = vperm.xlu1 %2501, %v1737_v49   ;;  %v1754_v49 = vmul.f32 %v4367_v40, %v5608_v53 }
 0x26e   :  { %2008 = vperm.xlu0 %2500, %v1746_v19   ;;  %v1747_v19 = vmul.f32 %v4217_v44, %v5609_v58 }
 0x26f   :  { %1973 = vperm.xlu1 %2501, %v1739_v47   ;;  %v1756_v47 = vmul.f32 %v4392_v62, %v5610_v18  ;;  %v5623_v18 = vld [vmem:[#allocation103_spill] sm:$0xff] }
 0x272   :  { %2018 = vperm.xlu0 %2500, %v1748_v8   ;;  %v1749_v8 = vmul.f32 %v4312_v14, %v5611_v50 }
 0x273   :  { %1983 = vperm.xlu1 %2501, %v1741_v57   ;;  %v1751_v57 = vmul.f32 %v5574_v34, %v5612_v22 }
 0x276   :  { %2028 = vperm.xlu0 %2500, %v1750_v41   ;;  %v1753_v41 = vmul.f32 %v5578_v36, %v5613_v1 }
 0x277   :  { %1993 = vperm.xlu1 %2501, %v1743_v35   ;;  %v4750_v35 = vpop.permute.xlu1 %1808 }
 0x27a   :  { %2038 = vperm.xlu0 %2500, %v1752_v4  }
 0x27b   :  { %2003 = vperm.xlu1 %2501, %v1745_v31   ;;  %v5620_v31 = vld [vmem:[#allocation17_spill] sm:$0xff] }
 0x27c   :  { %v1771_v53 = vmul.f32 %v5600_v23, %v5620_v31  ;;  %v5624_v23 = vld [vmem:[#allocation50_spill] sm:$0xff] }
 0x27d   :  { %v1775_v50 = vmul.f32 %v4110_v52, %v5624_v23 }
 0x27e   :  { %2048 = vperm.xlu0 %2500, %v1754_v49  }
 0x27f   :  { %2013 = vperm.xlu1 %2501, %v1747_v19  }
 0x282   :  { %2058 = vperm.xlu0 %2500, %v1756_v47  }
 0x283   :  { %2023 = vperm.xlu1 %2501, %v1749_v8  }
 0x286   :  { %2068 = vperm.xlu0 %2500, %v4608_v15   ;;  %v4755_v15 = vpop.permute.xlu1 %1813 }
 0x287   :  { %2033 = vperm.xlu1 %2501, %v1751_v57   ;;  %v5626_v57 = vld [vmem:[#allocation97_spill] sm:$0xff] }
 0x288   :  { %v1777_v1 = vmul.f32 %v4185_v61, %v5626_v57 }
 0x28a   :  { %2078 = vperm.xlu0 %2500, %v4612_v24   ;;  %v1770_v24 = vmul.f32 %v5588_v17, %v5614_v63  ;;  %v5617_v17 = vld [vmem:[#allocation19_spill] sm:$0xff] }
 0x28b   :  { %2043 = vperm.xlu1 %2501, %v1753_v41   ;;  %v5628_v63 = vld [vmem:[#allocation55_spill] sm:$0xff] }
 0x28e   :  { %2088 = vperm.xlu0 %2500, %v4616_v33   ;;  %v5615_v33 = vld [vmem:[#allocation44_spill] sm:$0xff] }
 0x28f   :  { %2053 = vperm.xlu1 %2501, %v1755_v51  }
 0x292   :  { %2098 = vperm.xlu0 %2500, %v4621_v29   ;;  %v1772_v29 = vmul.f32 %v5591_v54, %v5615_v33  ;;  %v1769_v54 = vmul.f32 %v5596_v7, %v5618_v46  ;;  %v5622_v7 = vld [vmem:[#allocation94_spill] sm:$0xff] }
 0x293   :  { %2063 = vperm.xlu1 %2501, %v4625_v5   ;;  %v4763_v5 = vpop.permute.xlu1 %1818  ;;  %v1773_v58 = vmul.f32 %v5603_v26, %v5622_v7  ;;  %v5632_v46 = vld [vmem:[#allocation54_spill] sm:$0xff] }
 0x296   :  { %2108 = vperm.xlu0 %2500, %v4628_v27   ;;  %v5616_v27 = vld [vmem:[#allocation46_spill] sm:$0xff] }
 0x297   :  { %2073 = vperm.xlu1 %2501, %v4636_v2   ;;  %v1774_v2 = vmul.f32 %v5593_v39, %v5616_v27  ;;  %v5619_v39 = vld [vmem:[#allocation23_spill] sm:$0xff]  ;;  %v5630_v27 = vld [vmem:[#allocation100_spill] sm:$0xff] }
 0x298   :  { %v1778_v38 = vmul.f32 %v5598_v30, %v5619_v39  ;;  %v1782_v30 = vmul.f32 %v4248_v12, %v5623_v18  ;;  %v5627_v12 = vld [vmem:[#allocation104_spill] sm:$0xff] }
 0x299   :  { %v1786_v51 = vmul.f32 %v4367_v40, %v5627_v12  ;;  %v5631_v40 = vld [vmem:[#allocation106_spill] sm:$0xff] }
 0x29a   :  { %2118 = vperm.xlu0 %2500, %v4657_v21   ;;  %v4768_v21 = vpop.permute.xlu1 %1823 }
 0x29b   :  { %2083 = vperm.xlu1 %2501, %v4639_v48   ;;  %v4770_v48 = vpop.permute.xlu0 %1803 }
 0x29e   :  { %2128 = vperm.xlu0 %2500, %v1770_v24   ;;  %v1779_v24 = vmul.f32 %v4217_v44, %v5628_v63 }
 0x29f   :  { %2093 = vperm.xlu1 %2501, %v4645_v6   ;;  %v1776_v6 = vmul.f32 %v4073_v25, %v5617_v17 }
 0x2a2   :  { %2138 = vperm.xlu0 %2500, %v1772_v29  }
 0x2a3   :  { %2103 = vperm.xlu1 %2501, %v4649_v3  }
 0x2a6   :  { %2148 = vperm.xlu0 %2500, %v1774_v2   ;;  %v1781_v2 = vmul.f32 %v4312_v14, %v5630_v27 }
 0x2a7   :  { %2113 = vperm.xlu1 %2501, %v4697_v20   ;;  %v4777_v4 = vpop.permute.xlu0 %1848  ;;  %v4779_v3 = vpop.permute.xlu1 %1828  ;;  %v5621_v20 = vld [vmem:[#allocation98_spill] sm:$0xff] }
 0x2a8   :  { %v1780_v25 = vmul.f32 %v4191_v32, %v5621_v20  ;;  %v5625_v32 = vld [vmem:[#allocation101_spill] sm:$0xff] }
 0x2a9   :  { %v1784_v22 = vmul.f32 %v4320_v43, %v5625_v32  ;;  %v5629_v43 = vld [vmem:[#allocation105_spill] sm:$0xff] }
 0x2aa   :  { %2158 = vperm.xlu0 %2500, %v1776_v6   ;;  %v1788_v29 = vmul.f32 %v4392_v62, %v5629_v43  ;;  %v1790_v6 = vmul.f32 %v4419_v37, %v5631_v40 }
 0x2ab   :  { %2123 = vperm.xlu1 %2501, %v1769_v54   ;;  %v1783_v54 = vmul.f32 %v5574_v34, %v5632_v46 }
 0x2ae   :  { %2168 = vperm.xlu0 %2500, %v1778_v38   ;;  %v5633_v38 = vld [vmem:[#allocation28_spill] sm:$0xff] }
 0x2af   :  { %2133 = vperm.xlu1 %2501, %v1771_v53   ;;  %v1785_v14 = vmul.f32 %v5578_v36, %v5633_v38  ;;  %v1787_v53 = vmul.f32 %v4653_v55, %v4385_v16 }
 0x2b1   :  { %v4787_v49 = vpop.permute.xlu0 %1858 }
 0x2b2   :  { %v4791_v19 = vpop.permute.xlu1 %1833  ;;  %2178 = vperm.xlu0 %2500, %v1780_v25   ;;  %v5635_v25 = vld [vmem:[#allocation109_spill] sm:$0xff] }
 0x2b3   :  { %2143 = vperm.xlu1 %2501, %v1773_v58   ;;  %v1789_v36 = vmul.f32 %v4443_v0, %v5635_v25 }
 0x2b5   :  { %v4795_v47 = vpop.permute.xlu0 %1868 }
 0x2b6   :  { %v4799_v8 = vpop.permute.xlu1 %1838  ;;  %2188 = vperm.xlu0 %2500, %v1782_v30  }
 0x2b7   :  { %2153 = vperm.xlu1 %2501, %v1775_v50  }
 0x2b9   :  { %v4803_v26 = vpop.permute.xlu0 %1878 }
 0x2ba   :  { %v4807_v41 = vpop.permute.xlu1 %1843  ;;  %2198 = vperm.xlu0 %2500, %v1784_v22  }
 0x2bb   :  { %2163 = vperm.xlu1 %2501, %v1777_v1  }
 0x2bd   :  { %v4811_v52 = vpop.permute.xlu0 %1888 }
 0x2be   :  { %v4815_v33 = vpop.permute.xlu1 %1853  ;;  %2208 = vperm.xlu0 %2500, %v1786_v51  }
 0x2bf   :  { %2173 = vperm.xlu1 %2501, %v1779_v24  }
 0x2c1   :  { %v4819_v61 = vpop.permute.xlu0 %1898 }
 0x2c2   :  { %v4823_v17 = vpop.permute.xlu1 %1863  ;;  %2218 = vperm.xlu0 %2500, %v1788_v29  }
 0x2c3   :  { %2183 = vperm.xlu1 %2501, %v1781_v2  }
 0x2c5   :  { %v4827_v44 = vpop.permute.xlu0 %1908 }
 0x2c6   :  { %v4831_v39 = vpop.permute.xlu1 %1873  ;;  %2228 = vperm.xlu0 %2500, %v1790_v6  }
 0x2c7   :  { %2193 = vperm.xlu1 %2501, %v1783_v54  }
 0x2c9   :  { %v4833_v62 = vpop.permute.xlu0 %1918 }
 0x2ca   :  { %v4837_v31 = vpop.permute.xlu1 %1883  ;;  %2238 = vperm.xlu0 %2500, %v4663_v28  }
 0x2cb   :  { %2203 = vperm.xlu1 %2501, %v1785_v14   ;;  %v2760_v14 = vld [vmem:[#allocation3 + $0x108] sm:$0xff] }
 0x2cd   :  { %v4840_v37 = vpop.permute.xlu0 %1928 }
 0x2ce   :  { %v4844_v34 = vpop.permute.xlu1 %1893  ;;  %2248 = vperm.xlu0 %2500, %v4667_v13  }
 0x2cf   :  { %2213 = vperm.xlu1 %2501, %v1787_v53  }
 0x2d1   :  { %v4847_v20 = vpop.permute.xlu0 %1938 }
 0x2d2   :  { %5634 = vst [vmem:[#allocation68_spill] sm:$0xff] %v4847_v20  ;;  %v4851_v7 = vpop.permute.xlu1 %1903  ;;  %2258 = vperm.xlu0 %2500, %v4671_v45  }
 0x2d3   :  { %5636 = vst [vmem:[#allocation63_spill] sm:$0xff] %v4851_v7  ;;  %2223 = vperm.xlu1 %2501, %v1789_v36   ;;  %v2761_v36 = vld [vmem:[#allocation3 + $0x8] sm:$0xff] }
 0x2d5   :  { %v4854_v28 = vpop.permute.xlu0 %1948 }
 0x2d6   :  { %5637 = vst [vmem:[#allocation112_spill] sm:$0xff] %v4854_v28  ;;  %v4856_v58 = vpop.permute.xlu1 %1913  ;;  %2268 = vperm.xlu0 %2500, %v4674_v9   ;;  %v2763_v28 = vld [vmem:[#allocation3 + $0x208] sm:$0xff] }
 0x2d7   :  { %5638 = vst [vmem:[#allocation69_spill] sm:$0xff] %v4856_v58  ;;  %2233 = vperm.xlu1 %2501, %v4678_v60  }
 0x2d9   :  { %v4860_v16 = vpop.permute.xlu0 %1958 }
 0x2da   :  { %5639 = vst [vmem:[#allocation64_spill] sm:$0xff] %v4860_v16  ;;  %v4862_v55 = vpop.permute.xlu1 %1923  ;;  %2278 = vperm.xlu0 %2500, %v4680_v10  }
 0x2db   :  { %5640 = vst [vmem:[#allocation33_spill] sm:$0xff] %v4862_v55  ;;  %2243 = vperm.xlu1 %2501, %v4683_v11   ;;  %v2762_v55 = vld [vmem:[#allocation3 + $0x118] sm:$0xff] }
 0x2dd   :  { %v1969_v0 = vpop.permute.xlu0 %1968 }
 0x2de   :  { %v4866_v13 = vpop.permute.xlu1 %1933  ;;  %v2314_v53 = vmul.f32 %v2760_v14, %v1969_v0  ;;  %v2765_v0 = vld [vmem:[#allocation3 + $0x128] sm:$0xff] }
 0x2df   :  { %5641 = vst [vmem:[#allocation117_spill] sm:$0xff] %v4866_v13  ;;  %2253 = vperm.xlu1 %2501, %v4686_v59  }
 0x2e1   :  { %v1979_v45 = vpop.permute.xlu0 %1978 }
 0x2e2   :  { %v4869_v18 = vpop.permute.xlu1 %1943  ;;  %v2316_v16 = vmul.f32 %v2762_v55, %v1979_v45 }
 0x2e3   :  { %5642 = vst [vmem:[#allocation72_spill] sm:$0xff] %v4869_v18  ;;  %2263 = vperm.xlu1 %2501, %v4689_v56  }
 0x2e5   :  { %v1989_v9 = vpop.permute.xlu0 %1988 }
 0x2e6   :  { %v4872_v60 = vpop.permute.xlu1 %1953  ;;  %v2318_v14 = vmul.f32 %v2765_v0, %v1989_v9 }
 0x2e7   :  { %5643 = vst [vmem:[#allocation113_spill] sm:$0xff] %v4872_v60  ;;  %2273 = vperm.xlu1 %2501, %v4699_v42   ;;  %v2282_v60 = vmul.f32 %v2761_v36, %v4750_v35  ;;  %v2766_v35 = vld [vmem:[#allocation3 + $0x218] sm:$0xff] }
 0x2e9   :  { %v1999_v30 = vpop.permute.xlu0 %1998  ;;  %v2379_v13 = vadd.f32 %v2314_v53, %v2282_v60  ;;  %v2767_v60 = vld [vmem:[#allocation3 + $0x28] sm:$0xff] }
 0x2ea   :  { %v1964_v23 = vpop.permute.xlu1 %1963  ;;  %v2286_v55 = vmul.f32 %v2767_v60, %v4779_v3 }
 0x2ed   :  { %v4875_v10 = vpop.permute.xlu0 %2008 }
 0x2ee   :  { %v4877_v11 = vpop.permute.xlu1 %1973 }
 0x2f1   :  { %v4879_v50 = vpop.permute.xlu0 %2018 }
 0x2f2   :  { %v4881_v32 = vpop.permute.xlu1 %1983 }
 0x2f5   :  { %v4883_v59 = vpop.permute.xlu0 %2028 }
 0x2f6   :  { %v4885_v22 = vpop.permute.xlu1 %1993 }
 0x2f9   :  { %v4887_v56 = vpop.permute.xlu0 %2038 }
 0x2fa   :  { %v4889_v57 = vpop.permute.xlu1 %2003 }
 0x2fd   :  { %v4891_v1 = vpop.permute.xlu0 %2048 }
 0x2fe   :  { %v4893_v42 = vpop.permute.xlu1 %2013 }
 0x301   :  { %v4895_v12 = vpop.permute.xlu0 %2058 }
 0x302   :  { %v4897_v51 = vpop.permute.xlu1 %2023 }
 0x305   :  { %v4899_v63 = vpop.permute.xlu0 %2068 }
 0x306   :  { %v4901_v24 = vpop.permute.xlu1 %2033 }
 0x309   :  { %v4903_v43 = vpop.permute.xlu0 %2078 }
 0x30a   :  { %v4905_v29 = vpop.permute.xlu1 %2043 }
 0x30d   :  { %v4907_v27 = vpop.permute.xlu0 %2088 }
 0x30e   :  { %v4909_v2 = vpop.permute.xlu1 %2053 }
 0x311   :  { %v4911_v40 = vpop.permute.xlu0 %2098 }
 0x312   :  { %v4913_v6 = vpop.permute.xlu1 %2063 }
 0x313   :  { %5644 = vst [vmem:[#allocation34_spill] sm:$0xff] %v4913_v6 }
 0x315   :  { %v4915_v46 = vpop.permute.xlu0 %2108 }
 0x316   :  { %5645 = vst [vmem:[#allocation35_spill] sm:$0xff] %v4915_v46  ;;  %v4917_v54 = vpop.permute.xlu1 %2073  ;;  %v2764_v46 = vld [vmem:[#allocation3 + $0x18] sm:$0xff] }
 0x317   :  { %5646 = vst [vmem:[#allocation76_spill] sm:$0xff] %v4917_v54  ;;  %v2284_v54 = vmul.f32 %v2764_v46, %v4763_v5 }
 0x319   :  { %v4919_v38 = vpop.permute.xlu0 %2118  ;;  %v2383_v6 = vadd.f32 %v2316_v16, %v2284_v54 }
 0x31a   :  { %5647 = vst [vmem:[#allocation118_spill] sm:$0xff] %v4919_v38  ;;  %v4921_v25 = vpop.permute.xlu1 %2083 }
 0x31b   :  { %5648 = vst [vmem:[#allocation73_spill] sm:$0xff] %v4921_v25 }
 0x31d   :  { %v2129_v18 = vpop.permute.xlu0 %2128 }
 0x31e   :  { %v4924_v58 = vpop.permute.xlu1 %2093  ;;  %v2346_v7 = vmul.f32 %v2763_v28, %v2129_v18  ;;  %v2768_v28 = vld [vmem:[#allocation3 + $0x138] sm:$0xff] }
 0x31f   :  { %5649 = vst [vmem:[#allocation114_spill] sm:$0xff] %v4924_v58  ;;  %v2387_v58 = vadd.f32 %v2318_v14, %v2286_v55  ;;  %v2320_v18 = vmul.f32 %v2768_v28, %v1999_v30 }
 0x320   :  { %v2380_v20 = vadd.f32 %v2379_v13, %v2346_v7  ;;  %v2769_v7 = vld [vmem:[#allocation3 + $0x228] sm:$0xff]  ;;  %v2770_v13 = vld [vmem:[#allocation3 + $0x100] sm:$0xff] }
 0x321   :  { %v2139_v38 = vpop.permute.xlu0 %2138  ;;  %v2313_v9 = vmul.f32 %v2770_v13, %v1964_v23 }
 0x322   :  { %2442 = vst [vmem:[#allocation8 + $0x8] sm:$0xff] %v2380_v20  ;;  %v4927_v25 = vpop.permute.xlu1 %2103  ;;  %v2348_v36 = vmul.f32 %v2766_v35, %v2139_v38  ;;  %v2771_v20 = vld [vmem:[#allocation3 + $0x38] sm:$0xff]  ;;  %v2772_v38 = vld [vmem:[#allocation3] sm:$0xff]  ;;  %v2773_v35 = vld [vmem:[#allocation3 + $0x148] sm:$0xff] }
 0x323   :  { %v2288_v46 = vmul.f32 %v2771_v20, %v4799_v8  ;;  %v2281_v0 = vmul.f32 %v2772_v38, %v4770_v48  ;;  %v2322_v14 = vmul.f32 %v2773_v35, %v4875_v10  ;;  %v2777_v8 = vld [vmem:[#allocation3 + $0x48] sm:$0xff]  ;;  %v2778_v48 = vld [vmem:[#allocation3 + $0x10] sm:$0xff]  ;;  %v2779_v20 = vld [vmem:[#allocation3 + $0x158] sm:$0xff] }
 0x324   :  { %v2384_v45 = vadd.f32 %v2383_v6, %v2348_v36  ;;  %v2774_v36 = vld [vmem:[#allocation3 + $0x238] sm:$0xff] }
 0x325   :  { %v2149_v53 = vpop.permute.xlu0 %2148  ;;  %v2391_v6 = vadd.f32 %v2320_v18, %v2288_v46  ;;  %v2377_v55 = vadd.f32 %v2313_v9, %v2281_v0  ;;  %v2283_v18 = vmul.f32 %v2778_v48, %v4755_v15  ;;  %v2324_v46 = vmul.f32 %v2779_v20, %v4879_v50  ;;  %v2781_v0 = vld [vmem:[#allocation3 + $0x120] sm:$0xff]  ;;  %v2783_v35 = vld [vmem:[#allocation3 + $0x58] sm:$0xff] }
 0x326   :  { %2444 = vst [vmem:[#allocation8 + $0x18] sm:$0xff] %v2384_v45  ;;  %v4930_v5 = vpop.permute.xlu1 %2113  ;;  %v2350_v16 = vmul.f32 %v2769_v7, %v2149_v53  ;;  %v2775_v45 = vld [vmem:[#allocation3 + $0x110] sm:$0xff]  ;;  %v2776_v53 = vld [vmem:[#allocation3 + $0x200] sm:$0xff]  ;;  %v2292_v15 = vmul.f32 %v2783_v35, %v4787_v49  ;;  %v2795_v35 = vld [vmem:[#allocation3 + $0x78] sm:$0xff] }
 0x327   :  { %v2315_v23 = vmul.f32 %v2775_v45, %v4877_v11  ;;  %v2785_v45 = vld [vmem:[#allocation3 + $0x168] sm:$0xff]  ;;  %v2788_v49 = vld [vmem:[#allocation3 + $0x220] sm:$0xff] }
 0x328   :  { %v2388_v54 = vadd.f32 %v2387_v58, %v2350_v16  ;;  %v2290_v58 = vmul.f32 %v2777_v8, %v4777_v4  ;;  %v2782_v4 = vld [vmem:[#allocation3 + $0x210] sm:$0xff] }
 0x329   :  { %v2159_v3 = vpop.permute.xlu0 %2158  ;;  %v2381_v11 = vadd.f32 %v2315_v23, %v2283_v18  ;;  %v2789_v18 = vld [vmem:[#allocation3 + $0x68] sm:$0xff] }
 0x32a   :  { %2446 = vst [vmem:[#allocation8 + $0x28] sm:$0xff] %v2388_v54  ;;  %v2124_v30 = vpop.permute.xlu1 %2123  ;;  %v2352_v60 = vmul.f32 %v2774_v36, %v2159_v3  ;;  %v2395_v10 = vadd.f32 %v2322_v14, %v2290_v58  ;;  %v2780_v54 = vld [vmem:[#allocation3 + $0x248] sm:$0xff]  ;;  %v2317_v3 = vmul.f32 %v2781_v0, %v4881_v32  ;;  %v2784_v36 = vld [vmem:[#allocation3 + $0x20] sm:$0xff]  ;;  %v2787_v58 = vld [vmem:[#allocation3 + $0x130] sm:$0xff] }
 0x32b   :  { %v2345_v28 = vmul.f32 %v2776_v53, %v2124_v30  ;;  %v2285_v14 = vmul.f32 %v2784_v36, %v4768_v21  ;;  %v2326_v53 = vmul.f32 %v2785_v45, %v4883_v59  ;;  %v2294_v21 = vmul.f32 %v2789_v18, %v4795_v47  ;;  %v2794_v47 = vld [vmem:[#allocation3 + $0x230] sm:$0xff] }
 0x32c   :  { %v2392_v7 = vadd.f32 %v2391_v6, %v2352_v60 }
 0x32d   :  { %v2378_v16 = vadd.f32 %v2377_v55, %v2345_v28  ;;  %v2169_v13 = vpop.permute.xlu0 %2168  ;;  %v2399_v55 = vadd.f32 %v2324_v46, %v2292_v15  ;;  %v2786_v28 = vld [vmem:[#allocation3 + $0x258] sm:$0xff]  ;;  %v2385_v8 = vadd.f32 %v2317_v3, %v2285_v14  ;;  %v2403_v46 = vadd.f32 %v2326_v53, %v2294_v21  ;;  %v2793_v3 = vld [vmem:[#allocation3 + $0x140] sm:$0xff] }
 0x32e   :  { %2448 = vst [vmem:[#allocation8 + $0x38] sm:$0xff] %v2392_v7  ;;  %v2134_v9 = vpop.permute.xlu1 %2133  ;;  %v2354_v38 = vmul.f32 %v2780_v54, %v2169_v13  ;;  %v2319_v7 = vmul.f32 %v2787_v58, %v4885_v22  ;;  %v2790_v13 = vld [vmem:[#allocation3 + $0x30] sm:$0xff]  ;;  %v2798_v53 = vld [vmem:[#allocation3 + $0x278] sm:$0xff]  ;;  %v2801_v58 = vld [vmem:[#allocation3 + $0x88] sm:$0xff] }
 0x32f   :  { %2441 = vst [vmem:[#allocation8] sm:$0xff] %v2378_v16  ;;  %v2347_v6 = vmul.f32 %v2782_v4, %v2134_v9  ;;  %v2791_v9 = vld [vmem:[#allocation3 + $0x178] sm:$0xff]  ;;  %v2321_v4 = vmul.f32 %v2793_v3, %v4889_v57 }
 0x330   :  { %v2396_v30 = vadd.f32 %v2395_v10, %v2354_v38  ;;  %v2287_v10 = vmul.f32 %v2790_v13, %v4791_v19  ;;  %v2328_v54 = vmul.f32 %v2791_v9, %v4887_v56  ;;  %v2296_v19 = vmul.f32 %v2795_v35, %v4803_v26  ;;  %v2800_v26 = vld [vmem:[#allocation3 + $0x240] sm:$0xff] }
 0x331   :  { %v2382_v60 = vadd.f32 %v2381_v11, %v2347_v6  ;;  %v2179_v50 = vpop.permute.xlu0 %2178  ;;  %v2792_v11 = vld [vmem:[#allocation3 + $0x268] sm:$0xff] }
 0x332   :  { %2450 = vst [vmem:[#allocation8 + $0x48] sm:$0xff] %v2396_v30  ;;  %v2144_v23 = vpop.permute.xlu1 %2143  ;;  %v2356_v32 = vmul.f32 %v2786_v28, %v2179_v50  ;;  %v2389_v0 = vadd.f32 %v2319_v7, %v2287_v10  ;;  %v2796_v30 = vld [vmem:[#allocation3 + $0x40] sm:$0xff]  ;;  %v2797_v50 = vld [vmem:[#allocation3 + $0x188] sm:$0xff]  ;;  %v2799_v28 = vld [vmem:[#allocation3 + $0x150] sm:$0xff] }
 0x333   :  { %2443 = vst [vmem:[#allocation8 + $0x10] sm:$0xff] %v2382_v60  ;;  %v2349_v48 = vmul.f32 %v2788_v49, %v2144_v23  ;;  %v2289_v36 = vmul.f32 %v2796_v30, %v4807_v41  ;;  %v2407_v60 = vadd.f32 %v2328_v54, %v2296_v19  ;;  %v2298_v41 = vmul.f32 %v2801_v58, %v4811_v52  ;;  %v2802_v49 = vld [vmem:[#allocation3 + $0x50] sm:$0xff]  ;;  %v2810_v19 = vld [vmem:[#allocation3 + $0x298] sm:$0xff] }
 0x334   :  { %v2400_v16 = vadd.f32 %v2399_v55, %v2356_v32  ;;  %v2330_v55 = vmul.f32 %v2797_v50, %v4891_v1  ;;  %v2323_v32 = vmul.f32 %v2799_v28, %v4893_v42  ;;  %v2806_v52 = vld [vmem:[#allocation3 + $0x250] sm:$0xff] }
 0x335   :  { %v2386_v20 = vadd.f32 %v2385_v8, %v2349_v48  ;;  %v2189_v59 = vpop.permute.xlu0 %2188  ;;  %v2393_v23 = vadd.f32 %v2321_v4, %v2289_v36  ;;  %v2291_v48 = vmul.f32 %v2802_v49, %v4815_v33  ;;  %v2811_v30 = vld [vmem:[#allocation3 + $0x170] sm:$0xff] }
 0x336   :  { %2452 = vst [vmem:[#allocation8 + $0x58] sm:$0xff] %v2400_v16  ;;  %v2154_v38 = vpop.permute.xlu1 %2153  ;;  %v2358_v22 = vmul.f32 %v2792_v11, %v2189_v59  ;;  %v2411_v21 = vadd.f32 %v2330_v55, %v2298_v41  ;;  %v2803_v16 = vld [vmem:[#allocation3 + $0x198] sm:$0xff]  ;;  %v2327_v36 = vmul.f32 %v2811_v30, %v4901_v24  ;;  %v2814_v50 = vld [vmem:[#allocation3 + $0x70] sm:$0xff]  ;;  %v5651_v30 = vld [vmem:[#allocation68_spill] sm:$0xff] }
 0x337   :  { %2445 = vst [vmem:[#allocation8 + $0x20] sm:$0xff] %v2386_v20  ;;  %v2351_v6 = vmul.f32 %v2794_v47, %v2154_v38  ;;  %v2332_v13 = vmul.f32 %v2803_v16, %v4895_v12  ;;  %v2804_v20 = vld [vmem:[#allocation3 + $0x288] sm:$0xff]  ;;  %v2397_v59 = vadd.f32 %v2323_v32, %v2291_v48  ;;  %v2807_v38 = vld [vmem:[#allocation3 + $0x98] sm:$0xff]  ;;  %v2295_v55 = vmul.f32 %v2814_v50, %v4831_v39  ;;  %v2820_v48 = vld [vmem:[#allocation3 + $0x80] sm:$0xff] }
 0x338   :  { %v2404_v15 = vadd.f32 %v2403_v46, %v2358_v22  ;;  %v2805_v46 = vld [vmem:[#allocation3 + $0x160] sm:$0xff]  ;;  %v2300_v33 = vmul.f32 %v2807_v38, %v4819_v61  ;;  %v2809_v47 = vld [vmem:[#allocation3 + $0x1a8] sm:$0xff]  ;;  %v2826_v38 = vld [vmem:[#allocation3 + $0x90] sm:$0xff] }
 0x339   :  { %v2390_v14 = vadd.f32 %v2389_v0, %v2351_v6  ;;  %v2199_v56 = vpop.permute.xlu0 %2198  ;;  %v2325_v9 = vmul.f32 %v2805_v46, %v4897_v51  ;;  %v2808_v22 = vld [vmem:[#allocation3 + $0x60] sm:$0xff]  ;;  %v2334_v6 = vmul.f32 %v2809_v47, %v4899_v63  ;;  %v2816_v32 = vld [vmem:[#allocation3 + $0x2a8] sm:$0xff] }
 0x33a   :  { %2454 = vst [vmem:[#allocation8 + $0x68] sm:$0xff] %v2404_v15  ;;  %v2164_v45 = vpop.permute.xlu1 %2163  ;;  %v2360_v57 = vmul.f32 %v2798_v53, %v2199_v56  ;;  %v2293_v0 = vmul.f32 %v2808_v22, %v4823_v17  ;;  %v2415_v4 = vadd.f32 %v2332_v13, %v2300_v33  ;;  %v2812_v61 = vld [vmem:[#allocation3 + $0x260] sm:$0xff]  ;;  %v2813_v56 = vld [vmem:[#allocation3 + $0xa8] sm:$0xff]  ;;  %v2299_v33 = vmul.f32 %v2826_v38, %v4844_v34 }
 0x33b   :  { %2447 = vst [vmem:[#allocation8 + $0x30] sm:$0xff] %v2390_v14  ;;  %v2353_v8 = vmul.f32 %v2800_v26, %v2164_v45  ;;  %v2302_v17 = vmul.f32 %v2813_v56, %v4827_v44  ;;  %v2405_v26 = vadd.f32 %v2327_v36, %v2295_v55  ;;  %v2818_v44 = vld [vmem:[#allocation3 + $0x270] sm:$0xff]  ;;  %v2821_v16 = vld [vmem:[#allocation3 + $0x1c8] sm:$0xff]  ;;  %v5653_v55 = vld [vmem:[#allocation35_spill] sm:$0xff] }
 0x33c   :  { %v2408_v7 = vadd.f32 %v2407_v60, %v2360_v57  ;;  %v2401_v15 = vadd.f32 %v2325_v9, %v2293_v0  ;;  %v2815_v57 = vld [vmem:[#allocation3 + $0x1b8] sm:$0xff]  ;;  %v2338_v13 = vmul.f32 %v2821_v16, %v4907_v27  ;;  %v2833_v50 = vld [vmem:[#allocation3 + $0x1e8] sm:$0xff]  ;;  %v5657_v16 = vld [vmem:[#allocation118_spill] sm:$0xff] }
 0x33d   :  { %v2394_v18 = vadd.f32 %v2393_v23, %v2353_v8  ;;  %v2209_v1 = vpop.permute.xlu0 %2208  ;;  %v2419_v53 = vadd.f32 %v2334_v6, %v2302_v17  ;;  %v2336_v23 = vmul.f32 %v2815_v57, %v4903_v43  ;;  %v2817_v8 = vld [vmem:[#allocation3 + $0x180] sm:$0xff]  ;;  %v2827_v0 = vld [vmem:[#allocation3 + $0x1d8] sm:$0xff] }
 0x33e   :  { %2456 = vst [vmem:[#allocation8 + $0x78] sm:$0xff] %v2408_v7  ;;  %v2174_v10 = vpop.permute.xlu1 %2173  ;;  %v2362_v42 = vmul.f32 %v2804_v20, %v2209_v1  ;;  %v2329_v58 = vmul.f32 %v2817_v8, %v4905_v29  ;;  %v2819_v7 = vld [vmem:[#allocation3 + $0xb8] sm:$0xff]  ;;  %v2829_v6 = vld [vmem:[#allocation3 + $0x1a0] sm:$0xff] }
 0x33f   :  { %2449 = vst [vmem:[#allocation8 + $0x40] sm:$0xff] %v2394_v18  ;;  %v2355_v54 = vmul.f32 %v2806_v52, %v2174_v10  ;;  %v2304_v39 = vmul.f32 %v2819_v7, %v4833_v62  ;;  %v2297_v18 = vmul.f32 %v2820_v48, %v4837_v31  ;;  %v2822_v20 = vld [vmem:[#allocation3 + $0x2b8] sm:$0xff]  ;;  %v2824_v62 = vld [vmem:[#allocation3 + $0x280] sm:$0xff]  ;;  %v2825_v52 = vld [vmem:[#allocation3 + $0xc8] sm:$0xff] }
 0x340   :  { %v2412_v11 = vadd.f32 %v2411_v21, %v2362_v42  ;;  %v2306_v31 = vmul.f32 %v2825_v52, %v4840_v37  ;;  %v2830_v37 = vld [vmem:[#allocation3 + $0x290] sm:$0xff] }
 0x341   :  { %v2398_v3 = vadd.f32 %v2397_v59, %v2355_v54  ;;  %v2219_v12 = vpop.permute.xlu0 %2218  ;;  %v2423_v21 = vadd.f32 %v2336_v23, %v2304_v39  ;;  %v2409_v42 = vadd.f32 %v2329_v58, %v2297_v18  ;;  %v2823_v59 = vld [vmem:[#allocation3 + $0x190] sm:$0xff]  ;;  %v2837_v58 = vld [vmem:[#allocation3 + $0xe8] sm:$0xff] }
 0x342   :  { %2458 = vst [vmem:[#allocation8 + $0x88] sm:$0xff] %v2412_v11  ;;  %v2184_v35 = vpop.permute.xlu1 %2183  ;;  %v2364_v51 = vmul.f32 %v2810_v19, %v2219_v12  ;;  %v2331_v46 = vmul.f32 %v2823_v59, %v4909_v2  ;;  %v2427_v22 = vadd.f32 %v2338_v13, %v2306_v31  ;;  %v2838_v39 = vld [vmem:[#allocation3 + $0xb0] sm:$0xff]  ;;  %v2841_v59 = vld [vmem:[#allocation3 + $0x1c0] sm:$0xff]  ;;  %v2843_v31 = vld [vmem:[#allocation3 + $0xf8] sm:$0xff] }
 0x343   :  { %2451 = vst [vmem:[#allocation8 + $0x50] sm:$0xff] %v2398_v3  ;;  %v2357_v14 = vmul.f32 %v2812_v61, %v2184_v35  ;;  %v2340_v3 = vmul.f32 %v2827_v0, %v4911_v40  ;;  %v5650_v35 = vld [vmem:[#allocation34_spill] sm:$0xff]  ;;  %v2832_v61 = vld [vmem:[#allocation3 + $0xa0] sm:$0xff] }
 0x344   :  { %v2416_v60 = vadd.f32 %v2415_v4, %v2364_v51  ;;  %v2828_v4 = vld [vmem:[#allocation3 + $0x2c8] sm:$0xff]  ;;  %v2413_v47 = vadd.f32 %v2331_v46, %v2299_v33  ;;  %v2333_v19 = vmul.f32 %v2829_v6, %v5650_v35  ;;  %v2846_v35 = vld [vmem:[#allocation3 + $0x1d0] sm:$0xff] }
 0x345   :  { %v2402_v45 = vadd.f32 %v2401_v15, %v2357_v14  ;;  %v2229_v63 = vpop.permute.xlu0 %2228  ;;  %v2831_v15 = vld [vmem:[#allocation3 + $0xd8] sm:$0xff]  ;;  %v5658_v46 = vld [vmem:[#allocation73_spill] sm:$0xff] }
 0x346   :  { %2460 = vst [vmem:[#allocation8 + $0x98] sm:$0xff] %v2416_v60  ;;  %v2194_v28 = vpop.permute.xlu1 %2193  ;;  %v2366_v24 = vmul.f32 %v2816_v32, %v2229_v63  ;;  %v2308_v34 = vmul.f32 %v2831_v15, %v5651_v30  ;;  %v5652_v14 = vld [vmem:[#allocation63_spill] sm:$0xff]  ;;  %v5654_v32 = vld [vmem:[#allocation76_spill] sm:$0xff] }
 0x347   :  { %2453 = vst [vmem:[#allocation8 + $0x60] sm:$0xff] %v2402_v45  ;;  %v2359_v41 = vmul.f32 %v2818_v44, %v2194_v28  ;;  %v2301_v56 = vmul.f32 %v2832_v61, %v5652_v14  ;;  %v2342_v45 = vmul.f32 %v2833_v50, %v5653_v55  ;;  %v2835_v28 = vld [vmem:[#allocation3 + $0x1b0] sm:$0xff]  ;;  %v5655_v44 = vld [vmem:[#allocation112_spill] sm:$0xff] }
 0x348   :  { %v2420_v49 = vadd.f32 %v2419_v53, %v2366_v24  ;;  %v2431_v60 = vadd.f32 %v2340_v3, %v2308_v34  ;;  %v2834_v53 = vld [vmem:[#allocation3 + $0x2d8] sm:$0xff]  ;;  %v2335_v24 = vmul.f32 %v2835_v28, %v5654_v32  ;;  %v2848_v34 = vld [vmem:[#allocation3 + $0xd0] sm:$0xff] }
 0x349   :  { %v2406_v1 = vadd.f32 %v2405_v26, %v2359_v41  ;;  %v2239_v43 = vpop.permute.xlu0 %2238  ;;  %v2417_v23 = vadd.f32 %v2333_v19, %v2301_v56  ;;  %v2836_v26 = vld [vmem:[#allocation3 + $0x2a0] sm:$0xff]  ;;  %v2310_v41 = vmul.f32 %v2837_v58, %v5655_v44  ;;  %v5661_v19 = vld [vmem:[#allocation114_spill] sm:$0xff]  ;;  %v5664_v44 = vld [vmem:[#allocation113_spill] sm:$0xff] }
 0x34a   :  { %2462 = vst [vmem:[#allocation8 + $0xa8] sm:$0xff] %v2420_v49  ;;  %v2204_v10 = vpop.permute.xlu1 %2203  ;;  %v2368_v29 = vmul.f32 %v2822_v20, %v2239_v43  ;;  %v5656_v49 = vld [vmem:[#allocation69_spill] sm:$0xff]  ;;  %v2850_v50 = vld [vmem:[#allocation3 + $0x2d0] sm:$0xff] }
 0x34b   :  { %2455 = vst [vmem:[#allocation8 + $0x70] sm:$0xff] %v2406_v1  ;;  %v2361_v9 = vmul.f32 %v2824_v62, %v2204_v10  ;;  %v2303_v48 = vmul.f32 %v2838_v39, %v5656_v49  ;;  %v2435_v43 = vadd.f32 %v2342_v45, %v2310_v41  ;;  %v2840_v20 = vld [vmem:[#allocation3 + $0x2e8] sm:$0xff]  ;;  %v2337_v62 = vmul.f32 %v2841_v59, %v5658_v46  ;;  %v2851_v45 = vld [vmem:[#allocation3 + $0xe0] sm:$0xff]  ;;  %v2852_v32 = vld [vmem:[#allocation3 + $0x1f0] sm:$0xff] }
 0x34c   :  { %v2424_v54 = vadd.f32 %v2423_v21, %v2368_v29  ;;  %v2839_v21 = vld [vmem:[#allocation3 + $0x1f8] sm:$0xff]  ;;  %v2854_v58 = vld [vmem:[#allocation3 + $0xf0] sm:$0xff] }
 0x34d   :  { %v2410_v11 = vadd.f32 %v2409_v42, %v2361_v9  ;;  %v2249_v27 = vpop.permute.xlu0 %2248  ;;  %v2344_v13 = vmul.f32 %v2839_v21, %v5657_v16  ;;  %v2421_v42 = vadd.f32 %v2335_v24, %v2303_v48  ;;  %v2842_v9 = vld [vmem:[#allocation3 + $0x2b0] sm:$0xff]  ;;  %v2343_v24 = vmul.f32 %v2852_v32, %v4930_v5 }
 0x34e   :  { %2464 = vst [vmem:[#allocation8 + $0xb8] sm:$0xff] %v2424_v54  ;;  %v2214_v12 = vpop.permute.xlu1 %2213  ;;  %v2370_v2 = vmul.f32 %v2828_v4, %v2249_v27  ;;  %v5659_v54 = vld [vmem:[#allocation64_spill] sm:$0xff]  ;;  %v5660_v27 = vld [vmem:[#allocation33_spill] sm:$0xff]  ;;  %v2311_v41 = vmul.f32 %v2854_v58, %v5664_v44  ;;  %v2855_v49 = vld [vmem:[#allocation3 + $0x2f0] sm:$0xff] }
 0x34f   :  { %2457 = vst [vmem:[#allocation8 + $0x80] sm:$0xff] %v2410_v11  ;;  %v2363_v51 = vmul.f32 %v2830_v37, %v2214_v12  ;;  %v2312_v38 = vmul.f32 %v2843_v31, %v5659_v54  ;;  %v2844_v11 = vld [vmem:[#allocation3 + $0xc0] sm:$0xff]  ;;  %v2339_v37 = vmul.f32 %v2846_v35, %v5661_v19 }
 0x350   :  { %v2428_v36 = vadd.f32 %v2427_v22, %v2370_v2  ;;  %v2305_v22 = vmul.f32 %v2844_v11, %v5660_v27  ;;  %v2845_v2 = vld [vmem:[#allocation3 + $0x2f8] sm:$0xff]  ;;  %v2437_v39 = vadd.f32 %v2343_v24, %v2311_v41 }
 0x351   :  { %v2414_v17 = vadd.f32 %v2413_v47, %v2363_v51  ;;  %v2259_v40 = vpop.permute.xlu0 %2258  ;;  %v2439_v12 = vadd.f32 %v2344_v13, %v2312_v38  ;;  %v2847_v51 = vld [vmem:[#allocation3 + $0x2c0] sm:$0xff] }
 0x352   :  { %2466 = vst [vmem:[#allocation8 + $0xc8] sm:$0xff] %v2428_v36  ;;  %v2224_v63 = vpop.permute.xlu1 %2223  ;;  %v2372_v57 = vmul.f32 %v2834_v53, %v2259_v40  ;;  %v2425_v6 = vadd.f32 %v2337_v62, %v2305_v22  ;;  %v5662_v36 = vld [vmem:[#allocation117_spill] sm:$0xff]  ;;  %v2849_v40 = vld [vmem:[#allocation3 + $0x1e0] sm:$0xff] }
 0x353   :  { %2459 = vst [vmem:[#allocation8 + $0x90] sm:$0xff] %v2414_v17  ;;  %v2365_v8 = vmul.f32 %v2836_v26, %v2224_v63  ;;  %v2307_v61 = vmul.f32 %v2848_v34, %v5662_v36  ;;  %v5663_v63 = vld [vmem:[#allocation72_spill] sm:$0xff] }
 0x354   :  { %v2432_v7 = vadd.f32 %v2431_v60, %v2372_v57  ;;  %v2341_v60 = vmul.f32 %v2849_v40, %v4927_v25  ;;  %v2309_v53 = vmul.f32 %v2851_v45, %v5663_v63  ;;  %v2853_v26 = vld [vmem:[#allocation3 + $0x2e0] sm:$0xff] }
 0x355   :  { %v2418_v18 = vadd.f32 %v2417_v23, %v2365_v8  ;;  %v2269_v1 = vpop.permute.xlu0 %2268  ;;  %v2429_v17 = vadd.f32 %v2339_v37, %v2307_v61 }
 0x356   :  { %2468 = vst [vmem:[#allocation8 + $0xd8] sm:$0xff] %v2432_v7  ;;  %v2234_v10 = vpop.permute.xlu1 %2233  ;;  %v2374_v29 = vmul.f32 %v2840_v20, %v2269_v1  ;;  %v2433_v28 = vadd.f32 %v2341_v60, %v2309_v53 }
 0x357   :  { %2461 = vst [vmem:[#allocation8 + $0xa0] sm:$0xff] %v2418_v18  ;;  %v2367_v52 = vmul.f32 %v2842_v9, %v2234_v10 }
 0x358   :  { %v2436_v33 = vadd.f32 %v2435_v43, %v2374_v29 }
 0x359   :  { %v2422_v0 = vadd.f32 %v2421_v42, %v2367_v52  ;;  %v2279_v3 = vpop.permute.xlu0 %2278 }
 0x35a   :  { %2470 = vst [vmem:[#allocation8 + $0xe8] sm:$0xff] %v2436_v33  ;;  %v2244_v4 = vpop.permute.xlu1 %2243  ;;  %v2376_v47 = vmul.f32 %v2845_v2, %v2279_v3 }
 0x35b   :  { %2463 = vst [vmem:[#allocation8 + $0xb0] sm:$0xff] %v2422_v0  ;;  %v2369_v15 = vmul.f32 %v2847_v51, %v2244_v4 }
 0x35c   :  { %v2440_v30 = vadd.f32 %v2439_v12, %v2376_v47 }
 0x35d   :  { %v2426_v14 = vadd.f32 %v2425_v6, %v2369_v15 }
 0x35e   :  { %2472 = vst [vmem:[#allocation8 + $0xf8] sm:$0xff] %v2440_v30  ;;  %v2254_v56 = vpop.permute.xlu1 %2253 }
 0x35f   :  { %2465 = vst [vmem:[#allocation8 + $0xc0] sm:$0xff] %v2426_v14  ;;  %v2371_v55 = vmul.f32 %v2850_v50, %v2254_v56 }
 0x361   :  { %v2430_v57 = vadd.f32 %v2429_v17, %v2371_v55 }
 0x362   :  { %v2264_v23 = vpop.permute.xlu1 %2263 }
 0x363   :  { %2467 = vst [vmem:[#allocation8 + $0xd0] sm:$0xff] %v2430_v57  ;;  %v2373_v8 = vmul.f32 %v2853_v26, %v2264_v23 }
 0x365   :  { %v2434_v7 = vadd.f32 %v2433_v28, %v2373_v8 }
 0x366   :  { %v2274_v25 = vpop.permute.xlu1 %2273 }
 0x367   :  { %2469 = vst [vmem:[#allocation8 + $0xe0] sm:$0xff] %v2434_v7  ;;  %v2375_v48 = vmul.f32 %v2855_v49, %v2274_v25 }
 0x369   :  { %v2438_v18 = vadd.f32 %v2437_v39, %v2375_v48 }
 0x36b   :  { %2471 = vst [vmem:[#allocation8 + $0xf0] sm:$0xff] %v2438_v18 }
 0x36c   :  { %2911 = shalt.err (!%p2908_p6)
}
 0x36d   :  { %s2912_s25 = scalar_lea.hbm %s5008_s5, 4096 }
 0x36e   :  { %p2913_p7 = scmp.ne.s32.totalorder %s5008_s5, %s2912_s25  ;;  %p2916_p8 = scmp.lt.u32.totalorder %s2912_s25, %s5008_s5 }
 0x370   :  { %p2918_p9 = pnand %p2916_p8, %p2913_p7 }
 0x372   :  { %2921 = shalt.err (!%p2918_p9)
}
 0x373   :  { %2484 = dma.vmem_to_hbm [thread:$0]  %s2479_s21, 4096, %s5008_s5, [#allocation5], %s2929_s29, %s2929_s29, %s2930_s30  }
 0x374   :  { %2926 = dma.done.wait [#allocation5], 4096  }
 0x375   :  { %2927 = vsyncadd [#allocation5], 4294963200 }
 0x376   :  { %2488 = vsyncpa [#allocation4], 1 }
 0x377   :  { %2489 = vsyncpa [#allocation7], 1 }
 0x378   :  { %2490 = vsyncpa [#allocation5], 1 }

</bundles_post_ra>
